<compile_context>
chip_gen: v7x
topology: tpu7x:2x2x1
jax: 0.10.0
libtpu: 0.0.40
codegen_flags: <defaults>
</compile_context>

<pallas_src>
import math
from functools import partial

import jax
import jax.numpy as jnp
from jax import lax
from jax.experimental import pallas as pl
from jax.experimental.pallas import tpu as pltpu

EPS = 1e-5
COMPUTE_DTYPE = jnp.bfloat16        # MXU operand dtype; accum / BN math stay f32


# --------------------------------------------------------------------------
# helpers
# --------------------------------------------------------------------------
def _row_tile(M, max_tile=256):
    """Row tile that divides M, is a multiple of 8 (sublane) or the full M, and
    is capped so the row grid keeps >=2 parallel steps when M is large."""
    if M <= max_tile or M % 8:
        return M
    t = min((max_tile // 8) * 8, (M // 2 // 8) * 8)
    while t > 8 and M % t:
        t -= 8
    return t if t >= 8 and M % t == 0 else M


def _itemsize(dt):
    return jnp.dtype(dt).itemsize


# --------------------------------------------------------------------------
# Pallas kernels
# --------------------------------------------------------------------------
def _mm_bn_kernel(x_ref, w_ref, s_ref, t_ref, o_ref, *, relu):
    # 1x1 conv (matmul) + folded BN (+ReLU) epilogue; bf16 operands, f32 accum.
    acc = jnp.dot(x_ref[...], w_ref[...], preferred_element_type=jnp.float32)
    y = acc * s_ref[...] + t_ref[...]
    if relu:
        y = jnp.maximum(y, 0.0)
    o_ref[...] = y.astype(o_ref.dtype)


def matmul_bn(x, w, scale, shift, *, relu, out_dtype):
    """relu?( (x @ w) * scale + shift ) -- fused 1x1-conv + BN(eval) (+ReLU)."""
    M, K = x.shape
    Nc = w.shape[1]
    tm = _row_tile(M)
    bytes_io = (x.size * _itemsize(x.dtype) + w.size * _itemsize(w.dtype)
                + 2 * Nc * 4 + M * Nc * _itemsize(out_dtype))
    return pl.pallas_call(
        partial(_mm_bn_kernel, relu=relu),
        out_shape=jax.ShapeDtypeStruct((M, Nc), out_dtype),
        grid=(M // tm,),
        in_specs=[pl.BlockSpec((tm, K), lambda i: (i, 0)),
                  pl.BlockSpec((K, Nc), lambda i: (0, 0)),
                  pl.BlockSpec((1, Nc), lambda i: (0, 0)),
                  pl.BlockSpec((1, Nc), lambda i: (0, 0))],
        out_specs=pl.BlockSpec((tm, Nc), lambda i: (i, 0)),
        compiler_params=pltpu.CompilerParams(dimension_semantics=("parallel",)),
        cost_estimate=pl.CostEstimate(flops=2 * M * K * Nc, transcendentals=0,
                                      bytes_accessed=bytes_io),
    )(x, w, scale.reshape(1, Nc), shift.reshape(1, Nc))


def _conv3x3_bn_relu_kernel(xp_ref, w_ref, s_ref, t_ref, o_ref):
    # 3x3 conv (padding already applied), 9 shifted-window matmuls accumulated
    # in f32, BN + ReLU epilogue.  xp_ref: (1, H+2, W+2, Cin), o_ref: (1, H*W, Cout).
    _, HW, Cout = o_ref.shape
    _, Hp, Wp, Cin = xp_ref.shape
    H, W = Hp - 2, Wp - 2
    acc = jnp.zeros((HW, Cout), jnp.float32)
    for tap in range(9):                                  # unrolled 9-tap loop
        dy, dx = tap // 3, tap % 3
        patch = xp_ref[0, dy:dy + H, dx:dx + W, :].reshape(H * W, Cin)
        acc = acc + jnp.dot(patch, w_ref[tap * Cin:(tap + 1) * Cin, :],
                            preferred_element_type=jnp.float32)
    y = jnp.maximum(acc * s_ref[...] + t_ref[...], 0.0)
    o_ref[0] = y.astype(o_ref.dtype)


def conv3x3_bn_relu(x_nhwc, w9, scale, shift, *, out_dtype):
    """relu(BN(conv3x3(x))) with padding=1, stride=1.
    x_nhwc: (N,H,W,Cin); w9: (9*Cin, Cout), rows ordered (ky, kx, cin).
    Returns (N, H*W, Cout)."""
    N, H, W, Cin = x_nhwc.shape
    Cout = w9.shape[1]
    xp = jnp.pad(x_nhwc, ((0, 0), (1, 1), (1, 1), (0, 0)))
    bytes_io = (xp.size * _itemsize(xp.dtype) + w9.size * _itemsize(w9.dtype)
                + 2 * Cout * 4 + N * H * W * Cout * _itemsize(out_dtype))
    return pl.pallas_call(
        _conv3x3_bn_relu_kernel,
        out_shape=jax.ShapeDtypeStruct((N, H * W, Cout), out_dtype),
        grid=(N,),
        in_specs=[pl.BlockSpec((1, H + 2, W + 2, Cin), lambda n: (n, 0, 0, 0)),
                  pl.BlockSpec((9 * Cin, Cout), lambda n: (0, 0)),
                  pl.BlockSpec((1, Cout), lambda n: (0, 0)),
                  pl.BlockSpec((1, Cout), lambda n: (0, 0))],
        out_specs=pl.BlockSpec((1, H * W, Cout), lambda n: (n, 0, 0)),
        compiler_params=pltpu.CompilerParams(dimension_semantics=("parallel",)),
        cost_estimate=pl.CostEstimate(flops=2 * N * H * W * 9 * Cin * Cout,
                                      transcendentals=0, bytes_accessed=bytes_io),
    )(xp, w9, scale.reshape(1, Cout), shift.reshape(1, Cout))


def _res_proj_kernel(h_ref, w3_ref, s3_ref, t3_ref,
                     x_ref, ws_ref, ss_ref, ts_ref, o_ref):
    # relu( BN3(h @ w3) + BN_sc(x @ w_sc) )  -- conv3 + projection shortcut fused.
    main = jnp.dot(h_ref[...], w3_ref[...], preferred_element_type=jnp.float32)
    main = main * s3_ref[...] + t3_ref[...]
    sc = jnp.dot(x_ref[...], ws_ref[...], preferred_element_type=jnp.float32)
    sc = sc * ss_ref[...] + ts_ref[...]
    o_ref[...] = jnp.maximum(main + sc, 0.0).astype(o_ref.dtype)


def conv3_add_relu_proj(h, w3, s3, t3, xs, wsc, ssc, tsc):
    M, K1 = h.shape
    Cout = w3.shape[1]
    K2 = xs.shape[1]
    tm = _row_tile(M)
    bytes_io = ((h.size + xs.size) * _itemsize(h.dtype)
                + (w3.size + wsc.size) * _itemsize(w3.dtype)
                + 4 * Cout * 4 + M * Cout * 4)
    return pl.pallas_call(
        _res_proj_kernel,
        out_shape=jax.ShapeDtypeStruct((M, Cout), jnp.float32),
        grid=(M // tm,),
        in_specs=[pl.BlockSpec((tm, K1), lambda i: (i, 0)),
                  pl.BlockSpec((K1, Cout), lambda i: (0, 0)),
                  pl.BlockSpec((1, Cout), lambda i: (0, 0)),
                  pl.BlockSpec((1, Cout), lambda i: (0, 0)),
                  pl.BlockSpec((tm, K2), lambda i: (i, 0)),
                  pl.BlockSpec((K2, Cout), lambda i: (0, 0)),
                  pl.BlockSpec((1, Cout), lambda i: (0, 0)),
                  pl.BlockSpec((1, Cout), lambda i: (0, 0))],
        out_specs=pl.BlockSpec((tm, Cout), lambda i: (i, 0)),
        compiler_params=pltpu.CompilerParams(dimension_semantics=("parallel",)),
        cost_estimate=pl.CostEstimate(flops=2 * M * (K1 + K2) * Cout,
                                      transcendentals=0, bytes_accessed=bytes_io),
    )(h, w3, s3.reshape(1, Cout), t3.reshape(1, Cout),
      xs, wsc, ssc.reshape(1, Cout), tsc.reshape(1, Cout))


def _res_id_kernel(h_ref, w3_ref, s3_ref, t3_ref, x_ref, o_ref):
    # relu( BN3(h @ w3) + x )  -- conv3 + identity shortcut fused.
    main = jnp.dot(h_ref[...], w3_ref[...], preferred_element_type=jnp.float32)
    main = main * s3_ref[...] + t3_ref[...]
    o_ref[...] = jnp.maximum(main + x_ref[...].astype(jnp.float32),
                             0.0).astype(o_ref.dtype)


def conv3_add_relu_identity(h, w3, s3, t3, x_id):
    M, K1 = h.shape
    Cout = w3.shape[1]
    tm = _row_tile(M)
    bytes_io = (h.size * _itemsize(h.dtype) + x_id.size * _itemsize(x_id.dtype)
                + w3.size * _itemsize(w3.dtype) + 2 * Cout * 4 + M * Cout * 4)
    return pl.pallas_call(
        _res_id_kernel,
        out_shape=jax.ShapeDtypeStruct((M, Cout), jnp.float32),
        grid=(M // tm,),
        in_specs=[pl.BlockSpec((tm, K1), lambda i: (i, 0)),
                  pl.BlockSpec((K1, Cout), lambda i: (0, 0)),
                  pl.BlockSpec((1, Cout), lambda i: (0, 0)),
                  pl.BlockSpec((1, Cout), lambda i: (0, 0)),
                  pl.BlockSpec((tm, Cout), lambda i: (i, 0))],
        out_specs=pl.BlockSpec((tm, Cout), lambda i: (i, 0)),
        compiler_params=pltpu.CompilerParams(dimension_semantics=("parallel",)),
        cost_estimate=pl.CostEstimate(flops=2 * M * K1 * Cout,
                                      transcendentals=0, bytes_accessed=bytes_io),
    )(h, w3, s3.reshape(1, Cout), t3.reshape(1, Cout), x_id)


# --------------------------------------------------------------------------
# deterministic parameter construction (eval-mode folded BatchNorm)
# --------------------------------------------------------------------------
class KeyGen:
    def __init__(self, seed):
        self.key = jax.random.PRNGKey(seed)

    def __call__(self):
        self.key, sub = jax.random.split(self.key)
        return sub


def make_conv(kg, kh, kw, cin, cout):
    fan_in = kh * kw * cin
    w = jax.random.normal(kg(), (kh, kw, cin, cout), jnp.float32)
    w = w * math.sqrt(2.0 / fan_in)
    return w.reshape(kh * kw * cin, cout)      # rows ordered (kh, kw, cin) = HWIO flat


def make_bn(kg, c):
    gamma = 1.0 + 0.1 * jax.random.normal(kg(), (c,), jnp.float32)
    beta = 0.1 * jax.random.normal(kg(), (c,), jnp.float32)
    rmean = 0.1 * jax.random.normal(kg(), (c,), jnp.float32)
    rvar = 1.0 + 0.1 * jax.random.uniform(kg(), (c,), jnp.float32)
    scale = gamma / jnp.sqrt(rvar + EPS)
    shift = beta - rmean * scale
    return scale, shift


def build_bottleneck_params(seed, in_planes, planes, stride, expansion=4):
    kg = KeyGen(seed)
    out_planes = expansion * planes
    p = {'conv1_w': make_conv(kg, 1, 1, in_planes, planes),
         'bn1': make_bn(kg, planes),
         'conv2_w': make_conv(kg, 3, 3, planes, planes),
         'bn2': make_bn(kg, planes),
         'conv3_w': make_conv(kg, 1, 1, planes, out_planes),
         'bn3': make_bn(kg, out_planes)}
    if stride != 1 or in_planes != out_planes:
        p['sc_conv_w'] = make_conv(kg, 1, 1, in_planes, out_planes)
        p['sc_bn'] = make_bn(kg, out_planes)
    return p


# --------------------------------------------------------------------------
# Bottleneck forward (Pallas)
# --------------------------------------------------------------------------
def bottleneck_forward(x_nchw, params, stride=1, expansion=4,
                       compute_dtype=COMPUTE_DTYPE):
    N, Cin, H, W = x_nchw.shape
    planes = params['conv1_w'].shape[1]
    out_planes = expansion * planes

    x_nhwc = jnp.transpose(x_nchw, (0, 2, 3, 1))
    xb = x_nhwc.astype(compute_dtype)
    x_flat = xb.reshape(N * H * W, Cin)

    # conv1 (1x1) + bn1 + relu1 -- fused epilogue
    s1, t1 = params['bn1']
    h1 = matmul_bn(x_flat, params['conv1_w'].astype(compute_dtype), s1, t1,
                   relu=True, out_dtype=compute_dtype)

    # conv2 (3x3, pad=1) + bn2 + relu2 -- 9-tap in-kernel accumulation
    s2, t2 = params['bn2']
    h2 = conv3x3_bn_relu(h1.reshape(N, H, W, planes),
                         params['conv2_w'].astype(compute_dtype), s2, t2,
                         out_dtype=compute_dtype)          # (N, H*W, planes)
    h2 = h2.reshape(N, H, W, planes)
    if stride > 1:
        # TODO(synk): stride>1 is handled by full stride-1 conv then subsampling
        # (numerically identical to a strided conv, but recomputes skipped rows).
        h2 = h2[:, ::stride, ::stride, :]
    Ho, Wo = h2.shape[1], h2.shape[2]
    h2_flat = h2.reshape(N * Ho * Wo, planes)

    # conv3 (1x1) + bn3 + shortcut + residual add + relu3 -- single fused kernel
    s3, t3 = params['bn3']
    if stride != 1 or Cin != out_planes:
        ssc, tsc = params['sc_bn']
        xs = xb[:, ::stride, ::stride, :].reshape(N * Ho * Wo, Cin)
        out = conv3_add_relu_proj(h2_flat,
                                  params['conv3_w'].astype(compute_dtype), s3, t3,
                                  xs, params['sc_conv_w'].astype(compute_dtype),
                                  ssc, tsc)
    else:
        out = conv3_add_relu_identity(h2_flat,
                                      params['conv3_w'].astype(compute_dtype),
                                      s3, t3, x_flat)
    return out.reshape(N, Ho, Wo, out_planes).transpose(0, 3, 1, 2)


# --------------------------------------------------------------------------
# pure-JAX reference (mirrors the kernel math: bf16-rounded matmul operands,
# f32 accumulation, eval-mode folded BN)
# --------------------------------------------------------------------------
def _ref_forward(x_nchw, params, stride=1, expansion=4):
    def bf(a):
        return a.astype(jnp.bfloat16).astype(jnp.float32)

    N, Cin, H, W = x_nchw.shape
    planes = params['conv1_w'].shape[1]
    out_planes = expansion * planes
    x = bf(jnp.transpose(x_nchw, (0, 2, 3, 1)))

    s1, t1 = params['bn1']
    h = jnp.einsum('nhwc,cd->nhwd', x, bf(params['conv1_w']))
    h = bf(jax.nn.relu(h * s1 + t1))

    w2 = bf(params['conv2_w']).reshape(3, 3, planes, planes)
    h = lax.conv_general_dilated(h, w2, (1, 1), ((1, 1), (1, 1)),
                                 dimension_numbers=('NHWC', 'HWIO', 'NHWC'))
    s2, t2 = params['bn2']
    h = bf(jax.nn.relu(h * s2 + t2))
    if stride > 1:
        h = h[:, ::stride, ::stride, :]

    s3, t3 = params['bn3']
    main = jnp.einsum('nhwc,cd->nhwd', h, bf(params['conv3_w'])) * s3 + t3
    if stride != 1 or Cin != out_planes:
        ssc, tsc = params['sc_bn']
        xs = x[:, ::stride, ::stride, :]
        sc = jnp.einsum('nhwc,cd->nhwd', xs, bf(params['sc_conv_w'])) * ssc + tsc
    else:
        sc = x
    out = jax.nn.relu(main + sc)
    return jnp.transpose(out, (0, 3, 1, 2))


# --------------------------------------------------------------------------
if __name__ == "__main__":
    N, H, W = 2, 16, 16
    PLANES = 32
    STRIDE = 1

    configs = [
        # (in_planes) -> projection shortcut (in_planes != 4*planes)
        64,
        # (in_planes) -> identity shortcut (in_planes == 4*planes, stride 1)
        128,
    ]

    all_ok = True
    for idx, in_planes in enumerate(configs):
        x = jax.random.normal(jax.random.PRNGKey(0), (N, in_planes, H, W),
                              jnp.float32)
        params = build_bottleneck_params(seed=1 + idx, in_planes=in_planes,
                                         planes=PLANES, stride=STRIDE)

        fwd = jax.jit(lambda xx, pp: bottleneck_forward(xx, pp, stride=STRIDE))
        out = jax.block_until_ready(fwd(x, params))

        assert out.shape == (N, 4 * PLANES, H // STRIDE, W // STRIDE), out.shape
        assert bool(jnp.all(jnp.isfinite(out)))

        ref = _ref_forward(x, params, stride=STRIDE)
        ok = bool(jnp.allclose(out, ref, rtol=2e-2, atol=2e-2))
        assert ok, float(jnp.max(jnp.abs(out - ref)))
        all_ok = all_ok and ok

    if all_ok:
        print("KERNEL_OK")
</pallas_src>

<mosaic_0001>
module attributes {stable_mosaic.version = 11 : i64} {
  func.func @_mm_bn_kernel(%arg0: i32, %arg1: memref<256x64xbf16, #tpu.memory_space<vmem>>, %arg2: memref<64x32xbf16, #tpu.memory_space<vmem>>, %arg3: memref<1x32xf32, #tpu.memory_space<vmem>>, %arg4: memref<1x32xf32, #tpu.memory_space<vmem>>, %arg5: memref<256x32xbf16, #tpu.memory_space<vmem>>) attributes {dimension_semantics = [#tpu.dimension_semantics<parallel>], iteration_bounds = array<i64: 2>, scalar_prefetch = 0 : i64, scratch_operands = 0 : i64, tpu.core_type = #tpu.core_type<tc>, window_params = [{transform_indices = @transform_0, window_bounds = array<i64: 256, 64>}, {pipeline_mode = #tpu.pipeline_mode<synchronous>, transform_indices = @transform_1, window_bounds = array<i64: 64, 32>}, {pipeline_mode = #tpu.pipeline_mode<synchronous>, transform_indices = @transform_2, window_bounds = array<i64: 1, 32>}, {pipeline_mode = #tpu.pipeline_mode<synchronous>, transform_indices = @transform_3, window_bounds = array<i64: 1, 32>}, {transform_indices = @transform_4, window_bounds = array<i64: 256, 32>}]} {
    %c0 = arith.constant 0 : index
    %c0_0 = arith.constant 0 : index
    %0 = vector.load %arg1[%c0, %c0_0] : memref<256x64xbf16, #tpu.memory_space<vmem>>, vector<256x64xbf16>
    %c0_1 = arith.constant 0 : index
    %c0_2 = arith.constant 0 : index
    %1 = vector.load %arg2[%c0_1, %c0_2] : memref<64x32xbf16, #tpu.memory_space<vmem>>, vector<64x32xbf16>
    %cst = arith.constant dense<0.000000e+00> : vector<256x32xf32>
    %2 = tpu.matmul %0, %1, %cst {dimension_numbers = #tpu.dot_dimension_numbers<[1], [0], [0], [1], [0, 0, 1, 1], [], []>} : vector<256x64xbf16>, vector<64x32xbf16>, vector<256x32xf32> -> vector<256x32xf32>
    %c0_3 = arith.constant 0 : index
    %c0_4 = arith.constant 0 : index
    %3 = vector.load %arg3[%c0_3, %c0_4] : memref<1x32xf32, #tpu.memory_space<vmem>>, vector<1x32xf32>
    %4 = vector.broadcast %3 : vector<1x32xf32> to vector<256x32xf32>
    %5 = arith.mulf %2, %4 : vector<256x32xf32>
    %c0_5 = arith.constant 0 : index
    %c0_6 = arith.constant 0 : index
    %6 = vector.load %arg4[%c0_5, %c0_6] : memref<1x32xf32, #tpu.memory_space<vmem>>, vector<1x32xf32>
    %7 = vector.broadcast %6 : vector<1x32xf32> to vector<256x32xf32>
    %8 = arith.addf %5, %7 : vector<256x32xf32>
    %cst_7 = arith.constant 0.000000e+00 : f32
    %9 = vector.broadcast %cst_7 : f32 to vector<256x32xf32>
    %10 = arith.maximumf %8, %9 : vector<256x32xf32>
    %11 = arith.truncf %10 : vector<256x32xf32> to vector<256x32xbf16>
    %c0_8 = arith.constant 0 : index
    %c0_9 = arith.constant 0 : index
    %12 = vector.load %arg5[%c0_8, %c0_9] : memref<256x32xbf16, #tpu.memory_space<vmem>>, vector<256x32xbf16>
    tpu.vector_store %arg5[%c0_8, %c0_9], %11 {strides = array<i32>} : memref<256x32xbf16, #tpu.memory_space<vmem>>, vector<256x32xbf16>,
    return
  }
  func.func @transform_0(%arg0: i32) -> (i32, i32) {
    %c0_i32 = arith.constant 0 : i32
    %c0_i32_0 = arith.constant 0 : i32
    return %arg0, %c0_i32 : i32, i32
  }
  func.func @transform_1(%arg0: i32) -> (i32, i32) {
    %c0_i32 = arith.constant 0 : i32
    %c0_i32_0 = arith.constant 0 : i32
    %c0_i32_1 = arith.constant 0 : i32
    return %c0_i32, %c0_i32_0 : i32, i32
  }
  func.func @transform_2(%arg0: i32) -> (i32, i32) {
    %c0_i32 = arith.constant 0 : i32
    %c0_i32_0 = arith.constant 0 : i32
    %c0_i32_1 = arith.constant 0 : i32
    return %c0_i32, %c0_i32_0 : i32, i32
  }
  func.func @transform_3(%arg0: i32) -> (i32, i32) {
    %c0_i32 = arith.constant 0 : i32
    %c0_i32_0 = arith.constant 0 : i32
    %c0_i32_1 = arith.constant 0 : i32
    return %c0_i32, %c0_i32_0 : i32, i32
  }
  func.func @transform_4(%arg0: i32) -> (i32, i32) {
    %c0_i32 = arith.constant 0 : i32
    %c0_i32_0 = arith.constant 0 : i32
    return %arg0, %c0_i32 : i32, i32
  }
}

module attributes {stable_mosaic.version = 11 : i64} {
  func.func @_conv3x3_bn_relu_kernel(%arg0: i32, %arg1: memref<1x18x18x32xbf16, #tpu.memory_space<vmem>>, %arg2: memref<288x32xbf16, #tpu.memory_space<vmem>>, %arg3: memref<1x32xf32, #tpu.memory_space<vmem>>, %arg4: memref<1x32xf32, #tpu.memory_space<vmem>>, %arg5: memref<1x256x32xbf16, #tpu.memory_space<vmem>>) attributes {dimension_semantics = [#tpu.dimension_semantics<parallel>], iteration_bounds = array<i64: 2>, scalar_prefetch = 0 : i64, scratch_operands = 0 : i64, tpu.core_type = #tpu.core_type<tc>, window_params = [{transform_indices = @transform_0, window_bounds = array<i64: 1, 18, 18, 32>}, {pipeline_mode = #tpu.pipeline_mode<synchronous>, transform_indices = @transform_1, window_bounds = array<i64: 288, 32>}, {pipeline_mode = #tpu.pipeline_mode<synchronous>, transform_indices = @transform_2, window_bounds = array<i64: 1, 32>}, {pipeline_mode = #tpu.pipeline_mode<synchronous>, transform_indices = @transform_3, window_bounds = array<i64: 1, 32>}, {transform_indices = @transform_4, window_bounds = array<i64: 1, 256, 32>}]} {
    %cst = arith.constant 0.000000e+00 : f32
    %0 = vector.broadcast %cst : f32 to vector<256x32xf32>
    %c0 = arith.constant 0 : index
    %c0_0 = arith.constant 0 : index
    %c0_1 = arith.constant 0 : index
    %c0_2 = arith.constant 0 : index
    %1 = vector.load %arg1[%c0, %c0_0, %c0_1, %c0_2] : memref<1x18x18x32xbf16, #tpu.memory_space<vmem>>, vector<1x16x16x32xbf16>
    %2 = vector.shape_cast %1 : vector<1x16x16x32xbf16> to vector<16x16x32xbf16>
    %3 = vector.shape_cast %2 : vector<16x16x32xbf16> to vector<256x32xbf16>
    %c0_3 = arith.constant 0 : index
    %c0_4 = arith.constant 0 : index
    %4 = vector.load %arg2[%c0_3, %c0_4] : memref<288x32xbf16, #tpu.memory_space<vmem>>, vector<32x32xbf16>
    %cst_5 = arith.constant dense<0.000000e+00> : vector<256x32xf32>
    %5 = tpu.matmul %3, %4, %cst_5 {dimension_numbers = #tpu.dot_dimension_numbers<[1], [0], [0], [1], [0, 0, 1, 1], [], []>} : vector<256x32xbf16>, vector<32x32xbf16>, vector<256x32xf32> -> vector<256x32xf32>
    %6 = arith.addf %0, %5 : vector<256x32xf32>
    %c0_6 = arith.constant 0 : index
    %c0_7 = arith.constant 0 : index
    %c1 = arith.constant 1 : index
    %c0_8 = arith.constant 0 : index
    %7 = vector.load %arg1[%c0_6, %c0_7, %c1, %c0_8] : memref<1x18x18x32xbf16, #tpu.memory_space<vmem>>, vector<1x16x16x32xbf16>
    %8 = vector.shape_cast %7 : vector<1x16x16x32xbf16> to vector<16x16x32xbf16>
    %9 = vector.shape_cast %8 : vector<16x16x32xbf16> to vector<256x32xbf16>
    %c32 = arith.constant 32 : index
    %c0_9 = arith.constant 0 : index
    %10 = vector.load %arg2[%c32, %c0_9] : memref<288x32xbf16, #tpu.memory_space<vmem>>, vector<32x32xbf16>
    %cst_10 = arith.constant dense<0.000000e+00> : vector<256x32xf32>
    %11 = tpu.matmul %9, %10, %cst_10 {dimension_numbers = #tpu.dot_dimension_numbers<[1], [0], [0], [1], [0, 0, 1, 1], [], []>} : vector<256x32xbf16>, vector<32x32xbf16>, vector<256x32xf32> -> vector<256x32xf32>
    %12 = arith.addf %6, %11 : vector<256x32xf32>
    %c0_11 = arith.constant 0 : index
    %c0_12 = arith.constant 0 : index
    %c2 = arith.constant 2 : index
    %c0_13 = arith.constant 0 : index
    %13 = vector.load %arg1[%c0_11, %c0_12, %c2, %c0_13] : memref<1x18x18x32xbf16, #tpu.memory_space<vmem>>, vector<1x16x16x32xbf16>
    %14 = vector.shape_cast %13 : vector<1x16x16x32xbf16> to vector<16x16x32xbf16>
    %15 = vector.shape_cast %14 : vector<16x16x32xbf16> to vector<256x32xbf16>
    %c64 = arith.constant 64 : index
    %c0_14 = arith.constant 0 : index
    %16 = vector.load %arg2[%c64, %c0_14] : memref<288x32xbf16, #tpu.memory_space<vmem>>, vector<32x32xbf16>
    %cst_15 = arith.constant dense<0.000000e+00> : vector<256x32xf32>
    %17 = tpu.matmul %15, %16, %cst_15 {dimension_numbers = #tpu.dot_dimension_numbers<[1], [0], [0], [1], [0, 0, 1, 1], [], []>} : vector<256x32xbf16>, vector<32x32xbf16>, vector<256x32xf32> -> vector<256x32xf32>
    %18 = arith.addf %12, %17 : vector<256x32xf32>
    %c0_16 = arith.constant 0 : index
    %c1_17 = arith.constant 1 : index
    %c0_18 = arith.constant 0 : index
    %c0_19 = arith.constant 0 : index
    %19 = vector.load %arg1[%c0_16, %c1_17, %c0_18, %c0_19] : memref<1x18x18x32xbf16, #tpu.memory_space<vmem>>, vector<1x16x16x32xbf16>
    %20 = vector.shape_cast %19 : vector<1x16x16x32xbf16> to vector<16x16x32xbf16>
    %21 = vector.shape_cast %20 : vector<16x16x32xbf16> to vector<256x32xbf16>
    %c96 = arith.constant 96 : index
    %c0_20 = arith.constant 0 : index
    %22 = vector.load %arg2[%c96, %c0_20] : memref<288x32xbf16, #tpu.memory_space<vmem>>, vector<32x32xbf16>
    %cst_21 = arith.constant dense<0.000000e+00> : vector<256x32xf32>
    %23 = tpu.matmul %21, %22, %cst_21 {dimension_numbers = #tpu.dot_dimension_numbers<[1], [0], [0], [1], [0, 0, 1, 1], [], []>} : vector<256x32xbf16>, vector<32x32xbf16>, vector<256x32xf32> -> vector<256x32xf32>
    %24 = arith.addf %18, %23 : vector<256x32xf32>
    %c0_22 = arith.constant 0 : index
    %c1_23 = arith.constant 1 : index
    %c1_24 = arith.constant 1 : index
    %c0_25 = arith.constant 0 : index
    %25 = vector.load %arg1[%c0_22, %c1_23, %c1_24, %c0_25] : memref<1x18x18x32xbf16, #tpu.memory_space<vmem>>, vector<1x16x16x32xbf16>
    %26 = vector.shape_cast %25 : vector<1x16x16x32xbf16> to vector<16x16x32xbf16>
    %27 = vector.shape_cast %26 : vector<16x16x32xbf16> to vector<256x32xbf16>
    %c128 = arith.constant 128 : index
    %c0_26 = arith.constant 0 : index
    %28 = vector.load %arg2[%c128, %c0_26] : memref<288x32xbf16, #tpu.memory_space<vmem>>, vector<32x32xbf16>
    %cst_27 = arith.constant dense<0.000000e+00> : vector<256x32xf32>
    %29 = tpu.matmul %27, %28, %cst_27 {dimension_numbers = #tpu.dot_dimension_numbers<[1], [0], [0], [1], [0, 0, 1, 1], [], []>} : vector<256x32xbf16>, vector<32x32xbf16>, vector<256x32xf32> -> vector<256x32xf32>
    %30 = arith.addf %24, %29 : vector<256x32xf32>
    %c0_28 = arith.constant 0 : index
    %c1_29 = arith.constant 1 : index
    %c2_30 = arith.constant 2 : index
    %c0_31 = arith.constant 0 : index
    %31 = vector.load %arg1[%c0_28, %c1_29, %c2_30, %c0_31] : memref<1x18x18x32xbf16, #tpu.memory_space<vmem>>, vector<1x16x16x32xbf16>
    %32 = vector.shape_cast %31 : vector<1x16x16x32xbf16> to vector<16x16x32xbf16>
    %33 = vector.shape_cast %32 : vector<16x16x32xbf16> to vector<256x32xbf16>
    %c160 = arith.constant 160 : index
    %c0_32 = arith.constant 0 : index
    %34 = vector.load %arg2[%c160, %c0_32] : memref<288x32xbf16, #tpu.memory_space<vmem>>, vector<32x32xbf16>
    %cst_33 = arith.constant dense<0.000000e+00> : vector<256x32xf32>
    %35 = tpu.matmul %33, %34, %cst_33 {dimension_numbers = #tpu.dot_dimension_numbers<[1], [0], [0], [1], [0, 0, 1, 1], [], []>} : vector<256x32xbf16>, vector<32x32xbf16>, vector<256x32xf32> -> vector<256x32xf32>
    %36 = arith.addf %30, %35 : vector<256x32xf32>
    %c0_34 = arith.constant 0 : index
    %c2_35 = arith.constant 2 : index
    %c0_36 = arith.constant 0 : index
    %c0_37 = arith.constant 0 : index
    %37 = vector.load %arg1[%c0_34, %c2_35, %c0_36, %c0_37] : memref<1x18x18x32xbf16, #tpu.memory_space<vmem>>, vector<1x16x16x32xbf16>
    %38 = vector.shape_cast %37 : vector<1x16x16x32xbf16> to vector<16x16x32xbf16>
    %39 = vector.shape_cast %38 : vector<16x16x32xbf16> to vector<256x32xbf16>
    %c192 = arith.constant 192 : index
    %c0_38 = arith.constant 0 : index
    %40 = vector.load %arg2[%c192, %c0_38] : memref<288x32xbf16, #tpu.memory_space<vmem>>, vector<32x32xbf16>
    %cst_39 = arith.constant dense<0.000000e+00> : vector<256x32xf32>
    %41 = tpu.matmul %39, %40, %cst_39 {dimension_numbers = #tpu.dot_dimension_numbers<[1], [0], [0], [1], [0, 0, 1, 1], [], []>} : vector<256x32xbf16>, vector<32x32xbf16>, vector<256x32xf32> -> vector<256x32xf32>
    %42 = arith.addf %36, %41 : vector<256x32xf32>
    %c0_40 = arith.constant 0 : index
    %c2_41 = arith.constant 2 : index
    %c1_42 = arith.constant 1 : index
    %c0_43 = arith.constant 0 : index
    %43 = vector.load %arg1[%c0_40, %c2_41, %c1_42, %c0_43] : memref<1x18x18x32xbf16, #tpu.memory_space<vmem>>, vector<1x16x16x32xbf16>
    %44 = vector.shape_cast %43 : vector<1x16x16x32xbf16> to vector<16x16x32xbf16>
    %45 = vector.shape_cast %44 : vector<16x16x32xbf16> to vector<256x32xbf16>
    %c224 = arith.constant 224 : index
    %c0_44 = arith.constant 0 : index
    %46 = vector.load %arg2[%c224, %c0_44] : memref<288x32xbf16, #tpu.memory_space<vmem>>, vector<32x32xbf16>
    %cst_45 = arith.constant dense<0.000000e+00> : vector<256x32xf32>
    %47 = tpu.matmul %45, %46, %cst_45 {dimension_numbers = #tpu.dot_dimension_numbers<[1], [0], [0], [1], [0, 0, 1, 1], [], []>} : vector<256x32xbf16>, vector<32x32xbf16>, vector<256x32xf32> -> vector<256x32xf32>
    %48 = arith.addf %42, %47 : vector<256x32xf32>
    %c0_46 = arith.constant 0 : index
    %c2_47 = arith.constant 2 : index
    %c2_48 = arith.constant 2 : index
    %c0_49 = arith.constant 0 : index
    %49 = vector.load %arg1[%c0_46, %c2_47, %c2_48, %c0_49] : memref<1x18x18x32xbf16, #tpu.memory_space<vmem>>, vector<1x16x16x32xbf16>
    %50 = vector.shape_cast %49 : vector<1x16x16x32xbf16> to vector<16x16x32xbf16>
    %51 = vector.shape_cast %50 : vector<16x16x32xbf16> to vector<256x32xbf16>
    %c256 = arith.constant 256 : index
    %c0_50 = arith.constant 0 : index
    %52 = vector.load %arg2[%c256, %c0_50] : memref<288x32xbf16, #tpu.memory_space<vmem>>, vector<32x32xbf16>
    %cst_51 = arith.constant dense<0.000000e+00> : vector<256x32xf32>
    %53 = tpu.matmul %51, %52, %cst_51 {dimension_numbers = #tpu.dot_dimension_numbers<[1], [0], [0], [1], [0, 0, 1, 1], [], []>} : vector<256x32xbf16>, vector<32x32xbf16>, vector<256x32xf32> -> vector<256x32xf32>
    %54 = arith.addf %48, %53 : vector<256x32xf32>
    %c0_52 = arith.constant 0 : index
    %c0_53 = arith.constant 0 : index
    %55 = vector.load %arg3[%c0_52, %c0_53] : memref<1x32xf32, #tpu.memory_space<vmem>>, vector<1x32xf32>
    %56 = vector.broadcast %55 : vector<1x32xf32> to vector<256x32xf32>
    %57 = arith.mulf %54, %56 : vector<256x32xf32>
    %c0_54 = arith.constant 0 : index
    %c0_55 = arith.constant 0 : index
    %58 = vector.load %arg4[%c0_54, %c0_55] : memref<1x32xf32, #tpu.memory_space<vmem>>, vector<1x32xf32>
    %59 = vector.broadcast %58 : vector<1x32xf32> to vector<256x32xf32>
    %60 = arith.addf %57, %59 : vector<256x32xf32>
    %cst_56 = arith.constant 0.000000e+00 : f32
    %61 = vector.broadcast %cst_56 : f32 to vector<256x32xf32>
    %62 = arith.maximumf %60, %61 : vector<256x32xf32>
    %63 = arith.truncf %62 : vector<256x32xf32> to vector<256x32xbf16>
    %c0_57 = arith.constant 0 : index
    %c0_58 = arith.constant 0 : index
    %c0_59 = arith.constant 0 : index
    %64 = vector.load %arg5[%c0_57, %c0_58, %c0_59] : memref<1x256x32xbf16, #tpu.memory_space<vmem>>, vector<1x256x32xbf16>
    %65 = vector.shape_cast %64 : vector<1x256x32xbf16> to vector<256x32xbf16>
    %66 = vector.shape_cast %63 : vector<256x32xbf16> to vector<1x256x32xbf16>
    tpu.vector_store %arg5[%c0_57, %c0_58, %c0_59], %66 {strides = array<i32>} : memref<1x256x32xbf16, #tpu.memory_space<vmem>>, vector<1x256x32xbf16>,
    return
  }
  func.func @transform_0(%arg0: i32) -> (i32, i32, i32, i32) {
    %c0_i32 = arith.constant 0 : i32
    %c0_i32_0 = arith.constant 0 : i32
    %c0_i32_1 = arith.constant 0 : i32
    %c0_i32_2 = arith.constant 0 : i32
    return %arg0, %c0_i32, %c0_i32_0, %c0_i32_1 : i32, i32, i32, i32
  }
  func.func @transform_1(%arg0: i32) -> (i32, i32) {
    %c0_i32 = arith.constant 0 : i32
    %c0_i32_0 = arith.constant 0 : i32
    %c0_i32_1 = arith.constant 0 : i32
    return %c0_i32, %c0_i32_0 : i32, i32
  }
  func.func @transform_2(%arg0: i32) -> (i32, i32) {
    %c0_i32 = arith.constant 0 : i32
    %c0_i32_0 = arith.constant 0 : i32
    %c0_i32_1 = arith.constant 0 : i32
    return %c0_i32, %c0_i32_0 : i32, i32
  }
  func.func @transform_3(%arg0: i32) -> (i32, i32) {
    %c0_i32 = arith.constant 0 : i32
    %c0_i32_0 = arith.constant 0 : i32
    %c0_i32_1 = arith.constant 0 : i32
    return %c0_i32, %c0_i32_0 : i32, i32
  }
  func.func @transform_4(%arg0: i32) -> (i32, i32, i32) {
    %c0_i32 = arith.constant 0 : i32
    %c0_i32_0 = arith.constant 0 : i32
    %c0_i32_1 = arith.constant 0 : i32
    return %arg0, %c0_i32, %c0_i32_0 : i32, i32, i32
  }
}

module attributes {stable_mosaic.version = 11 : i64} {
  func.func @_res_proj_kernel(%arg0: i32, %arg1: memref<256x32xbf16, #tpu.memory_space<vmem>>, %arg2: memref<32x128xbf16, #tpu.memory_space<vmem>>, %arg3: memref<1x128xf32, #tpu.memory_space<vmem>>, %arg4: memref<1x128xf32, #tpu.memory_space<vmem>>, %arg5: memref<256x64xbf16, #tpu.memory_space<vmem>>, %arg6: memref<64x128xbf16, #tpu.memory_space<vmem>>, %arg7: memref<1x128xf32, #tpu.memory_space<vmem>>, %arg8: memref<1x128xf32, #tpu.memory_space<vmem>>, %arg9: memref<256x128xf32, #tpu.memory_space<vmem>>) attributes {dimension_semantics = [#tpu.dimension_semantics<parallel>], iteration_bounds = array<i64: 2>, scalar_prefetch = 0 : i64, scratch_operands = 0 : i64, tpu.core_type = #tpu.core_type<tc>, window_params = [{transform_indices = @transform_0, window_bounds = array<i64: 256, 32>}, {pipeline_mode = #tpu.pipeline_mode<synchronous>, transform_indices = @transform_1, window_bounds = array<i64: 32, 128>}, {pipeline_mode = #tpu.pipeline_mode<synchronous>, transform_indices = @transform_2, window_bounds = array<i64: 1, 128>}, {pipeline_mode = #tpu.pipeline_mode<synchronous>, transform_indices = @transform_3, window_bounds = array<i64: 1, 128>}, {transform_indices = @transform_4, window_bounds = array<i64: 256, 64>}, {pipeline_mode = #tpu.pipeline_mode<synchronous>, transform_indices = @transform_5, window_bounds = array<i64: 64, 128>}, {pipeline_mode = #tpu.pipeline_mode<synchronous>, transform_indices = @transform_6, window_bounds = array<i64: 1, 128>}, {pipeline_mode = #tpu.pipeline_mode<synchronous>, transform_indices = @transform_7, window_bounds = array<i64: 1, 128>}, {transform_indices = @transform_8, window_bounds = array<i64: 256, 128>}]} {
    %c0 = arith.constant 0 : index
    %c0_0 = arith.constant 0 : index
    %0 = vector.load %arg1[%c0, %c0_0] : memref<256x32xbf16, #tpu.memory_space<vmem>>, vector<256x32xbf16>
    %c0_1 = arith.constant 0 : index
    %c0_2 = arith.constant 0 : index
    %1 = vector.load %arg2[%c0_1, %c0_2] : memref<32x128xbf16, #tpu.memory_space<vmem>>, vector<32x128xbf16>
    %cst = arith.constant dense<0.000000e+00> : vector<256x128xf32>
    %2 = tpu.matmul %0, %1, %cst {dimension_numbers = #tpu.dot_dimension_numbers<[1], [0], [0], [1], [0, 0, 1, 1], [], []>} : vector<256x32xbf16>, vector<32x128xbf16>, vector<256x128xf32> -> vector<256x128xf32>
    %c0_3 = arith.constant 0 : index
    %c0_4 = arith.constant 0 : index
    %3 = vector.load %arg3[%c0_3, %c0_4] : memref<1x128xf32, #tpu.memory_space<vmem>>, vector<1x128xf32>
    %4 = vector.broadcast %3 : vector<1x128xf32> to vector<256x128xf32>
    %5 = arith.mulf %2, %4 : vector<256x128xf32>
    %c0_5 = arith.constant 0 : index
    %c0_6 = arith.constant 0 : index
    %6 = vector.load %arg4[%c0_5, %c0_6] : memref<1x128xf32, #tpu.memory_space<vmem>>, vector<1x128xf32>
    %7 = vector.broadcast %6 : vector<1x128xf32> to vector<256x128xf32>
    %8 = arith.addf %5, %7 : vector<256x128xf32>
    %c0_7 = arith.constant 0 : index
    %c0_8 = arith.constant 0 : index
    %9 = vector.load %arg5[%c0_7, %c0_8] : memref<256x64xbf16, #tpu.memory_space<vmem>>, vector<256x64xbf16>
    %c0_9 = arith.constant 0 : index
    %c0_10 = arith.constant 0 : index
    %10 = vector.load %arg6[%c0_9, %c0_10] : memref<64x128xbf16, #tpu.memory_space<vmem>>, vector<64x128xbf16>
    %cst_11 = arith.constant dense<0.000000e+00> : vector<256x128xf32>
    %11 = tpu.matmul %9, %10, %cst_11 {dimension_numbers = #tpu.dot_dimension_numbers<[1], [0], [0], [1], [0, 0, 1, 1], [], []>} : vector<256x64xbf16>, vector<64x128xbf16>, vector<256x128xf32> -> vector<256x128xf32>
    %c0_12 = arith.constant 0 : index
    %c0_13 = arith.constant 0 : index
    %12 = vector.load %arg7[%c0_12, %c0_13] : memref<1x128xf32, #tpu.memory_space<vmem>>, vector<1x128xf32>
    %13 = vector.broadcast %12 : vector<1x128xf32> to vector<256x128xf32>
    %14 = arith.mulf %11, %13 : vector<256x128xf32>
    %c0_14 = arith.constant 0 : index
    %c0_15 = arith.constant 0 : index
    %15 = vector.load %arg8[%c0_14, %c0_15] : memref<1x128xf32, #tpu.memory_space<vmem>>, vector<1x128xf32>
    %16 = vector.broadcast %15 : vector<1x128xf32> to vector<256x128xf32>
    %17 = arith.addf %14, %16 : vector<256x128xf32>
    %18 = arith.addf %8, %17 : vector<256x128xf32>
    %cst_16 = arith.constant 0.000000e+00 : f32
    %19 = vector.broadcast %cst_16 : f32 to vector<256x128xf32>
    %20 = arith.maximumf %18, %19 : vector<256x128xf32>
    %c0_17 = arith.constant 0 : index
    %c0_18 = arith.constant 0 : index
    %21 = vector.load %arg9[%c0_17, %c0_18] : memref<256x128xf32, #tpu.memory_space<vmem>>, vector<256x128xf32>
    tpu.vector_store %arg9[%c0_17, %c0_18], %20 {strides = array<i32>} : memref<256x128xf32, #tpu.memory_space<vmem>>, vector<256x128xf32>,
    return
  }
  func.func @transform_0(%arg0: i32) -> (i32, i32) {
    %c0_i32 = arith.constant 0 : i32
    %c0_i32_0 = arith.constant 0 : i32
    return %arg0, %c0_i32 : i32, i32
  }
  func.func @transform_1(%arg0: i32) -> (i32, i32) {
    %c0_i32 = arith.constant 0 : i32
    %c0_i32_0 = arith.constant 0 : i32
    %c0_i32_1 = arith.constant 0 : i32
    return %c0_i32, %c0_i32_0 : i32, i32
  }
  func.func @transform_2(%arg0: i32) -> (i32, i32) {
    %c0_i32 = arith.constant 0 : i32
    %c0_i32_0 = arith.constant 0 : i32
    %c0_i32_1 = arith.constant 0 : i32
    return %c0_i32, %c0_i32_0 : i32, i32
  }
  func.func @transform_3(%arg0: i32) -> (i32, i32) {
    %c0_i32 = arith.constant 0 : i32
    %c0_i32_0 = arith.constant 0 : i32
    %c0_i32_1 = arith.constant 0 : i32
    return %c0_i32, %c0_i32_0 : i32, i32
  }
  func.func @transform_4(%arg0: i32) -> (i32, i32) {
    %c0_i32 = arith.constant 0 : i32
    %c0_i32_0 = arith.constant 0 : i32
    return %arg0, %c0_i32 : i32, i32
  }
  func.func @transform_5(%arg0: i32) -> (i32, i32) {
    %c0_i32 = arith.constant 0 : i32
    %c0_i32_0 = arith.constant 0 : i32
    %c0_i32_1 = arith.constant 0 : i32
    return %c0_i32, %c0_i32_0 : i32, i32
  }
  func.func @transform_6(%arg0: i32) -> (i32, i32) {
    %c0_i32 = arith.constant 0 : i32
    %c0_i32_0 = arith.constant 0 : i32
    %c0_i32_1 = arith.constant 0 : i32
    return %c0_i32, %c0_i32_0 : i32, i32
  }
  func.func @transform_7(%arg0: i32) -> (i32, i32) {
    %c0_i32 = arith.constant 0 : i32
    %c0_i32_0 = arith.constant 0 : i32
    %c0_i32_1 = arith.constant 0 : i32
    return %c0_i32, %c0_i32_0 : i32, i32
  }
  func.func @transform_8(%arg0: i32) -> (i32, i32) {
    %c0_i32 = arith.constant 0 : i32
    %c0_i32_0 = arith.constant 0 : i32
    return %arg0, %c0_i32 : i32, i32
  }
}

</mosaic_0001>

<bundles_post_ra>
// kernel: _lambda_.3
= control target key start
LH: loop header
LB: loop body
LE: loop exit
PB: predicated region body
PF: predicated region fallthrough
CT: control target
= control target key end

     0   :  { %s1125_s15 = smov 0   ;;  %s1335_s0 = inlined_call_operand.vmem [shape: bf16[512,64], index: 0, kind: input, shape index: {}]   ;;  %s1336_s1 = inlined_call_operand.vmem [shape: bf16[64,32], index: 1, kind: input, shape index: {}]   ;;  %s1337_s2 = inlined_call_operand.vmem [shape: f32[1,32], index: 2, kind: input, shape index: {}]   ;;  %s1338_s3 = inlined_call_operand.vmem [shape: f32[1,32], index: 3, kind: input, shape index: {}]   ;;  %s1339_s4 = inlined_call_operand.vmem [shape: bf16[512,32], index: 4, kind: output, shape index: {}]  }
   0x1 LB: > { %s883_s16 = sadd.s32 4294967295, %s1098_s15   ;;  %p887_p0 = scmp.ge.s32.totalorder %s1098_s15, 1  ;;  %s1098_s15 = sphi %s1125_s15, %s14_s15  }
   0x2   : > { %p163_p1 = scmp.lt.s32.totalorder %s1098_s15, 3 }
   0x4   : > { %p164_p2 = pnand %p887_p0, %p163_p1 }
   0x5   : > { %v1072_v0 = vld [vmem:[%s1336_s1] sm:$0xff] (!%p164_p2)   ;;  %s888_s19 = sshll.u32 (!%p164_p2), %s883_s16, 5  ;;  %v1073_v1 = vld [vmem:[%s1336_s1 + $0x8] sm:$0xff] (!%p164_p2)   ;;  %v1074_v2 = vld [vmem:[%s1336_s1 + $0x10] sm:$0xff] (!%p164_p2)   ;;  %vm346_vm0 = vcmask (!%p164_p2), 523264   ;;  %vm794_vm1 = vcmask (!%p164_p2), 257024  }
   0x6   : > { %167 = sbr.rel (%p164_p2) target bundleno = 273 (0x111), region = 36  ;;  %p190_p3 = scmp.lt.s32.totalorder (!%p164_p2), %s888_s19, 63  ;;  %1016 = vmatprep.subr.bf16.mxu0 (!%p164_p2), %v1072_v0  ;;  %1056 = vmatprep.subr.bf16.mxu1 (!%p164_p2), %v1072_v0  ;;  %v1075_v3 = vld [vmem:[%s1336_s1 + $0x18] sm:$0xff] (!%p164_p2)   ;;  %v1190_v20 = vld [vmem:[%s1337_s2] ss:$0 sm:$0xff] (!%p164_p2) }
   0x7   : > { %1017 = vmatpush3.bf16.msra.mxu0 (!%p164_p2), %v1072_v0  ;;  %1060 = vmatpush3.bf16.msra.mxu1 (!%p164_p2), %v1072_v0  ;;  %v1195_v22 = vld [vmem:[%s1338_s3] ss:$0 sm:$0xff] (!%p164_p2) }
   0x8   : > { %1018 = vmatprep.subr.bf16.mxu0 (!%p164_p2), %v1073_v1  ;;  %1057 = vmatprep.subr.bf16.mxu1 (!%p164_p2), %v1073_v1 }
   0xb   : > { %1019 = vmatpush3.bf16.msra.mxu0 (!%p164_p2), %v1073_v1  ;;  %1061 = vmatpush3.bf16.msra.mxu1 (!%p164_p2), %v1073_v1 }
   0xc   : > { %1020 = vmatprep.subr.bf16.mxu0 (!%p164_p2), %v1074_v2  ;;  %1058 = vmatprep.subr.bf16.mxu1 (!%p164_p2), %v1074_v2 }
   0xd   : > { %s1341_s19 = smov (!%p190_p3, %s888_s19), 63 }
   0xe   : > { %s889_s24 = sshll.u32 %s1341_s19, 2 }
   0xf   : > { %s1153_s29 = scalar_lea.vmem %s1335_s0, %s889_s24  ;;  %1021 = vmatpush3.bf16.msra.mxu0 %v1074_v2  ;;  %1062 = vmatpush3.bf16.msra.mxu1 %v1074_v2  ;;  %s1216_s10 = scalar_lea.vmem %s1339_s4, %s889_s24 }
  0x10   : > { %v1076_v4 = vld [vmem:[%s1153_s29] sm:$0xff]   ;;  %1022 = vmatprep.subr.bf16.mxu0 %v1075_v3  ;;  %1059 = vmatprep.subr.bf16.mxu1 %v1075_v3  ;;  %v1078_v6 = vld [vmem:[%s1153_s29 + $0x8] sm:$0xff]   ;;  %v1080_v8 = vld [vmem:[%s1153_s29 + $0x10] sm:$0xff]  }
  0x11   : > { %v1077_v5 = vld [vmem:[%s1153_s29 + $0x40] sm:$0xff]   ;;  %1024 = vmatprep.mubr.msk.bf16.mxu0 %vm346_vm0, %v1076_v4  ;;  %v1079_v7 = vld [vmem:[%s1153_s29 + $0x48] sm:$0xff]   ;;  %v1081_v9 = vld [vmem:[%s1153_s29 + $0x50] sm:$0xff]  }
  0x12   : > { %1040 = vmatprep.mubr.msk.bf16.mxu1 %vm346_vm0, %v1077_v5  ;;  %v1082_v10 = vld [vmem:[%s1153_s29 + $0x18] sm:$0xff]   ;;  %v1084_v12 = vld [vmem:[%s1153_s29 + $0x20] sm:$0xff]   ;;  %v1086_v14 = vld [vmem:[%s1153_s29 + $0x28] sm:$0xff]  }
  0x13   : > { %1023 = vmatpush3.bf16.msra.mxu0 %v1075_v3  ;;  %1063 = vmatpush3.bf16.msra.mxu1 %v1075_v3  ;;  %v1083_v11 = vld [vmem:[%s1153_s29 + $0x58] sm:$0xff]   ;;  %v1085_v13 = vld [vmem:[%s1153_s29 + $0x60] sm:$0xff]   ;;  %v1087_v15 = vld [vmem:[%s1153_s29 + $0x68] sm:$0xff]  }
  0x14   : > { %v1088_v16 = vld [vmem:[%s1153_s29 + $0x30] sm:$0xff]   ;;  %v1090_v18 = vld [vmem:[%s1153_s29 + $0x38] sm:$0xff]  }
  0x15   : > { %v1089_v17 = vld [vmem:[%s1153_s29 + $0x70] sm:$0xff]   ;;  %v1091_v19 = vld [vmem:[%s1153_s29 + $0x78] sm:$0xff]  }
  0x16   : > { %1025 = vmatmul.mubr.msk.bf16.vlgmr.msra.gmra.mrb[0].mxu0 %vm346_vm0, %v1078_v6  ;;  %1041 = vmatmul.mubr.msk.bf16.vlgmr.msra.gmra.mrb[0].mxu1 %vm346_vm0, %v1079_v7 }
  0x17   : > { %1028 = vmatprep.mubr.msk.bf16.mxu0 %vm346_vm0, %v1080_v8  ;;  %1044 = vmatprep.mubr.msk.bf16.mxu1 %vm346_vm0, %v1081_v9 }
  0x1e   : > { %1029 = vmatmul.mubr.msk.bf16.gmra.mrb[4].mxu0 %vm346_vm0, %v1082_v10  ;;  %1045 = vmatmul.mubr.msk.bf16.gmra.mrb[4].mxu1 %vm346_vm0, %v1083_v11 }
  0x1f   : > { %1032 = vmatprep.mubr.msk.bf16.mxu0 %vm346_vm0, %v1084_v12  ;;  %1048 = vmatprep.mubr.msk.bf16.mxu1 %vm346_vm0, %v1085_v13 }
  0x26   : > { %1033 = vmatmul.mubr.msk.bf16.gmra.mrb[8].mxu0 %vm346_vm0, %v1086_v14  ;;  %1049 = vmatmul.mubr.msk.bf16.gmra.mrb[8].mxu1 %vm346_vm0, %v1087_v15 }
  0x27   : > { %1036 = vmatprep.mubr.msk.bf16.mxu0 %vm346_vm0, %v1088_v16  ;;  %1052 = vmatprep.mubr.msk.bf16.mxu1 %vm346_vm0, %v1089_v17 }
  0x2e   : > { %1037 = vmatmul.mubr.msk.bf16.gmra.mrb[12].mxu0 %vm346_vm0, %v1090_v18  ;;  %1053 = vmatmul.mubr.msk.bf16.gmra.mrb[12].mxu1 %vm346_vm0, %v1091_v19 }
  0xe9   : > { %v1026_v21 = vpop.f32.mrb[0].mxu0  ;;  %v1042_v23 = vpop.f32.mrb[0].mxu1 }
  0xea   : > { %v565_v24 = vmul.f32 %v1026_v21, %v1190_v20  ;;  %v581_v25 = vmul.f32 %v1042_v23, %v1190_v20  ;;  %v429_v26 = vpop.f32.mrb[1].mxu0  ;;  %v493_v27 = vpop.f32.mrb[1].mxu1 }
  0xeb   : > { %v563_v28 = vmul.f32 %v1190_v20, %v429_v26  ;;  %v579_v29 = vmul.f32 %v1190_v20, %v493_v27  ;;  %v1027_v30 = vpop.f32.mrb[2].mxu0  ;;  %v1043_v31 = vpop.f32.mrb[2].mxu1 }
  0xec   : > { %v604_v32 = vadd.f32 %v1195_v22, %v565_v24  ;;  %v620_v33 = vadd.f32 %v1195_v22, %v581_v25  ;;  %v566_v34 = vmul.f32 %v1027_v30, %v1190_v20  ;;  %v582_v35 = vmul.f32 %v1043_v31, %v1190_v20  ;;  %v432_v36 = vpop.f32.mrb[3].mxu0  ;;  %v496_v37 = vpop.f32.mrb[3].mxu1 }
  0xed   : > { %v602_v38 = vadd.f32 %v1195_v22, %v563_v28  ;;  %v618_v39 = vadd.f32 %v1195_v22, %v579_v29  ;;  %v564_v40 = vmul.f32 %v1190_v20, %v432_v36  ;;  %v580_v41 = vmul.f32 %v1190_v20, %v496_v37 }
  0xee   : > { %v636_v42 = vmax.f32 %v604_v32, 0.0  ;;  %v652_v43 = vmax.f32 %v620_v33, 0.0  ;;  %v605_v44 = vadd.f32 %v1195_v22, %v566_v34  ;;  %v621_v45 = vadd.f32 %v1195_v22, %v582_v35 }
  0xef   : > { %v634_v46 = vmax.f32 %v602_v38, 0.0  ;;  %v650_v47 = vmax.f32 %v618_v39, 0.0  ;;  %v603_v48 = vadd.f32 %v1195_v22, %v564_v40  ;;  %v619_v49 = vadd.f32 %v1195_v22, %v580_v41 }
  0xf0   : > { %v966_v50 = vpack.c.bf16 %v636_v42, %v636_v42  ;;  %v982_v51 = vpack.c.bf16 %v652_v43, %v652_v43  ;;  %v637_v52 = vmax.f32 %v605_v44, 0.0  ;;  %v653_v53 = vmax.f32 %v621_v45, 0.0 }
  0xf1   : > { %v964_v54 = vpack.c.bf16 %v634_v46, %v634_v46  ;;  %v980_v55 = vpack.c.bf16 %v650_v47, %v650_v47  ;;  %v635_v56 = vmax.f32 %v603_v48, 0.0  ;;  %v651_v57 = vmax.f32 %v619_v49, 0.0  ;;  %v1030_v58 = vpop.f32.mrb[4].mxu0  ;;  %v1046_v59 = vpop.f32.mrb[4].mxu1 }
  0xf2   : > { %797 = vst.msk [vmem:[%s1216_s10 + $0x8] sm:$0xf] %vm794_vm1, %v966_v50  ;;  %813 = vst.msk [vmem:[%s1216_s10 + $0x48] sm:$0xf] %vm794_vm1, %v982_v51  ;;  %v967_v60 = vpack.c.bf16 %v637_v52, %v637_v52  ;;  %v983_v61 = vpack.c.bf16 %v653_v53, %v653_v53  ;;  %v569_v62 = vmul.f32 %v1030_v58, %v1190_v20  ;;  %v445_v0 = vpop.f32.mrb[5].mxu0  ;;  %v509_v1 = vpop.f32.mrb[5].mxu1 }
  0xf3   : > { %v585_v63 = vmul.f32 %v1046_v59, %v1190_v20  ;;  %795 = vst.msk [vmem:[%s1216_s10] sm:$0xf] %vm794_vm1, %v964_v54  ;;  %811 = vst.msk [vmem:[%s1216_s10 + $0x40] sm:$0xf] %vm794_vm1, %v980_v55  ;;  %v965_v2 = vpack.c.bf16 %v635_v56, %v635_v56  ;;  %v981_v3 = vpack.c.bf16 %v651_v57, %v651_v57  ;;  %v1031_v6 = vpop.f32.mrb[6].mxu0  ;;  %v1047_v7 = vpop.f32.mrb[6].mxu1 }
  0xf4   : > { %v567_v4 = vmul.f32 %v1190_v20, %v445_v0  ;;  %v583_v5 = vmul.f32 %v1190_v20, %v509_v1  ;;  %798 = vst.msk [vmem:[%s1216_s10 + $0xc] sm:$0xf] %vm794_vm1, %v967_v60  ;;  %814 = vst.msk [vmem:[%s1216_s10 + $0x4c] sm:$0xf] %vm794_vm1, %v983_v61  ;;  %v608_v8 = vadd.f32 %v1195_v22, %v569_v62  ;;  %v448_v12 = vpop.f32.mrb[7].mxu0  ;;  %v512_v13 = vpop.f32.mrb[7].mxu1 }
  0xf5   : > { %v624_v9 = vadd.f32 %v1195_v22, %v585_v63  ;;  %v570_v10 = vmul.f32 %v1031_v6, %v1190_v20  ;;  %v586_v11 = vmul.f32 %v1047_v7, %v1190_v20  ;;  %796 = vst.msk [vmem:[%s1216_s10 + $0x4] sm:$0xf] %vm794_vm1, %v965_v2  ;;  %812 = vst.msk [vmem:[%s1216_s10 + $0x44] sm:$0xf] %vm794_vm1, %v981_v3 }
  0xf6   : > { %v606_v14 = vadd.f32 %v1195_v22, %v567_v4  ;;  %v622_v15 = vadd.f32 %v1195_v22, %v583_v5  ;;  %v568_v16 = vmul.f32 %v1190_v20, %v448_v12  ;;  %v584_v17 = vmul.f32 %v1190_v20, %v512_v13 }
  0xf7   : > { %v640_v18 = vmax.f32 %v608_v8, 0.0  ;;  %v656_v19 = vmax.f32 %v624_v9, 0.0  ;;  %v609_v21 = vadd.f32 %v1195_v22, %v570_v10  ;;  %v625_v23 = vadd.f32 %v1195_v22, %v586_v11 }
  0xf8   : > { %v638_v24 = vmax.f32 %v606_v14, 0.0  ;;  %v654_v25 = vmax.f32 %v622_v15, 0.0  ;;  %v607_v26 = vadd.f32 %v1195_v22, %v568_v16  ;;  %v623_v27 = vadd.f32 %v1195_v22, %v584_v17 }
  0xf9   : > { %v970_v28 = vpack.c.bf16 %v640_v18, %v640_v18  ;;  %v986_v29 = vpack.c.bf16 %v656_v19, %v656_v19  ;;  %v641_v30 = vmax.f32 %v609_v21, 0.0  ;;  %v657_v31 = vmax.f32 %v625_v23, 0.0  ;;  %v1034_v36 = vpop.f32.mrb[8].mxu0  ;;  %v1050_v37 = vpop.f32.mrb[8].mxu1 }
  0xfa   : > { %v968_v32 = vpack.c.bf16 %v638_v24, %v638_v24  ;;  %v984_v33 = vpack.c.bf16 %v654_v25, %v654_v25  ;;  %v639_v34 = vmax.f32 %v607_v26, 0.0  ;;  %v655_v35 = vmax.f32 %v623_v27, 0.0  ;;  %v461_v42 = vpop.f32.mrb[9].mxu0  ;;  %v525_v43 = vpop.f32.mrb[9].mxu1 }
  0xfb   : > { %801 = vst.msk [vmem:[%s1216_s10 + $0x18] sm:$0xf] %vm794_vm1, %v970_v28  ;;  %817 = vst.msk [vmem:[%s1216_s10 + $0x58] sm:$0xf] %vm794_vm1, %v986_v29  ;;  %v971_v38 = vpack.c.bf16 %v641_v30, %v641_v30  ;;  %v987_v39 = vpack.c.bf16 %v657_v31, %v657_v31  ;;  %v573_v40 = vmul.f32 %v1034_v36, %v1190_v20  ;;  %v1035_v48 = vpop.f32.mrb[10].mxu0  ;;  %v1051_v49 = vpop.f32.mrb[10].mxu1 }
  0xfc   : > { %v589_v41 = vmul.f32 %v1050_v37, %v1190_v20  ;;  %799 = vst.msk [vmem:[%s1216_s10 + $0x10] sm:$0xf] %vm794_vm1, %v968_v32  ;;  %815 = vst.msk [vmem:[%s1216_s10 + $0x50] sm:$0xf] %vm794_vm1, %v984_v33  ;;  %v969_v44 = vpack.c.bf16 %v639_v34, %v639_v34  ;;  %v985_v45 = vpack.c.bf16 %v655_v35, %v655_v35  ;;  %v464_v54 = vpop.f32.mrb[11].mxu0  ;;  %v528_v55 = vpop.f32.mrb[11].mxu1 }
  0xfd   : > { %v571_v46 = vmul.f32 %v1190_v20, %v461_v42  ;;  %v587_v47 = vmul.f32 %v1190_v20, %v525_v43  ;;  %802 = vst.msk [vmem:[%s1216_s10 + $0x1c] sm:$0xf] %vm794_vm1, %v971_v38  ;;  %818 = vst.msk [vmem:[%s1216_s10 + $0x5c] sm:$0xf] %vm794_vm1, %v987_v39  ;;  %v612_v50 = vadd.f32 %v1195_v22, %v573_v40 }
  0xfe   : > { %v628_v51 = vadd.f32 %v1195_v22, %v589_v41  ;;  %v574_v52 = vmul.f32 %v1035_v48, %v1190_v20  ;;  %v590_v53 = vmul.f32 %v1051_v49, %v1190_v20  ;;  %800 = vst.msk [vmem:[%s1216_s10 + $0x14] sm:$0xf] %vm794_vm1, %v969_v44  ;;  %816 = vst.msk [vmem:[%s1216_s10 + $0x54] sm:$0xf] %vm794_vm1, %v985_v45 }
  0xff   : > { %v610_v56 = vadd.f32 %v1195_v22, %v571_v46  ;;  %v626_v57 = vadd.f32 %v1195_v22, %v587_v47  ;;  %v572_v58 = vmul.f32 %v1190_v20, %v464_v54  ;;  %v588_v59 = vmul.f32 %v1190_v20, %v528_v55 }
 0x100   : > { %v644_v60 = vmax.f32 %v612_v50, 0.0  ;;  %v660_v61 = vmax.f32 %v628_v51, 0.0  ;;  %v613_v62 = vadd.f32 %v1195_v22, %v574_v52  ;;  %v629_v63 = vadd.f32 %v1195_v22, %v590_v53 }
 0x101   : > { %v642_v0 = vmax.f32 %v610_v56, 0.0  ;;  %v658_v1 = vmax.f32 %v626_v57, 0.0  ;;  %v611_v2 = vadd.f32 %v1195_v22, %v572_v58  ;;  %v627_v3 = vadd.f32 %v1195_v22, %v588_v59  ;;  %v1038_v12 = vpop.f32.mrb[12].mxu0  ;;  %v1054_v13 = vpop.f32.mrb[12].mxu1 }
 0x102   : > { %v974_v4 = vpack.c.bf16 %v644_v60, %v644_v60  ;;  %v990_v5 = vpack.c.bf16 %v660_v61, %v660_v61  ;;  %v645_v6 = vmax.f32 %v613_v62, 0.0  ;;  %v661_v7 = vmax.f32 %v629_v63, 0.0  ;;  %v477_v18 = vpop.f32.mrb[13].mxu0  ;;  %v541_v19 = vpop.f32.mrb[13].mxu1 }
 0x103   : > { %v972_v8 = vpack.c.bf16 %v642_v0, %v642_v0  ;;  %v988_v9 = vpack.c.bf16 %v658_v1, %v658_v1  ;;  %v643_v10 = vmax.f32 %v611_v2, 0.0  ;;  %v659_v11 = vmax.f32 %v627_v3, 0.0  ;;  %v1039_v26 = vpop.f32.mrb[14].mxu0  ;;  %v1055_v27 = vpop.f32.mrb[14].mxu1 }
 0x104   : > { %805 = vst.msk [vmem:[%s1216_s10 + $0x28] sm:$0xf] %vm794_vm1, %v974_v4  ;;  %821 = vst.msk [vmem:[%s1216_s10 + $0x68] sm:$0xf] %vm794_vm1, %v990_v5  ;;  %v975_v14 = vpack.c.bf16 %v645_v6, %v645_v6  ;;  %v991_v15 = vpack.c.bf16 %v661_v7, %v661_v7  ;;  %v577_v16 = vmul.f32 %v1038_v12, %v1190_v20  ;;  %v480_v32 = vpop.f32.mrb[15].mxu0  ;;  %v544_v33 = vpop.f32.mrb[15].mxu1 }
 0x105   : > { %v593_v17 = vmul.f32 %v1054_v13, %v1190_v20  ;;  %803 = vst.msk [vmem:[%s1216_s10 + $0x20] sm:$0xf] %vm794_vm1, %v972_v8  ;;  %819 = vst.msk [vmem:[%s1216_s10 + $0x60] sm:$0xf] %vm794_vm1, %v988_v9  ;;  %v973_v21 = vpack.c.bf16 %v643_v10, %v643_v10  ;;  %v989_v23 = vpack.c.bf16 %v659_v11, %v659_v11 }
 0x106   : > { %v575_v24 = vmul.f32 %v1190_v20, %v477_v18  ;;  %v591_v25 = vmul.f32 %v1190_v20, %v541_v19  ;;  %806 = vst.msk [vmem:[%s1216_s10 + $0x2c] sm:$0xf] %vm794_vm1, %v975_v14  ;;  %822 = vst.msk [vmem:[%s1216_s10 + $0x6c] sm:$0xf] %vm794_vm1, %v991_v15  ;;  %v616_v28 = vadd.f32 %v1195_v22, %v577_v16 }
 0x107   : > { %v632_v29 = vadd.f32 %v1195_v22, %v593_v17  ;;  %v578_v30 = vmul.f32 %v1039_v26, %v1190_v20  ;;  %v594_v31 = vmul.f32 %v1055_v27, %v1190_v20  ;;  %804 = vst.msk [vmem:[%s1216_s10 + $0x24] sm:$0xf] %vm794_vm1, %v973_v21  ;;  %820 = vst.msk [vmem:[%s1216_s10 + $0x64] sm:$0xf] %vm794_vm1, %v989_v23 }
 0x108   : > { %v614_v34 = vadd.f32 %v1195_v22, %v575_v24  ;;  %v630_v35 = vadd.f32 %v1195_v22, %v591_v25  ;;  %v576_v36 = vmul.f32 %v1190_v20, %v480_v32  ;;  %v592_v37 = vmul.f32 %v1190_v20, %v544_v33 }
 0x109   : > { %v648_v38 = vmax.f32 %v616_v28, 0.0  ;;  %v664_v39 = vmax.f32 %v632_v29, 0.0  ;;  %v617_v40 = vadd.f32 %v1195_v22, %v578_v30  ;;  %v633_v41 = vadd.f32 %v1195_v22, %v594_v31 }
 0x10a   : > { %v646_v42 = vmax.f32 %v614_v34, 0.0  ;;  %v662_v43 = vmax.f32 %v630_v35, 0.0  ;;  %v615_v44 = vadd.f32 %v1195_v22, %v576_v36  ;;  %v631_v45 = vadd.f32 %v1195_v22, %v592_v37 }
 0x10b   : > { %v978_v46 = vpack.c.bf16 %v648_v38, %v648_v38  ;;  %v994_v47 = vpack.c.bf16 %v664_v39, %v664_v39  ;;  %v649_v20 = vmax.f32 %v617_v40, 0.0  ;;  %v665_v48 = vmax.f32 %v633_v41, 0.0 }
 0x10c   : > { %v976_v49 = vpack.c.bf16 %v646_v42, %v646_v42  ;;  %v992_v50 = vpack.c.bf16 %v662_v43, %v662_v43  ;;  %v647_v51 = vmax.f32 %v615_v44, 0.0  ;;  %v663_v52 = vmax.f32 %v631_v45, 0.0 }
 0x10d   : > { %809 = vst.msk [vmem:[%s1216_s10 + $0x38] sm:$0xf] %vm794_vm1, %v978_v46  ;;  %825 = vst.msk [vmem:[%s1216_s10 + $0x78] sm:$0xf] %vm794_vm1, %v994_v47  ;;  %v979_v53 = vpack.c.bf16 %v649_v20, %v649_v20  ;;  %v995_v54 = vpack.c.bf16 %v665_v48, %v665_v48 }
 0x10e   : > { %807 = vst.msk [vmem:[%s1216_s10 + $0x30] sm:$0xf] %vm794_vm1, %v976_v49  ;;  %823 = vst.msk [vmem:[%s1216_s10 + $0x70] sm:$0xf] %vm794_vm1, %v992_v50  ;;  %v977_v22 = vpack.c.bf16 %v647_v51, %v647_v51  ;;  %v993_v55 = vpack.c.bf16 %v663_v52, %v663_v52 }
 0x10f   : > { %810 = vst.msk [vmem:[%s1216_s10 + $0x3c] sm:$0xf] %vm794_vm1, %v979_v53  ;;  %826 = vst.msk [vmem:[%s1216_s10 + $0x7c] sm:$0xf] %vm794_vm1, %v995_v54 }
 0x110   : > { %808 = vst.msk [vmem:[%s1216_s10 + $0x34] sm:$0xf] %vm794_vm1, %v977_v22  ;;  %824 = vst.msk [vmem:[%s1216_s10 + $0x74] sm:$0xf] %vm794_vm1, %v993_v55 }
 0x111 PF: > { %s14_s15 = sadd.s32 1, %s1098_s15  }
 0x112   : > { %p11_p4 = scmp.ge.s32.totalorder %s14_s15, 4  }
 0x114   :  { %13 = sbr.rel (!%p11_p4) target bundleno = 1 (0x1), region = 66 }

// kernel: _lambda_.5
= control target key start
LH: loop header
LB: loop body
LE: loop exit
PB: predicated region body
PF: predicated region fallthrough
CT: control target
= control target key end

     0   :  { %13 = vsyncpa [#allocation3], 0  ;;  %s2134_s0 = inlined_call_operand.vmem [shape: bf16[512,32], index: 0, kind: input, shape index: {}]   ;;  %s2135_s1 = inlined_call_operand.vmem [shape: bf16[32,128], index: 1, kind: input, shape index: {}]   ;;  %s2136_s2 = inlined_call_operand.vmem [shape: f32[1,128], index: 2, kind: input, shape index: {}]   ;;  %s2137_s3 = inlined_call_operand.vmem [shape: f32[1,128], index: 3, kind: input, shape index: {}]   ;;  %s2138_s4 = inlined_call_operand.vmem [shape: bf16[512,64], index: 4, kind: input, shape index: {}]   ;;  %s2139_s5 = inlined_call_operand.vmem [shape: bf16[64,128], index: 5, kind: input, shape index: {}]   ;;  %s2140_s6 = inlined_call_operand.vmem [shape: f32[1,128], index: 6, kind: input, shape index: {}]   ;;  %s2141_s7 = inlined_call_operand.vmem [shape: f32[1,128], index: 7, kind: input, shape index: {}]   ;;  %s2142_s8 = inlined_call_operand.hbm [shape: f32[512,128], index: 8, kind: output, shape index: {}]  }
   0x1   :  { %15 = vsyncpa [#allocation3 + $0x1], 0  ;;  %s1756_s27 = smov 0   ;;  %s1758_s28 = smov 0  }
   0x2   :  { %s1760_s29 = smov 0   ;;  %s1762_s30 = smov 0  }
   0x3 LB: > { %s1777_s9 = sadd.s32 4294967295, %s1706_s30   ;;  %s1362_s10 = sadd.s32 4294967294, %s1706_s30   ;;  %s1706_s30 = sphi %s1762_s30, %s2148_s30   ;;  %s1702_s29 = sphi %s1760_s29, %s2147_s29   ;;  %s1698_s28 = sphi %s1758_s28, %s2146_s28   ;;  %s1694_s27 = sphi %s1756_s27, %s2145_s27  }
   0x4   : > { %s1781_s11 = sadd.s32 1, %s1706_s30   ;;  %s206_s12 = sadd.s32 1, %s1702_s29 }
   0x5   : > { %s203_s13 = ssub.s32 %s1706_s30, %s1781_s11  ;;  %p216_p0 = scmp.ne.s32.totalorder %s1702_s29, %s1698_s28 }
   0x6   : > { %p204_p1 = scmp.eq.s32.totalorder %s203_s13, 0  ;;  %p217_p2 = scmp.eq.s32.totalorder %s1777_s9, 1 }
   0x7   : > { %p222_p3 = scmp.ne.s32.totalorder %s1698_s28, %s1694_s27  ;;  %p223_p4 = scmp.eq.s32.totalorder %s1362_s10, 1 }
   0x8   : > { %s1792_s14 = scalar_select %p204_p1, %s1702_s29, %s206_s12  }
   0x9   : > { %p1794_p5 = por %p217_p2, %p216_p0  ;;  %p1798_p6 = por %p223_p4, %p222_p3 }
   0xa   : > { %p1365_p7 = scmp.ge.s32.totalorder %s1706_s30, 1  ;;  %p277_p8 = scmp.lt.s32.totalorder %s1706_s30, 3 }
   0xc   : > { %p278_p9 = pnand %p1365_p7, %p277_p8 }
   0xd   : > { %v1606_v0 = vld [vmem:[%s2139_s5] sm:$0xff] (!%p278_p9)   ;;  %s1367_s19 = sshll.u32 (!%p278_p9), %s1777_s9, 5  ;;  %v1607_v1 = vld [vmem:[%s2139_s5 + $0x8] sm:$0xff] (!%p278_p9)   ;;  %v1609_v3 = vld [vmem:[%s2139_s5 + $0x10] sm:$0xff] (!%p278_p9)   ;;  %vm458_vm0 = vcmask (!%p278_p9), 261120   ;;  %vm890_vm1 = vcmask (!%p278_p9), 523264  }
   0xe   : > { %281 = sbr.rel (%p278_p9) target bundleno = 324 (0x144), region = 52  ;;  %p317_p10 = scmp.lt.s32.totalorder (!%p278_p9), %s1367_s19, 63  ;;  %1525 = vmatprep.subr.bf16.mxu1 (!%p278_p9), %v1606_v0  ;;  %v1608_v2 = vld [vmem:[%s2135_s1] sm:$0xff] (!%p278_p9)   ;;  %v1610_v4 = vld [vmem:[%s2135_s1 + $0x8] sm:$0xff] (!%p278_p9)   ;;  %v1612_v5 = vld [vmem:[%s2139_s5 + $0x18] sm:$0xff] (!%p278_p9)  }
   0xf   : > { %1526 = vmatpush3.bf16.msra.mxu1 (!%p278_p9), %v1606_v0  ;;  %1489 = vmatprep.subr.bf16.mxu0 (!%p278_p9), %v1608_v2  ;;  %v1900_v39 = vld [vmem:[%s2136_s2] ss:$0 sm:$0xff] (!%p278_p9)  ;;  %s313_s17 = sand.u32 (!%p278_p9), 1, %s1698_s28   ;;  %s1450_s23 = sshll.u32 (!%p278_p9), %s1777_s9, 12 }
  0x10   : > { %1527 = vmatprep.subr.bf16.mxu1 (!%p278_p9), %v1607_v1  ;;  %1490 = vmatpush3.bf16.msra.mxu0 (!%p278_p9), %v1608_v2  ;;  %v1906_v44 = vld [vmem:[%s2137_s3] ss:$0 sm:$0xff] (!%p278_p9)  ;;  %s1366_s21 = sshll.u32 (!%p278_p9), %s313_s17, 8  ;;  %s2084_s26 = scalar_lea.hbm (!%p278_p9), %s2142_s8, %s1450_s23 }
  0x11   : > { %1491 = vmatprep.subr.bf16.mxu0 (!%p278_p9), %v1610_v4  ;;  %v1912_v46 = vld [vmem:[%s2140_s6] ss:$0 sm:$0xff] (!%p278_p9)  ;;  %s1938_s22 = scalar_lea.vmem (!%p278_p9), [#allocation2], %s1366_s21  ;;  %s2093_s9 = scalar_lea.sflag (!%p278_p9), [#allocation3], %s313_s17 }
  0x12   : > { %v1918_v48 = vld [vmem:[%s2141_s7] ss:$0 sm:$0xff] (!%p278_p9) }
  0x13   : > { %1528 = vmatpush3.bf16.msra.mxu1 (!%p278_p9), %v1607_v1 }
  0x14   : > { %1529 = vmatprep.subr.bf16.mxu1 (!%p278_p9), %v1609_v3  ;;  %1492 = vmatpush3.bf16.msra.mxu0 (!%p278_p9), %v1610_v4 }
  0x15   : > { %s2150_s19 = smov (!%p317_p10, %s1367_s19), 63 }
  0x16   : > { %s1368_s12 = sshll.u32 %s2150_s19, 2 }
  0x17   : > { %s1823_s18 = scalar_lea.vmem %s2134_s0, %s1368_s12  ;;  %s1831_s24 = scalar_lea.vmem %s2138_s4, %s1368_s12  ;;  %1530 = vmatpush3.bf16.msra.mxu1 %v1609_v3 }
  0x18   : > { %v1611_v6 = vld [vmem:[%s1823_s18] sm:$0xff]   ;;  %v1613_v7 = vld [vmem:[%s1823_s18 + $0x8] sm:$0xff]   ;;  %v1616_v9 = vld [vmem:[%s1823_s18 + $0x10] sm:$0xff]   ;;  %1531 = vmatprep.subr.bf16.mxu1 %v1612_v5  ;;  %s1708_s12 = smov [#allocation2]  }
  0x19   : > { %1493 = vmatprep.mubr.msk.bf16.mxu0 %vm458_vm0, %v1611_v6  ;;  %v1614_v8 = vld [vmem:[%s1831_s24] sm:$0xff]   ;;  %v1615_v10 = vld [vmem:[%s1831_s24 + $0x8] sm:$0xff]   ;;  %v1618_v11 = vld [vmem:[%s1831_s24 + $0x10] sm:$0xff]   ;;  %s1648_s13 = sshll.u32 %s1708_s12, 4  ;;  %s1649_s13 = int_to_ptr.vmem [resolvable:$false] %s1648_s13 }
  0x1a   : > { %1533 = vmatprep.mubr.msk.bf16.mxu1 %vm890_vm1, %v1614_v8  ;;  %1494 = vmatmul.mubr.msk.bf16.vlgmr.msra.gmra.mrb[0].mxu0 %vm458_vm0, %v1613_v7  ;;  %v1617_v12 = vld [vmem:[%s1823_s18 + $0x18] sm:$0xff]   ;;  %v1620_v13 = vld [vmem:[%s1823_s18 + $0x20] sm:$0xff]   ;;  %v1621_v16 = vld [vmem:[%s1823_s18 + $0x28] sm:$0xff]  }
  0x1b   : > { %1497 = vmatprep.mubr.msk.bf16.mxu0 %vm458_vm0, %v1616_v9  ;;  %1532 = vmatpush3.bf16.msra.mxu1 %v1612_v5  ;;  %v1619_v14 = vld [vmem:[%s1831_s24 + $0x18] sm:$0xff]   ;;  %v1622_v15 = vld [vmem:[%s1831_s24 + $0x20] sm:$0xff]   ;;  %v1624_v17 = vld [vmem:[%s1823_s18 + $0x30] sm:$0xff]  }
  0x1c   : > { %v1623_v18 = vld [vmem:[%s1831_s24 + $0x28] sm:$0xff]   ;;  %v1626_v19 = vld [vmem:[%s1831_s24 + $0x30] sm:$0xff]   ;;  %v1625_v20 = vld [vmem:[%s1823_s18 + $0x38] sm:$0xff]  }
  0x1d   : > { %v1628_v21 = vld [vmem:[%s1823_s18 + $0x40] sm:$0xff]   ;;  %v1627_v22 = vld [vmem:[%s1831_s24 + $0x38] sm:$0xff]   ;;  %v1629_v24 = vld [vmem:[%s1823_s18 + $0x48] sm:$0xff]  }
  0x1e   : > { %1534 = vmatmul.mubr.msk.bf16.vlgmr.msra.gmra.mrb[0].mxu1 %vm890_vm1, %v1615_v10  ;;  %v1630_v23 = vld [vmem:[%s1831_s24 + $0x40] sm:$0xff]   ;;  %v1632_v25 = vld [vmem:[%s1823_s18 + $0x50] sm:$0xff]   ;;  %v1631_v26 = vld [vmem:[%s1831_s24 + $0x48] sm:$0xff]  }
  0x1f   : > { %1537 = vmatprep.mubr.msk.bf16.mxu1 %vm890_vm1, %v1618_v11  ;;  %v1634_v27 = vld [vmem:[%s1831_s24 + $0x50] sm:$0xff]   ;;  %v1633_v28 = vld [vmem:[%s1823_s18 + $0x58] sm:$0xff]   ;;  %v1636_v29 = vld [vmem:[%s1823_s18 + $0x60] sm:$0xff]  }
  0x20   : > { %v1635_v30 = vld [vmem:[%s1831_s24 + $0x58] sm:$0xff]   ;;  %v1638_v31 = vld [vmem:[%s1831_s24 + $0x60] sm:$0xff]   ;;  %v1637_v32 = vld [vmem:[%s1823_s18 + $0x68] sm:$0xff]  }
  0x21   : > { %v1640_v33 = vld [vmem:[%s1823_s18 + $0x70] sm:$0xff]   ;;  %v1639_v34 = vld [vmem:[%s1831_s24 + $0x68] sm:$0xff]   ;;  %v1641_v36 = vld [vmem:[%s1823_s18 + $0x78] sm:$0xff]   ;;  %s1650_s18 = scalar_lea.vmem %s1649_s13, 8192 }
  0x22   : > { %1498 = vmatmul.mubr.msk.bf16.gmra.mrb[4].mxu0 %vm458_vm0, %v1617_v12  ;;  %v1642_v35 = vld [vmem:[%s1831_s24 + $0x70] sm:$0xff]   ;;  %v1643_v37 = vld [vmem:[%s1831_s24 + $0x78] sm:$0xff]   ;;  %s1288_s24 = sshll.u32 %s1938_s22, 4  ;;  %s2086_s24 = int_to_ptr.vmem [resolvable:$true] %s1288_s24 }
  0x23   : > { %1501 = vmatprep.mubr.msk.bf16.mxu0 %vm458_vm0, %v1620_v13  ;;  %s1644_s10 = scalar_lea.vmem %s2086_s24, 4096  ;;  %p1651_p0 = scmp.lt.s32.totalorder %s2086_s24, %s1649_s13 }
  0x24   : > { %p1645_p11 = scmp.ne.s32.totalorder %s2086_s24, %s1644_s10  ;;  %p1652_p1 = scmp.lt.s32.totalorder %s1650_s18, %s1644_s10 }
  0x26   : > { %1538 = vmatmul.mubr.msk.bf16.gmra.mrb[4].mxu1 %vm890_vm1, %v1619_v14  ;;  %p1646_p12 = pnand %p1645_p11, %p1794_p5  ;;  %p1653_p2 = por %p1652_p1, %p1651_p0 }
  0x27   : > { %1541 = vmatprep.mubr.msk.bf16.mxu1 %vm890_vm1, %v1622_v15 }
  0x28   : > { %p1647_p13 = pneg %p1646_p12 }
  0x2a   : > { %1502 = vmatmul.mubr.msk.bf16.gmra.mrb[8].mxu0 %vm458_vm0, %v1621_v16  ;;  %p1654_p3 = pnand %p1653_p2, %p1647_p13 }
  0x2b   : > { %1505 = vmatprep.mubr.msk.bf16.mxu0 %vm458_vm0, %v1624_v17 }
  0x2e   : > { %1542 = vmatmul.mubr.msk.bf16.gmra.mrb[8].mxu1 %vm890_vm1, %v1623_v18 }
  0x2f   : > { %1545 = vmatprep.mubr.msk.bf16.mxu1 %vm890_vm1, %v1626_v19 }
  0x32   : > { %1506 = vmatmul.mubr.msk.bf16.gmra.mrb[12].mxu0 %vm458_vm0, %v1625_v20 }
  0x33   : > { %1509 = vmatprep.mubr.msk.bf16.mxu0 %vm458_vm0, %v1628_v21 }
  0x36   : > { %1546 = vmatmul.mubr.msk.bf16.gmra.mrb[12].mxu1 %vm890_vm1, %v1627_v22 }
  0x37   : > { %1549 = vmatprep.mubr.msk.bf16.mxu1 %vm890_vm1, %v1630_v23 }
  0x3a   : > { %1510 = vmatmul.mubr.msk.bf16.gmra.mrb[16].mxu0 %vm458_vm0, %v1629_v24 }
  0x3b   : > { %1513 = vmatprep.mubr.msk.bf16.mxu0 %vm458_vm0, %v1632_v25 }
  0x3e   : > { %1550 = vmatmul.mubr.msk.bf16.gmra.mrb[16].mxu1 %vm890_vm1, %v1631_v26 }
  0x3f   : > { %1553 = vmatprep.mubr.msk.bf16.mxu1 %vm890_vm1, %v1634_v27 }
  0x42   : > { %1514 = vmatmul.mubr.msk.bf16.gmra.mrb[20].mxu0 %vm458_vm0, %v1633_v28 }
  0x43   : > { %1517 = vmatprep.mubr.msk.bf16.mxu0 %vm458_vm0, %v1636_v29 }
  0x46   : > { %1554 = vmatmul.mubr.msk.bf16.gmra.mrb[20].mxu1 %vm890_vm1, %v1635_v30 }
  0x47   : > { %1557 = vmatprep.mubr.msk.bf16.mxu1 %vm890_vm1, %v1638_v31 }
  0x4a   : > { %1518 = vmatmul.mubr.msk.bf16.gmra.mrb[24].mxu0 %vm458_vm0, %v1637_v32 }
  0x4b   : > { %1521 = vmatprep.mubr.msk.bf16.mxu0 %vm458_vm0, %v1640_v33 }
  0x4e   : > { %1558 = vmatmul.mubr.msk.bf16.gmra.mrb[24].mxu1 %vm890_vm1, %v1639_v34 }
  0x4f   : > { %1561 = vmatprep.mubr.msk.bf16.mxu1 %vm890_vm1, %v1642_v35 }
  0x52   : > { %1522 = vmatmul.mubr.msk.bf16.gmra.mrb[28].mxu0 %vm458_vm0, %v1641_v36 }
  0x56   : > { %1562 = vmatmul.mubr.msk.bf16.gmra.mrb[28].mxu1 %vm890_vm1, %v1643_v37 }
  0xed   : > { %v1495_v38 = vpop.f32.mrb[0].mxu0 }
  0xee   : > { %v541_v40 = vpop.f32.mrb[1].mxu0  ;;  %v677_v42 = vmul.f32 %v1495_v38, %v1900_v39 }
  0xef   : > { %v1496_v41 = vpop.f32.mrb[2].mxu0  ;;  %v675_v45 = vmul.f32 %v1900_v39, %v541_v40 }
  0xf0   : > { %v544_v43 = vpop.f32.mrb[3].mxu0  ;;  %v716_v49 = vadd.f32 %v1906_v44, %v677_v42  ;;  %v678_v50 = vmul.f32 %v1496_v41, %v1900_v39 }
  0xf1   : > { %v1535_v47 = vpop.f32.mrb[0].mxu1  ;;  %v714_v53 = vadd.f32 %v1906_v44, %v675_v45  ;;  %v676_v54 = vmul.f32 %v1900_v39, %v544_v43 }
  0xf2   : > { %v1109_v51 = vmul.f32 %v1535_v47, %v1912_v46  ;;  %v973_v52 = vpop.f32.mrb[1].mxu1  ;;  %v717_v1 = vadd.f32 %v1906_v44, %v678_v50 }
  0xf3   : > { %v1107_v55 = vmul.f32 %v1912_v46, %v973_v52  ;;  %v1536_v56 = vpop.f32.mrb[2].mxu1  ;;  %v715_v6 = vadd.f32 %v1906_v44, %v676_v54 }
  0xf4   : > { %v1148_v58 = vadd.f32 %v1918_v48, %v1109_v51  ;;  %v1110_v59 = vmul.f32 %v1536_v56, %v1912_v46  ;;  %v976_v60 = vpop.f32.mrb[3].mxu1 }
  0xf5   : > { %v1499_v57 = vpop.f32.mrb[4].mxu0  ;;  %v1146_v62 = vadd.f32 %v1918_v48, %v1107_v55  ;;  %v1108_v63 = vmul.f32 %v1912_v46, %v976_v60 }
  0xf6   : > { %v557_v61 = vpop.f32.mrb[5].mxu0  ;;  %v1180_v2 = vadd.f32 %v1148_v58, %v716_v49  ;;  %v1149_v3 = vadd.f32 %v1918_v48, %v1110_v59  ;;  %v681_v4 = vmul.f32 %v1499_v57, %v1900_v39 }
  0xf7   : > { %v1500_v0 = vpop.f32.mrb[6].mxu0  ;;  %v1178_v7 = vadd.f32 %v1146_v62, %v714_v53  ;;  %v1147_v8 = vadd.f32 %v1918_v48, %v1108_v63  ;;  %v679_v9 = vmul.f32 %v1900_v39, %v557_v61 }
  0xf8   : > { %v560_v5 = vpop.f32.mrb[7].mxu0  ;;  %v1212_v10 = vmax.f32 %v1180_v2, 0.0  ;;  %v1181_v11 = vadd.f32 %v1149_v3, %v717_v1  ;;  %v720_v16 = vadd.f32 %v1906_v44, %v681_v4  ;;  %v682_v17 = vmul.f32 %v1500_v0, %v1900_v39 }
  0xf9   : > { %v1210_v12 = vmax.f32 %v1178_v7, 0.0  ;;  %v1179_v13 = vadd.f32 %v1147_v8, %v715_v6  ;;  %v1539_v14 = vpop.f32.mrb[4].mxu1  ;;  %v718_v21 = vadd.f32 %v1906_v44, %v679_v9  ;;  %v680_v22 = vmul.f32 %v1900_v39, %v560_v5 }
  0xfa   : > { %1244 = vst [vmem:[%s1938_s22 + $0x10] sm:$0xff] %v1212_v10  ;;  %v1213_v15 = vmax.f32 %v1181_v11, 0.0  ;;  %v1113_v18 = vmul.f32 %v1539_v14, %v1912_v46  ;;  %v989_v19 = vpop.f32.mrb[5].mxu1  ;;  %v721_v33 = vadd.f32 %v1906_v44, %v682_v17 }
  0xfb   : > { %1242 = vst [vmem:[%s1938_s22] sm:$0xff] %v1210_v12  ;;  %v1211_v20 = vmax.f32 %v1179_v13, 0.0  ;;  %v1111_v23 = vmul.f32 %v1912_v46, %v989_v19  ;;  %v1540_v24 = vpop.f32.mrb[6].mxu1  ;;  %v719_v38 = vadd.f32 %v1906_v44, %v680_v22 }
  0xfc   : > { %1245 = vst [vmem:[%s1938_s22 + $0x18] sm:$0xff] %v1213_v15  ;;  %v1152_v26 = vadd.f32 %v1918_v48, %v1113_v18  ;;  %v1114_v27 = vmul.f32 %v1540_v24, %v1912_v46  ;;  %v992_v28 = vpop.f32.mrb[7].mxu1 }
  0xfd   : > { %v1503_v25 = vpop.f32.mrb[8].mxu0  ;;  %1243 = vst [vmem:[%s1938_s22 + $0x8] sm:$0xff] %v1211_v20  ;;  %v1150_v30 = vadd.f32 %v1918_v48, %v1111_v23  ;;  %v1112_v31 = vmul.f32 %v1912_v46, %v992_v28 }
  0xfe   : > { %v573_v29 = vpop.f32.mrb[9].mxu0  ;;  %v1184_v34 = vadd.f32 %v1152_v26, %v720_v16  ;;  %v1153_v35 = vadd.f32 %v1918_v48, %v1114_v27  ;;  %v685_v36 = vmul.f32 %v1503_v25, %v1900_v39 }
  0xff   : > { %v1504_v32 = vpop.f32.mrb[10].mxu0  ;;  %v1182_v40 = vadd.f32 %v1150_v30, %v718_v21  ;;  %v1151_v41 = vadd.f32 %v1918_v48, %v1112_v31  ;;  %v683_v42 = vmul.f32 %v1900_v39, %v573_v29 }
 0x100   : > { %v576_v37 = vpop.f32.mrb[11].mxu0  ;;  %v1216_v43 = vmax.f32 %v1184_v34, 0.0  ;;  %v1185_v45 = vadd.f32 %v1153_v35, %v721_v33  ;;  %v724_v52 = vadd.f32 %v1906_v44, %v685_v36  ;;  %v686_v53 = vmul.f32 %v1504_v32, %v1900_v39 }
 0x101   : > { %v1214_v47 = vmax.f32 %v1182_v40, 0.0  ;;  %v1183_v49 = vadd.f32 %v1151_v41, %v719_v38  ;;  %v1543_v50 = vpop.f32.mrb[8].mxu1  ;;  %v722_v57 = vadd.f32 %v1906_v44, %v683_v42  ;;  %v684_v58 = vmul.f32 %v1900_v39, %v576_v37 }
 0x102   : > { %1248 = vst [vmem:[%s1938_s22 + $0x30] sm:$0xff] %v1216_v43  ;;  %v1217_v51 = vmax.f32 %v1185_v45, 0.0  ;;  %v1117_v54 = vmul.f32 %v1543_v50, %v1912_v46  ;;  %v1005_v55 = vpop.f32.mrb[9].mxu1  ;;  %v725_v5 = vadd.f32 %v1906_v44, %v686_v53 }
 0x103   : > { %1246 = vst [vmem:[%s1938_s22 + $0x20] sm:$0xff] %v1214_v47  ;;  %v1215_v56 = vmax.f32 %v1183_v49, 0.0  ;;  %v1115_v59 = vmul.f32 %v1912_v46, %v1005_v55  ;;  %v1544_v60 = vpop.f32.mrb[10].mxu1  ;;  %v723_v10 = vadd.f32 %v1906_v44, %v684_v58 }
 0x104   : > { %1249 = vst [vmem:[%s1938_s22 + $0x38] sm:$0xff] %v1217_v51  ;;  %v1156_v62 = vadd.f32 %v1918_v48, %v1117_v54  ;;  %v1118_v63 = vmul.f32 %v1544_v60, %v1912_v46  ;;  %v1008_v0 = vpop.f32.mrb[11].mxu1 }
 0x105   : > { %v1507_v61 = vpop.f32.mrb[12].mxu0  ;;  %1247 = vst [vmem:[%s1938_s22 + $0x28] sm:$0xff] %v1215_v56  ;;  %v1154_v2 = vadd.f32 %v1918_v48, %v1115_v59  ;;  %v1116_v3 = vmul.f32 %v1912_v46, %v1008_v0 }
 0x106   : > { %v589_v1 = vpop.f32.mrb[13].mxu0  ;;  %v1188_v6 = vadd.f32 %v1156_v62, %v724_v52  ;;  %v1157_v7 = vadd.f32 %v1918_v48, %v1118_v63  ;;  %v689_v8 = vmul.f32 %v1507_v61, %v1900_v39 }
 0x107   : > { %v1508_v4 = vpop.f32.mrb[14].mxu0  ;;  %v1186_v11 = vadd.f32 %v1154_v2, %v722_v57  ;;  %v1155_v12 = vadd.f32 %v1918_v48, %v1116_v3  ;;  %v687_v13 = vmul.f32 %v1900_v39, %v589_v1 }
 0x108   : > { %v592_v9 = vpop.f32.mrb[15].mxu0  ;;  %v1220_v14 = vmax.f32 %v1188_v6, 0.0  ;;  %v1189_v15 = vadd.f32 %v1157_v7, %v725_v5  ;;  %v728_v20 = vadd.f32 %v1906_v44, %v689_v8  ;;  %v690_v21 = vmul.f32 %v1508_v4, %v1900_v39 }
 0x109   : > { %v1218_v16 = vmax.f32 %v1186_v11, 0.0  ;;  %v1187_v17 = vadd.f32 %v1155_v12, %v723_v10  ;;  %v1547_v18 = vpop.f32.mrb[12].mxu1  ;;  %v726_v25 = vadd.f32 %v1906_v44, %v687_v13  ;;  %v688_v26 = vmul.f32 %v1900_v39, %v592_v9 }
 0x10a   : > { %1252 = vst [vmem:[%s1938_s22 + $0x50] sm:$0xff] %v1220_v14  ;;  %v1221_v19 = vmax.f32 %v1189_v15, 0.0  ;;  %v1121_v22 = vmul.f32 %v1547_v18, %v1912_v46  ;;  %v1021_v23 = vpop.f32.mrb[13].mxu1  ;;  %v729_v37 = vadd.f32 %v1906_v44, %v690_v21 }
 0x10b   : > { %1250 = vst [vmem:[%s1938_s22 + $0x40] sm:$0xff] %v1218_v16  ;;  %v1219_v24 = vmax.f32 %v1187_v17, 0.0  ;;  %v1119_v27 = vmul.f32 %v1912_v46, %v1021_v23  ;;  %v1548_v28 = vpop.f32.mrb[14].mxu1  ;;  %v727_v43 = vadd.f32 %v1906_v44, %v688_v26 }
 0x10c   : > { %1253 = vst [vmem:[%s1938_s22 + $0x58] sm:$0xff] %v1221_v19  ;;  %v1160_v30 = vadd.f32 %v1918_v48, %v1121_v22  ;;  %v1122_v31 = vmul.f32 %v1548_v28, %v1912_v46  ;;  %v1024_v32 = vpop.f32.mrb[15].mxu1 }
 0x10d   : > { %v1511_v29 = vpop.f32.mrb[16].mxu0  ;;  %1251 = vst [vmem:[%s1938_s22 + $0x48] sm:$0xff] %v1219_v24  ;;  %v1158_v34 = vadd.f32 %v1918_v48, %v1119_v27  ;;  %v1120_v35 = vmul.f32 %v1912_v46, %v1024_v32 }
 0x10e   : > { %v605_v33 = vpop.f32.mrb[17].mxu0  ;;  %v1192_v38 = vadd.f32 %v1160_v30, %v728_v20  ;;  %v1161_v40 = vadd.f32 %v1918_v48, %v1122_v31  ;;  %v693_v41 = vmul.f32 %v1511_v29, %v1900_v39 }
 0x10f   : > { %v1512_v36 = vpop.f32.mrb[18].mxu0  ;;  %v1190_v45 = vadd.f32 %v1158_v34, %v726_v25  ;;  %v1159_v47 = vadd.f32 %v1918_v48, %v1120_v35  ;;  %v691_v49 = vmul.f32 %v1900_v39, %v605_v33 }
 0x110   : > { %v608_v42 = vpop.f32.mrb[19].mxu0  ;;  %v1224_v50 = vmax.f32 %v1192_v38, 0.0  ;;  %v1193_v51 = vadd.f32 %v1161_v40, %v729_v37  ;;  %v732_v56 = vadd.f32 %v1906_v44, %v693_v41  ;;  %v694_v57 = vmul.f32 %v1512_v36, %v1900_v39 }
 0x111   : > { %v1222_v52 = vmax.f32 %v1190_v45, 0.0  ;;  %v1191_v53 = vadd.f32 %v1159_v47, %v727_v43  ;;  %v1551_v54 = vpop.f32.mrb[16].mxu1  ;;  %v730_v61 = vadd.f32 %v1906_v44, %v691_v49  ;;  %v692_v62 = vmul.f32 %v1900_v39, %v608_v42 }
 0x112   : > { %1256 = vst [vmem:[%s1938_s22 + $0x70] sm:$0xff] %v1224_v50  ;;  %v1225_v55 = vmax.f32 %v1193_v51, 0.0  ;;  %v1125_v58 = vmul.f32 %v1551_v54, %v1912_v46  ;;  %v1037_v59 = vpop.f32.mrb[17].mxu1  ;;  %v733_v9 = vadd.f32 %v1906_v44, %v694_v57 }
 0x113   : > { %1254 = vst [vmem:[%s1938_s22 + $0x60] sm:$0xff] %v1222_v52  ;;  %v1223_v60 = vmax.f32 %v1191_v53, 0.0  ;;  %v1123_v63 = vmul.f32 %v1912_v46, %v1037_v59  ;;  %v1552_v0 = vpop.f32.mrb[18].mxu1  ;;  %v731_v14 = vadd.f32 %v1906_v44, %v692_v62 }
 0x114   : > { %1257 = vst [vmem:[%s1938_s22 + $0x78] sm:$0xff] %v1225_v55  ;;  %v1164_v2 = vadd.f32 %v1918_v48, %v1125_v58  ;;  %v1126_v3 = vmul.f32 %v1552_v0, %v1912_v46  ;;  %v1040_v4 = vpop.f32.mrb[19].mxu1 }
 0x115   : > { %v1515_v1 = vpop.f32.mrb[20].mxu0  ;;  %1255 = vst [vmem:[%s1938_s22 + $0x68] sm:$0xff] %v1223_v60  ;;  %v1162_v6 = vadd.f32 %v1918_v48, %v1123_v63  ;;  %v1124_v7 = vmul.f32 %v1912_v46, %v1040_v4 }
 0x116   : > { %v621_v5 = vpop.f32.mrb[21].mxu0  ;;  %v1196_v10 = vadd.f32 %v1164_v2, %v732_v56  ;;  %v1165_v11 = vadd.f32 %v1918_v48, %v1126_v3  ;;  %v697_v12 = vmul.f32 %v1515_v1, %v1900_v39 }
 0x117   : > { %v1516_v8 = vpop.f32.mrb[22].mxu0  ;;  %v1194_v15 = vadd.f32 %v1162_v6, %v730_v61  ;;  %v1163_v16 = vadd.f32 %v1918_v48, %v1124_v7  ;;  %v695_v17 = vmul.f32 %v1900_v39, %v621_v5 }
 0x118   : > { %v624_v13 = vpop.f32.mrb[23].mxu0  ;;  %v1228_v18 = vmax.f32 %v1196_v10, 0.0  ;;  %v1197_v19 = vadd.f32 %v1165_v11, %v733_v9  ;;  %v736_v24 = vadd.f32 %v1906_v44, %v697_v12  ;;  %v698_v25 = vmul.f32 %v1516_v8, %v1900_v39 }
 0x119   : > { %v1226_v20 = vmax.f32 %v1194_v15, 0.0  ;;  %v1195_v21 = vadd.f32 %v1163_v16, %v731_v14  ;;  %v1555_v22 = vpop.f32.mrb[20].mxu1  ;;  %v734_v29 = vadd.f32 %v1906_v44, %v695_v17  ;;  %v696_v30 = vmul.f32 %v1900_v39, %v624_v13 }
 0x11a   : > { %1260 = vst [vmem:[%s1938_s22 + $0x90] sm:$0xff] %v1228_v18  ;;  %v1229_v23 = vmax.f32 %v1197_v19, 0.0  ;;  %v1129_v26 = vmul.f32 %v1555_v22, %v1912_v46  ;;  %v1053_v27 = vpop.f32.mrb[21].mxu1  ;;  %v737_v42 = vadd.f32 %v1906_v44, %v698_v25 }
 0x11b   : > { %1258 = vst [vmem:[%s1938_s22 + $0x80] sm:$0xff] %v1226_v20  ;;  %v1227_v28 = vmax.f32 %v1195_v21, 0.0  ;;  %v1127_v31 = vmul.f32 %v1912_v46, %v1053_v27  ;;  %v1556_v32 = vpop.f32.mrb[22].mxu1  ;;  %v735_v50 = vadd.f32 %v1906_v44, %v696_v30 }
 0x11c   : > { %1261 = vst [vmem:[%s1938_s22 + $0x98] sm:$0xff] %v1229_v23  ;;  %v1168_v34 = vadd.f32 %v1918_v48, %v1129_v26  ;;  %v1130_v35 = vmul.f32 %v1556_v32, %v1912_v46  ;;  %v1056_v36 = vpop.f32.mrb[23].mxu1 }
 0x11d   : > { %v1519_v33 = vpop.f32.mrb[24].mxu0  ;;  %1259 = vst [vmem:[%s1938_s22 + $0x88] sm:$0xff] %v1227_v28  ;;  %v1166_v38 = vadd.f32 %v1918_v48, %v1127_v31  ;;  %v1128_v40 = vmul.f32 %v1912_v46, %v1056_v36 }
 0x11e   : > { %v637_v37 = vpop.f32.mrb[25].mxu0  ;;  %v1200_v43 = vadd.f32 %v1168_v34, %v736_v24  ;;  %v1169_v45 = vadd.f32 %v1918_v48, %v1130_v35  ;;  %v701_v47 = vmul.f32 %v1519_v33, %v1900_v39 }
 0x11f   : > { %v1520_v41 = vpop.f32.mrb[26].mxu0  ;;  %v1198_v51 = vadd.f32 %v1166_v38, %v734_v29  ;;  %v1167_v52 = vadd.f32 %v1918_v48, %v1128_v40  ;;  %v699_v53 = vmul.f32 %v1900_v39, %v637_v37 }
 0x120   : > { %v640_v49 = vpop.f32.mrb[27].mxu0  ;;  %v1232_v54 = vmax.f32 %v1200_v43, 0.0  ;;  %v1201_v55 = vadd.f32 %v1169_v45, %v737_v42  ;;  %v740_v60 = vadd.f32 %v1906_v44, %v701_v47  ;;  %v702_v61 = vmul.f32 %v1520_v41, %v1900_v39 }
 0x121   : > { %v1230_v56 = vmax.f32 %v1198_v51, 0.0  ;;  %v1199_v57 = vadd.f32 %v1167_v52, %v735_v50  ;;  %v1559_v58 = vpop.f32.mrb[24].mxu1  ;;  %v738_v1 = vadd.f32 %v1906_v44, %v699_v53  ;;  %v700_v2 = vmul.f32 %v1900_v39, %v640_v49 }
 0x122   : > { %1264 = vst [vmem:[%s1938_s22 + $0xb0] sm:$0xff] %v1232_v54  ;;  %v1233_v59 = vmax.f32 %v1201_v55, 0.0  ;;  %v1133_v62 = vmul.f32 %v1559_v58, %v1912_v46  ;;  %v1069_v63 = vpop.f32.mrb[25].mxu1  ;;  %v741_v13 = vadd.f32 %v1906_v44, %v702_v61 }
 0x123   : > { %1262 = vst [vmem:[%s1938_s22 + $0xa0] sm:$0xff] %v1230_v56  ;;  %v1231_v0 = vmax.f32 %v1199_v57, 0.0  ;;  %v1131_v3 = vmul.f32 %v1912_v46, %v1069_v63  ;;  %v1560_v4 = vpop.f32.mrb[26].mxu1  ;;  %v739_v18 = vadd.f32 %v1906_v44, %v700_v2 }
 0x124   : > { %1265 = vst [vmem:[%s1938_s22 + $0xb8] sm:$0xff] %v1233_v59  ;;  %v1172_v6 = vadd.f32 %v1918_v48, %v1133_v62  ;;  %v1134_v7 = vmul.f32 %v1560_v4, %v1912_v46  ;;  %v1072_v8 = vpop.f32.mrb[27].mxu1 }
 0x125   : > { %v1523_v5 = vpop.f32.mrb[28].mxu0  ;;  %1263 = vst [vmem:[%s1938_s22 + $0xa8] sm:$0xff] %v1231_v0  ;;  %v1170_v10 = vadd.f32 %v1918_v48, %v1131_v3  ;;  %v1132_v11 = vmul.f32 %v1912_v46, %v1072_v8 }
 0x126   : > { %v653_v9 = vpop.f32.mrb[29].mxu0  ;;  %v1204_v14 = vadd.f32 %v1172_v6, %v740_v60  ;;  %v1173_v15 = vadd.f32 %v1918_v48, %v1134_v7  ;;  %v705_v16 = vmul.f32 %v1523_v5, %v1900_v39 }
 0x127   : > { %v1524_v12 = vpop.f32.mrb[30].mxu0  ;;  %v1202_v19 = vadd.f32 %v1170_v10, %v738_v1  ;;  %v1171_v20 = vadd.f32 %v1918_v48, %v1132_v11  ;;  %v703_v21 = vmul.f32 %v1900_v39, %v653_v9 }
 0x128   : > { %v656_v17 = vpop.f32.mrb[31].mxu0  ;;  %v1236_v22 = vmax.f32 %v1204_v14, 0.0  ;;  %v1205_v23 = vadd.f32 %v1173_v15, %v741_v13  ;;  %v744_v28 = vadd.f32 %v1906_v44, %v705_v16  ;;  %v706_v29 = vmul.f32 %v1524_v12, %v1900_v39 }
 0x129   : > { %v1234_v24 = vmax.f32 %v1202_v19, 0.0  ;;  %v1203_v25 = vadd.f32 %v1171_v20, %v739_v18  ;;  %v1563_v26 = vpop.f32.mrb[28].mxu1  ;;  %v742_v33 = vadd.f32 %v1906_v44, %v703_v21  ;;  %v704_v34 = vmul.f32 %v1900_v39, %v656_v17 }
 0x12a   : > { %1268 = vst [vmem:[%s1938_s22 + $0xd0] sm:$0xff] %v1236_v22  ;;  %v1237_v27 = vmax.f32 %v1205_v23, 0.0  ;;  %v1137_v30 = vmul.f32 %v1563_v26, %v1912_v46  ;;  %v1085_v31 = vpop.f32.mrb[29].mxu1  ;;  %v745_v43 = vadd.f32 %v1906_v44, %v706_v29 }
 0x12b   : > { %1266 = vst [vmem:[%s1938_s22 + $0xc0] sm:$0xff] %v1234_v24  ;;  %v1235_v32 = vmax.f32 %v1203_v25, 0.0  ;;  %v1135_v35 = vmul.f32 %v1912_v46, %v1085_v31  ;;  %v1564_v36 = vpop.f32.mrb[30].mxu1  ;;  %v743_v47 = vadd.f32 %v1906_v44, %v704_v34 }
 0x12c   : > { %1269 = vst [vmem:[%s1938_s22 + $0xd8] sm:$0xff] %v1237_v27  ;;  %v1176_v37 = vadd.f32 %v1918_v48, %v1137_v30  ;;  %v1138_v38 = vmul.f32 %v1564_v36, %v1912_v46  ;;  %v1088_v40 = vpop.f32.mrb[31].mxu1 }
 0x12d   : > { %1267 = vst [vmem:[%s1938_s22 + $0xc8] sm:$0xff] %v1235_v32  ;;  %v1174_v41 = vadd.f32 %v1918_v48, %v1135_v35  ;;  %v1136_v42 = vmul.f32 %v1912_v46, %v1088_v40 }
 0x12e   : > { %v1208_v39 = vadd.f32 %v1176_v37, %v744_v28  ;;  %v1177_v45 = vadd.f32 %v1918_v48, %v1138_v38 }
 0x12f   : > { %v1206_v49 = vadd.f32 %v1174_v41, %v742_v33  ;;  %v1175_v50 = vadd.f32 %v1918_v48, %v1136_v42 }
 0x130   : > { %v1240_v51 = vmax.f32 %v1208_v39, 0.0  ;;  %v1209_v52 = vadd.f32 %v1177_v45, %v745_v43 }
 0x131   : > { %v1238_v46 = vmax.f32 %v1206_v49, 0.0  ;;  %v1207_v53 = vadd.f32 %v1175_v50, %v743_v47 }
 0x132   : > { %1272 = vst [vmem:[%s1938_s22 + $0xf0] sm:$0xff] %v1240_v51  ;;  %v1241_v54 = vmax.f32 %v1209_v52, 0.0 }
 0x133   : > { %1270 = vst [vmem:[%s1938_s22 + $0xe0] sm:$0xff] %v1238_v46  ;;  %v1239_v44 = vmax.f32 %v1207_v53, 0.0 }
 0x134   : > { %1273 = vst [vmem:[%s1938_s22 + $0xf8] sm:$0xff] %v1241_v54 }
 0x135   : > { %1271 = vst [vmem:[%s1938_s22 + $0xe8] sm:$0xff] %v1239_v44 }
 0x136   : > { %1657 = shalt.err (!%p1654_p3)
}
 0x137   : > { %s1658_s17 = scalar_lea.hbm %s2084_s26, 4096  ;;  %s1662_s22 = scalar_lea.hbm %s2142_s8, 8192 }
 0x138   : > { %p1659_p4 = scmp.ne.s32.totalorder %s2084_s26, %s1658_s17  ;;  %p1663_p9 = scmp.lt.u32.totalorder %s2084_s26, %s2142_s8 }
 0x139   : > { %p1664_p10 = scmp.lt.u32.totalorder %s1662_s22, %s1658_s17  ;;  %p1666_p12 = scmp.lt.u32.totalorder %s1658_s17, %s2084_s26 }
 0x13a   : > { %p1660_p7 = pnand %p1659_p4, %p1794_p5 }
 0x13b   : > { %p1665_p11 = por %p1664_p10, %p1663_p9 }
 0x13c   : > { %p1661_p8 = pneg %p1660_p7 }
 0x13d   : > { %p1667_p13 = por %p1666_p12, %p1665_p11 }
 0x13f   : > { %p1668_p0 = pnand %p1667_p13, %p1661_p8 }
 0x141   : > { %1671 = shalt.err (!%p1668_p0)
}
 0x142   : > { %s1709_s25 = smov 128   ;;  %s1710_s10 = smov 8  }
 0x143   : > { %1565 = dma.vmem_to_hbm [thread:$0]  (%p1794_p5), %s2086_s24, 4096, %s2084_s26, %s2093_s9, %s1709_s25, %s1709_s25, %s1710_s10  }
 0x144 PF: > { %p1571_p1 = scmp.ge.s32.totalorder %s1706_s30, 2  ;;  %s1303_s12 = sand.u32 1, %s1694_s27  }
 0x145   : > { %s1304_s13 = scalar_lea.sflag [#allocation3], %s1303_s12 }
 0x146   : > { %p1568_p2 = pnand %p1571_p1, %p1798_p6 }
 0x148   : > { %1689 = dma.done.wait (!%p1568_p2), %s1304_s13, 4096  }
 0x149   : > { %1691 = vsyncadd (!%p1568_p2), %s1304_s13, 4294963200  ;;  %p18_p3 = scmp.ge.s32.totalorder %s1781_s11, 4   ;;  %s2145_s27 = smov %s1698_s28 }
 0x14a   : > { %s2146_s28 = smov %s1702_s29  ;;  %s2147_s29 = smov %s1792_s14 }
 0x14b   : > { %s2148_s30 = smov %s1781_s11  ;;  %20 = sbr.rel (!%p18_p3) target bundleno = 3 (0x3), region = 90 }
 0x152   :  { %1309 = vsyncpa [#allocation3], 1 }
 0x153   :  { %1311 = vsyncpa [#allocation3 + $0x1], 1 }

// kernel: _lambda_.4
= control target key start
LH: loop header
LB: loop body
LE: loop exit
PB: predicated region body
PF: predicated region fallthrough
CT: control target
= control target key end

     0   :  { %s6721_s15 = smov 0   ;;  %s8620_s0 = inlined_call_operand.vmem [shape: bf16[2,18,18,32], index: 0, kind: input, shape index: {}]   ;;  %s8621_s1 = inlined_call_operand.vmem [shape: bf16[288,32], index: 1, kind: input, shape index: {}]   ;;  %s8622_s2 = inlined_call_operand.vmem [shape: f32[1,32], index: 2, kind: input, shape index: {}]   ;;  %s8623_s3 = inlined_call_operand.vmem [shape: f32[1,32], index: 3, kind: input, shape index: {}]   ;;  %s8624_s4 = inlined_call_operand.vmem [shape: bf16[2,256,32], index: 4, kind: output, shape index: {}]  }
   0x1 LB: > { %s5183_s16 = sadd.s32 4294967295, %s6694_s15   ;;  %p5187_p0 = scmp.ge.s32.totalorder %s6694_s15, 1  ;;  %s6694_s15 = sphi %s6721_s15, %s14_s15  }
   0x2   : > { %p162_p1 = scmp.lt.s32.totalorder %s6694_s15, 3 }
   0x4   : > { %p163_p2 = pnand %p5187_p0, %p162_p1 }
   0x6   : > { %166 = sbr.rel (%p163_p2) target bundleno = 591 (0x24f), region = 36 }
   0xd   : > { %v6561_v0 = vld [vmem:[%s8621_s1 + $0x10] sm:$0xff]   ;;  %p188_p3 = scmp.lt.s32.totalorder %s5183_s16, 1  ;;  %v6562_v1 = vld [vmem:[%s8621_s1 + $0x40] sm:$0xff]   ;;  %v6563_v2 = vld [vmem:[%s8621_s1 + $0x18] sm:$0xff]   ;;  %vm251_vm0 = vsmask.f32 3328 }
   0xe   : > { %5968 = vmatprep.subr.bf16.mxu1 %v6561_v0  ;;  %6112 = vmatprep.subr.bf16.mxu0 %v6562_v1  ;;  %v6564_v3 = vld [vmem:[%s8621_s1 + $0x48] sm:$0xff]   ;;  %v6747_v4 = vld [vmem:[%s8621_s1] sm:$0xff]   ;;  %vm252_vm1 = vsmask.f32 7440  ;;  %v6757_v5 = vld [vmem:[%s8621_s1 + $0x50] sm:$0xff]   ;;  %vm702_vm3 = vcmask 261120  }
   0xf   : > { %s8693_s16 = smov (!%p188_p3, %s5183_s16), 1  ;;  %5969 = vmatpush3.bf16.msra.mxu1 %v6561_v0  ;;  %6113 = vmatpush3.bf16.msra.mxu0 %v6562_v1  ;;  %vm6777_vm2 = vmor %vm251_vm0, %vm252_vm1  ;;  %vm1261_vm4 = vcmask 1042432   ;;  %vm1262_vm5 = vcmask 1046532   ;;  %vm5095_vm7 = vcmask 257024  }
  0x10   : > { %5970 = vmatprep.subr.bf16.mxu1 %v6563_v2  ;;  %s6552_s25 = smul.u32 216, %s8693_s16  ;;  %6114 = vmatprep.subr.bf16.mxu0 %v6564_v3  ;;  %vm7005_vm6 = vmor %vm1261_vm4, %vm1262_vm5  ;;  %s5773_s19 = sshll.u32 %s8693_s16, 7 }
  0x11   : > { %s8487_s22 = scalar_lea.vmem %s8624_s4, %s5773_s19 }
  0x12   : > { %s6752_s30 = scalar_lea.vmem %s8620_s0, %s6552_s25 }
  0x13   : > { %5971 = vmatpush3.bf16.msra.mxu1 %v6563_v2  ;;  %v199_v6 = vld [vmem:[%s6752_s30] sm:$0xf]  ;;  %v200_v7 = vld [vmem:[%s6752_s30 + $0x4] sm:$0xf]  ;;  %v235_v8 = vld [vmem:[%s6752_s30 + $0x8] sm:$0x1]  ;;  %6115 = vmatpush3.bf16.msra.mxu0 %v6564_v3 }
  0x14   : > { %v255_v9 = vshrl.u32 %v199_v6, 16  ;;  %v258_v10 = vshll.u32 %v199_v6, 16  ;;  %v264_v11 = vshll.u32 %v200_v7, 16  ;;  %v268_v12 = vshrl.u32 %v200_v7, 16  ;;  %6004 = vmatprep.subr.bf16.mxu1 %v6747_v4  ;;  %v5375_v13 = vld [vmem:[%s6752_s30 + $0xc] sm:$0xf]  ;;  %6148 = vmatprep.subr.bf16.mxu0 %v6757_v5 }
  0x15   : > { %v274_v14 = vshll.u32 %v235_v8, 16  ;;  %v6765_v15 = vld [vmem:[%s6752_s30 + $0x10] sm:$0xf]  ;;  %v6768_v16 = vld [vmem:[%s6752_s30 + $0x14] sm:$0x1]  ;;  %v2100_v22 = vshrl.u32 %v5375_v13, 16 }
  0x16   : > { %v257_v17 = vrot.slane %v255_v9, 4  ;;  %v260_v18 = vrot.slane %v258_v10, 5  ;;  %v266_v19 = vrot.slane %v264_v11, 5  ;;  %v270_v20 = vrot.slane %v268_v12, 4  ;;  %v201_v29 = vld [vmem:[%s6752_s30 + $0xc] sm:$0xf] }
  0x17   : > { %v276_v21 = vrot.slane %v274_v14, 5  ;;  %v2103_v23 = vshll.u32 %v5375_v13, 16  ;;  %v2109_v24 = vshll.u32 %v6765_v15, 16  ;;  %v2113_v27 = vshrl.u32 %v6765_v15, 16  ;;  %v202_v34 = vld [vmem:[%s6752_s30 + $0x10] sm:$0xf] }
  0x18   : > { %v261_v25 = vor.u32 %v260_v18, %v257_v17  ;;  %v271_v26 = vor.u32 %v270_v20, %v266_v19  ;;  %v2119_v28 = vshll.u32 %v6768_v16, 16  ;;  %v2102_v31 = vrot.slane %v2100_v22, 4  ;;  %v236_v40 = vld [vmem:[%s6752_s30 + $0x14] sm:$0x1]  ;;  %v5378_v51 = vld [vmem:[%s6752_s30 + $0x18] sm:$0xf] }
  0x19   : > { %v2105_v32 = vrot.slane %v2103_v23, 5  ;;  %v2111_v33 = vrot.slane %v2109_v24, 5  ;;  %v2115_v37 = vrot.slane %v2113_v27, 4  ;;  %v279_v41 = vshrl.u32 %v201_v29, 16  ;;  %v6789_v56 = vld [vmem:[%s6752_s30 + $0x1c] sm:$0xf] }
  0x1a   : > { %v262_v35 = vrot.slane %v261_v25, 4  ;;  %v272_v36 = vrot.slane %v271_v26, 4  ;;  %v2121_v39 = vrot.slane %v2119_v28, 5  ;;  %v282_v42 = vshll.u32 %v201_v29, 16  ;;  %v6797_v61 = vld [vmem:[%s6752_s30 + $0x20] sm:$0x1] }
  0x1b   : > { %v2106_v38 = vor.u32 %v2105_v32, %v2102_v31  ;;  %v2116_v45 = vor.u32 %v2115_v37, %v2111_v33  ;;  %v288_v46 = vshll.u32 %v202_v34, 16  ;;  %v281_v49 = vrot.slane %v279_v41, 4  ;;  %v203_v12 = vld [vmem:[%s6752_s30 + $0x18] sm:$0xf]  ;;  %v237_v26 = vld [vmem:[%s6752_s30 + $0x20] sm:$0x1] }
  0x1c   : > { %v267_v43 = vsel %vm6777_vm2, %v262_v35, %v266_v19  ;;  %v277_v44 = vsel %vm6777_vm2, %v272_v36, %v276_v21  ;;  %v284_v50 = vrot.slane %v282_v42, 5  ;;  %v292_v54 = vshrl.u32 %v202_v34, 16  ;;  %v204_v19 = vld [vmem:[%s6752_s30 + $0x1c] sm:$0xf]  ;;  %v5381_v34 = vld [vmem:[%s6752_s30 + $0x24] sm:$0xf] }
  0x1d   : > { %v5191_v47 = vcombine.low %v267_v43, %v277_v44  ;;  %v2107_v48 = vrot.slane %v2106_v38, 4  ;;  %v2117_v52 = vrot.slane %v2116_v45, 4  ;;  %v290_v53 = vrot.slane %v288_v46, 5 }
  0x1e   : > { %v298_v55 = vshll.u32 %v236_v40, 16  ;;  %v2854_v58 = vrot.slane %v6765_v15, 5  ;;  %v2857_v59 = vrot.slane %v6768_v16, 5  ;;  %v285_v60 = vor.u32 %v284_v50, %v281_v49  ;;  %v6568_v40 = vld [vmem:[%s8621_s1 + $0x8] sm:$0xff]   ;;  %v6567_v50 = vld [vmem:[%s8621_s1 + $0x58] sm:$0xff]  }
  0x1f   : > { %5972 = vmatprep.mubr.msk.bf16.mxu1 %vm702_vm3, %v5191_v47  ;;  %v2112_v57 = vsel %vm6777_vm2, %v2107_v48, %v2111_v33  ;;  %v2122_v62 = vsel %vm6777_vm2, %v2117_v52, %v2121_v39  ;;  %v294_v63 = vrot.slane %v292_v54, 4  ;;  %v2124_v1 = vshrl.u32 %v5378_v51, 16  ;;  %v6820_v39 = vld [vmem:[%s6752_s30 + $0x28] sm:$0xf]  ;;  %v6829_v47 = vld [vmem:[%s6752_s30 + $0x2c] sm:$0x1] }
  0x20   : > { %v300_v0 = vrot.slane %v298_v55, 5  ;;  %v5423_v2 = vcombine.low %v2112_v57, %v2122_v62  ;;  %v286_v3 = vrot.slane %v285_v60, 4  ;;  %v2127_v6 = vshll.u32 %v5378_v51, 16  ;;  %v205_v55 = vld [vmem:[%s6752_s30 + $0x24] sm:$0xf] }
  0x21   : > { %v2133_v7 = vshll.u32 %v6789_v56, 16  ;;  %v295_v8 = vor.u32 %v294_v63, %v290_v53  ;;  %v2126_v9 = vrot.slane %v2124_v1, 4  ;;  %v2137_v10 = vshrl.u32 %v6789_v56, 16  ;;  %v6571_v1 = vld [vmem:[%s8621_s1 + $0x20] sm:$0xff]  }
  0x22   : > { %v2143_v11 = vshll.u32 %v6797_v61, 16  ;;  %6116 = vmatprep.mubr.msk.bf16.mxu0 %vm702_vm3, %v5423_v2  ;;  %v291_v13 = vsel %vm6777_vm2, %v286_v3, %v290_v53  ;;  %v2129_v14 = vrot.slane %v2127_v6, 5  ;;  %v2861_v18 = vrot.slane %v6789_v56, 5 }
  0x23   : > { %v2135_v17 = vrot.slane %v2133_v7, 5  ;;  %v296_v20 = vrot.slane %v295_v8, 4  ;;  %v2139_v21 = vrot.slane %v2137_v10, 4  ;;  %v2864_v23 = vrot.slane %v6797_v61, 5 }
  0x24   : > { %v2145_v22 = vrot.slane %v2143_v11, 5  ;;  %v2130_v24 = vor.u32 %v2129_v14, %v2126_v9  ;;  %v6813_v25 = vrot.slane %v2861_v18, 4  ;;  %v303_v27 = vshrl.u32 %v203_v12, 16  ;;  %v238_v9 = vld [vmem:[%s6752_s30 + $0x2c] sm:$0x1] }
  0x25   : > { %v306_v28 = vshll.u32 %v203_v12, 16  ;;  %v301_v29 = vsel %vm6777_vm2, %v296_v20, %v300_v0  ;;  %v2140_v31 = vor.u32 %v2139_v21, %v2135_v17  ;;  %v312_v32 = vshll.u32 %v204_v19, 16  ;;  %v206_v0 = vld [vmem:[%s6752_s30 + $0x28] sm:$0xf] }
  0x26   : > { %v316_v33 = vshrl.u32 %v204_v19, 16  ;;  %v5192_v35 = vcombine.low %v291_v13, %v301_v29  ;;  %v2131_v36 = vrot.slane %v2130_v24, 4  ;;  %v305_v37 = vrot.slane %v303_v27, 4  ;;  %v5384_v19 = vld [vmem:[%s6752_s30 + $0x30] sm:$0xf] }
  0x27   : > { %v308_v38 = vrot.slane %v306_v28, 5  ;;  %v2141_v41 = vrot.slane %v2140_v31, 4  ;;  %v314_v42 = vrot.slane %v312_v32, 5  ;;  %v322_v44 = vshll.u32 %v237_v26, 16  ;;  %v6854_v26 = vld [vmem:[%s6752_s30 + $0x34] sm:$0xf] }
  0x28   : > { %v318_v43 = vrot.slane %v316_v33, 4  ;;  %5973 = vmatmul.mubr.msk.bf16.vlgmr.msra.gmra.mrb[0].mxu1 %vm702_vm3, %v5192_v35  ;;  %v2136_v45 = vsel %vm6777_vm2, %v2131_v36, %v2135_v17  ;;  %v2148_v48 = vshrl.u32 %v5381_v34, 16  ;;  %v2151_v49 = vshll.u32 %v5381_v34, 16  ;;  %v6865_v34 = vld [vmem:[%s6752_s30 + $0x38] sm:$0x1] }
  0x29   : > { %v309_v46 = vor.u32 %v308_v38, %v305_v37  ;;  %6005 = vmatpush3.bf16.msra.mxu1 %v6747_v4  ;;  %v2146_v51 = vsel %vm6777_vm2, %v2141_v41, %v2145_v22  ;;  %v324_v53 = vrot.slane %v322_v44, 5  ;;  %v2157_v54 = vshll.u32 %v6820_v39, 16 }
  0x2a   : > { %v319_v52 = vor.u32 %v318_v43, %v314_v42  ;;  %v5424_v57 = vcombine.low %v2136_v45, %v2146_v51  ;;  %v2150_v62 = vrot.slane %v2148_v48, 4  ;;  %v2153_v63 = vrot.slane %v2151_v49, 5  ;;  %6006 = vmatprep.subr.bf16.mxu1 %v6568_v40 }
  0x2b   : > { %v310_v60 = vrot.slane %v309_v46, 4  ;;  %v2159_v2 = vrot.slane %v2157_v54, 5  ;;  %v2161_v3 = vshrl.u32 %v6820_v39, 16  ;;  %v2167_v6 = vshll.u32 %v6829_v47, 16  ;;  %v207_v46 = vld [vmem:[%s6752_s30 + $0x30] sm:$0xf] }
  0x2c   : > { %v320_v4 = vrot.slane %v319_v52, 4  ;;  %6117 = vmatmul.mubr.msk.bf16.vlgmr.msra.gmra.mrb[0].mxu0 %vm702_vm3, %v5424_v57  ;;  %v2154_v8 = vor.u32 %v2153_v63, %v2150_v62  ;;  %v327_v10 = vshrl.u32 %v205_v55, 16  ;;  %v330_v11 = vshll.u32 %v205_v55, 16 }
  0x2d   : > { %v315_v7 = vsel %vm6777_vm2, %v310_v60, %v314_v42  ;;  %6149 = vmatpush3.bf16.msra.mxu0 %v6757_v5  ;;  %v2163_v13 = vrot.slane %v2161_v3, 4  ;;  %v2169_v14 = vrot.slane %v2167_v6, 5  ;;  %v336_v17 = vshll.u32 %v206_v0, 16  ;;  %6007 = vmatpush3.bf16.msra.mxu1 %v6568_v40  ;;  %v6859_v5 = vld [vmem:[%s8621_s1 + $0x60] sm:$0xff]   ;;  %v239_v60 = vld [vmem:[%s6752_s30 + $0x38] sm:$0x1] }
  0x2e   : > { %v325_v12 = vsel %vm6777_vm2, %v320_v4, %v324_v53  ;;  %v2155_v21 = vrot.slane %v2154_v8, 4  ;;  %v329_v22 = vrot.slane %v327_v10, 4  ;;  %v332_v24 = vrot.slane %v330_v11, 5  ;;  %6150 = vmatprep.subr.bf16.mxu0 %v6567_v50  ;;  %6040 = vmatprep.subr.bf16.mxu1 %v6571_v1  ;;  %v208_v53 = vld [vmem:[%s6752_s30 + $0x34] sm:$0xf] }
  0x2f   : > { %v5193_v20 = vcombine.low %v315_v7, %v325_v12  ;;  %v2164_v27 = vor.u32 %v2163_v13, %v2159_v2  ;;  %v338_v28 = vrot.slane %v336_v17, 5  ;;  %v340_v29 = vshrl.u32 %v206_v0, 16  ;;  %v5387_v7 = vld [vmem:[%s6752_s30 + $0x3c] sm:$0xf]  ;;  %v6883_v12 = vld [vmem:[%s6752_s30 + $0x40] sm:$0xf] }
  0x30   : > { %v346_v31 = vshll.u32 %v238_v9, 16  ;;  %v2160_v32 = vsel %vm6777_vm2, %v2155_v21, %v2159_v2  ;;  %v333_v33 = vor.u32 %v332_v24, %v329_v22  ;;  %v2172_v35 = vshrl.u32 %v5384_v19, 16  ;;  %v209_v21 = vld [vmem:[%s6752_s30 + $0x3c] sm:$0xf] }
  0x31   : > { %5976 = vmatprep.mubr.msk.bf16.mxu1 %vm702_vm3, %v5193_v20  ;;  %v2175_v36 = vshll.u32 %v5384_v19, 16  ;;  %v2165_v37 = vrot.slane %v2164_v27, 4  ;;  %v342_v38 = vrot.slane %v340_v29, 4  ;;  %v2181_v41 = vshll.u32 %v6854_v26, 16  ;;  %6151 = vmatpush3.bf16.msra.mxu0 %v6567_v50  ;;  %v6888_v20 = vld [vmem:[%s6752_s30 + $0x44] sm:$0x1] }
  0x32   : > { %v348_v40 = vrot.slane %v346_v31, 5  ;;  %v334_v42 = vrot.slane %v333_v33, 4  ;;  %v2174_v43 = vrot.slane %v2172_v35, 4  ;;  %v2185_v45 = vshrl.u32 %v6854_v26, 16  ;;  %6184 = vmatprep.subr.bf16.mxu0 %v6859_v5 }
  0x33   : > { %v2177_v44 = vrot.slane %v2175_v36, 5  ;;  %v2170_v48 = vsel %vm6777_vm2, %v2165_v37, %v2169_v14  ;;  %v343_v49 = vor.u32 %v342_v38, %v338_v28  ;;  %v2183_v51 = vrot.slane %v2181_v41, 5 }
  0x34   : > { %v2191_v52 = vshll.u32 %v6865_v34, 16  ;;  %v5425_v54 = vcombine.low %v2160_v32, %v2170_v48  ;;  %v339_v50 = vsel %vm6777_vm2, %v334_v42, %v338_v28  ;;  %v2187_v57 = vrot.slane %v2185_v45, 4 }
  0x35   : > { %v2178_v55 = vor.u32 %v2177_v44, %v2174_v43  ;;  %v344_v62 = vrot.slane %v343_v49, 4  ;;  %v351_v0 = vshrl.u32 %v207_v46, 16  ;;  %v354_v1 = vshll.u32 %v207_v46, 16 }
  0x36   : > { %v2193_v63 = vrot.slane %v2191_v52, 5  ;;  %6120 = vmatprep.mubr.msk.bf16.mxu0 %vm702_vm3, %v5425_v54  ;;  %v2188_v2 = vor.u32 %v2187_v57, %v2183_v51  ;;  %v360_v3 = vshll.u32 %v208_v53, 16  ;;  %v364_v6 = vshrl.u32 %v208_v53, 16  ;;  %v240_v54 = vld [vmem:[%s6752_s30 + $0x44] sm:$0x1] }
  0x37   : > { %v2179_v4 = vrot.slane %v2178_v55, 4  ;;  %v349_v8 = vsel %vm6777_vm2, %v344_v62, %v348_v40  ;;  %v353_v9 = vrot.slane %v351_v0, 4  ;;  %v356_v10 = vrot.slane %v354_v1, 5  ;;  %v210_v40 = vld [vmem:[%s6752_s30 + $0x40] sm:$0xf] }
  0x38   : > { %v370_v11 = vshll.u32 %v239_v60, 16  ;;  %v5194_v13 = vcombine.low %v339_v50, %v349_v8  ;;  %v2189_v17 = vrot.slane %v2188_v2, 4  ;;  %v362_v19 = vrot.slane %v360_v3, 5  ;;  %v5390_v55 = vld [vmem:[%s6752_s30 + $0x48] sm:$0xf] }
  0x39   : > { %v2184_v14 = vsel %vm6777_vm2, %v2179_v4, %v2183_v51  ;;  %v357_v22 = vor.u32 %v356_v10, %v353_v9  ;;  %v366_v24 = vrot.slane %v364_v6, 4  ;;  %v2196_v28 = vshrl.u32 %v5387_v7, 16  ;;  %v6906_v0 = vld [vmem:[%s6752_s30 + $0x4c] sm:$0xf] }
  0x3a   : > { %v372_v27 = vrot.slane %v370_v11, 5  ;;  %5977 = vmatmul.mubr.msk.bf16.gmra.mrb[4].mxu1 %vm702_vm3, %v5194_v13  ;;  %v2194_v29 = vsel %vm6777_vm2, %v2189_v17, %v2193_v63  ;;  %v2199_v31 = vshll.u32 %v5387_v7, 16  ;;  %v2205_v32 = vshll.u32 %v6883_v12, 16  ;;  %v6914_v13 = vld [vmem:[%s6752_s30 + $0x50] sm:$0x1] }
  0x3b   : > { %v2209_v33 = vshrl.u32 %v6883_v12, 16  ;;  %v5426_v35 = vcombine.low %v2184_v14, %v2194_v29  ;;  %v358_v36 = vrot.slane %v357_v22, 4  ;;  %v367_v37 = vor.u32 %v366_v24, %v362_v19 }
  0x3c   : > { %v2198_v38 = vrot.slane %v2196_v28, 4  ;;  %v2201_v41 = vrot.slane %v2199_v31, 5  ;;  %v2207_v42 = vrot.slane %v2205_v32, 5  ;;  %v2215_v44 = vshll.u32 %v6888_v20, 16  ;;  %v6921_v28 = vld [vmem:[%s6752_s30 + $0x4c] sm:$0xf] }
  0x3d   : > { %v2211_v43 = vrot.slane %v2209_v33, 4  ;;  %6121 = vmatmul.mubr.msk.bf16.gmra.mrb[4].mxu0 %vm702_vm3, %v5426_v35  ;;  %v363_v45 = vsel %vm6777_vm2, %v358_v36, %v362_v19  ;;  %v368_v46 = vrot.slane %v367_v37, 4  ;;  %v375_v48 = vshrl.u32 %v209_v21, 16  ;;  %v6918_v19 = vld [vmem:[%s6752_s30 + $0x48] sm:$0xf] }
  0x3e   : > { %v378_v49 = vshll.u32 %v209_v21, 16  ;;  %v2202_v51 = vor.u32 %v2201_v41, %v2198_v38  ;;  %v2217_v53 = vrot.slane %v2215_v44, 5  ;;  %v384_v50 = vshll.u32 %v210_v40, 16  ;;  %v241_v38 = vld [vmem:[%s6752_s30 + $0x50] sm:$0x1] }
  0x3f   : > { %v2212_v52 = vor.u32 %v2211_v43, %v2207_v42  ;;  %v373_v57 = vsel %vm6777_vm2, %v368_v46, %v372_v27  ;;  %v377_v60 = vrot.slane %v375_v48, 4  ;;  %v388_v63 = vshrl.u32 %v210_v40, 16 }
  0x40   : > { %v380_v62 = vrot.slane %v378_v49, 5  ;;  %v5195_v1 = vcombine.low %v363_v45, %v373_v57  ;;  %v2203_v4 = vrot.slane %v2202_v51, 4  ;;  %v386_v3 = vrot.slane %v384_v50, 5  ;;  %v5393_v45 = vld [vmem:[%s6752_s30 + $0x54] sm:$0xf] }
  0x41   : > { %v2213_v2 = vrot.slane %v2212_v52, 4  ;;  %v390_v7 = vrot.slane %v388_v63, 4  ;;  %v394_v8 = vshll.u32 %v240_v54, 16  ;;  %v2220_v9 = vshrl.u32 %v5390_v55, 16 }
  0x42   : > { %v381_v6 = vor.u32 %v380_v62, %v377_v60  ;;  %5980 = vmatprep.mubr.msk.bf16.mxu1 %vm702_vm3, %v5195_v1  ;;  %v2208_v10 = vsel %vm6777_vm2, %v2203_v4, %v2207_v42  ;;  %v2223_v14 = vshll.u32 %v5390_v55, 16  ;;  %v2229_v17 = vshll.u32 %v6906_v0, 16  ;;  %v6937_v55 = vld [vmem:[%s6752_s30 + $0x58] sm:$0xf] }
  0x43   : > { %v2218_v11 = vsel %vm6777_vm2, %v2213_v2, %v2217_v53  ;;  %v391_v24 = vor.u32 %v390_v7, %v386_v3  ;;  %v396_v27 = vrot.slane %v394_v8, 5  ;;  %v2222_v29 = vrot.slane %v2220_v9, 4 }
  0x44   : > { %v5427_v21 = vcombine.low %v2208_v10, %v2218_v11  ;;  %v382_v22 = vrot.slane %v381_v6, 4  ;;  %v2225_v31 = vrot.slane %v2223_v14, 5  ;;  %v2231_v32 = vrot.slane %v2229_v17, 5  ;;  %v6947_v11 = vld [vmem:[%s6752_s30 + $0x54] sm:$0xf] }
  0x45   : > { %v2233_v33 = vshrl.u32 %v6906_v0, 16  ;;  %v392_v36 = vrot.slane %v391_v24, 4  ;;  %v2239_v37 = vshll.u32 %v6914_v13, 16  ;;  %v399_v40 = vshrl.u32 %v6918_v19, 16  ;;  %v6953_v24 = vld [vmem:[%s6752_s30 + $0x58] sm:$0xf] }
  0x46   : > { %6124 = vmatprep.mubr.msk.bf16.mxu0 %vm702_vm3, %v5427_v21  ;;  %v387_v35 = vsel %vm6777_vm2, %v382_v22, %v386_v3  ;;  %v2226_v41 = vor.u32 %v2225_v31, %v2222_v29  ;;  %v402_v43 = vshll.u32 %v6918_v19, 16  ;;  %v408_v44 = vshll.u32 %v6921_v28, 16  ;;  %v6943_v3 = vld [vmem:[%s6752_s30 + $0x5c] sm:$0x1] }
  0x47   : > { %v2235_v42 = vrot.slane %v2233_v33, 4  ;;  %v397_v46 = vsel %vm6777_vm2, %v392_v36, %v396_v27  ;;  %v2241_v48 = vrot.slane %v2239_v37, 5  ;;  %v401_v49 = vrot.slane %v399_v40, 4  ;;  %v242_v37 = vld [vmem:[%s6752_s30 + $0x5c] sm:$0x1] }
  0x48   : > { %v412_v51 = vshrl.u32 %v6921_v28, 16  ;;  %v5196_v52 = vcombine.low %v387_v35, %v397_v46  ;;  %v2227_v53 = vrot.slane %v2226_v41, 4  ;;  %v404_v50 = vrot.slane %v402_v43, 5 }
  0x49   : > { %v2236_v54 = vor.u32 %v2235_v42, %v2231_v32  ;;  %v410_v57 = vrot.slane %v408_v44, 5  ;;  %v418_v62 = vshll.u32 %v241_v38, 16  ;;  %v2244_v63 = vshrl.u32 %v5393_v45, 16  ;;  %v5396_v44 = vld [vmem:[%s6752_s30 + $0x60] sm:$0xf] }
  0x4a   : > { %v414_v60 = vrot.slane %v412_v51, 4  ;;  %5981 = vmatmul.mubr.msk.bf16.gmra.mrb[8].mxu1 %vm702_vm3, %v5196_v52  ;;  %v2232_v1 = vsel %vm6777_vm2, %v2227_v53, %v2231_v32  ;;  %v405_v2 = vor.u32 %v404_v50, %v401_v49  ;;  %v2247_v6 = vshll.u32 %v5393_v45, 16  ;;  %v6967_v51 = vld [vmem:[%s6752_s30 + $0x64] sm:$0xf] }
  0x4b   : > { %v2237_v4 = vrot.slane %v2236_v54, 4  ;;  %v420_v8 = vrot.slane %v418_v62, 5  ;;  %v2246_v9 = vrot.slane %v2244_v63, 4  ;;  %v2253_v10 = vshll.u32 %v6937_v55, 16 }
  0x4c   : > { %v415_v7 = vor.u32 %v414_v60, %v410_v57  ;;  %v406_v17 = vrot.slane %v405_v2, 4  ;;  %v2249_v21 = vrot.slane %v2247_v6, 5  ;;  %v2257_v22 = vshrl.u32 %v6937_v55, 16  ;;  %v6974_v60 = vld [vmem:[%s6752_s30 + $0x60] sm:$0xf] }
  0x4d   : > { %v2242_v14 = vsel %vm6777_vm2, %v2237_v4, %v2241_v48  ;;  %v2255_v31 = vrot.slane %v2253_v10, 5  ;;  %v2263_v32 = vshll.u32 %v6943_v3, 16  ;;  %v423_v38 = vshrl.u32 %v6947_v11, 16 }
  0x4e   : > { %v5428_v27 = vcombine.low %v2232_v1, %v2242_v14  ;;  %v416_v29 = vrot.slane %v415_v7, 4  ;;  %v411_v33 = vsel %vm6777_vm2, %v406_v17, %v410_v57  ;;  %v2250_v35 = vor.u32 %v2249_v21, %v2246_v9  ;;  %v6971_v57 = vld [vmem:[%s6752_s30 + $0x68] sm:$0x1]  ;;  %v6984_v21 = vld [vmem:[%s6752_s30 + $0x64] sm:$0xf] }
  0x4f   : > { %v2259_v36 = vrot.slane %v2257_v22, 4  ;;  %v2265_v41 = vrot.slane %v2263_v32, 5  ;;  %v426_v42 = vshll.u32 %v6947_v11, 16  ;;  %v432_v43 = vshll.u32 %v6953_v24, 16  ;;  %v243_v32 = vld [vmem:[%s6752_s30 + $0x68] sm:$0x1] }
  0x50   : > { %6125 = vmatmul.mubr.msk.bf16.gmra.mrb[8].mxu0 %vm702_vm3, %v5428_v27  ;;  %v421_v40 = vsel %vm6777_vm2, %v416_v29, %v420_v8  ;;  %v2251_v46 = vrot.slane %v2250_v35, 4  ;;  %v425_v49 = vrot.slane %v423_v38, 4  ;;  %v436_v54 = vshrl.u32 %v6953_v24, 16 }
  0x51   : > { %v5197_v45 = vcombine.low %v411_v33, %v421_v40  ;;  %v2260_v48 = vor.u32 %v2259_v36, %v2255_v31  ;;  %v428_v52 = vrot.slane %v426_v42, 5  ;;  %v434_v53 = vrot.slane %v432_v43, 5 }
  0x52   : > { %v442_v50 = vshll.u32 %v242_v37, 16  ;;  %v2256_v62 = vsel %vm6777_vm2, %v2251_v46, %v2255_v31  ;;  %v2268_v1 = vshrl.u32 %v5396_v44, 16  ;;  %v2271_v4 = vshll.u32 %v5396_v44, 16 }
  0x53   : > { %5984 = vmatprep.mubr.msk.bf16.mxu1 %vm702_vm3, %v5197_v45  ;;  %v2261_v63 = vrot.slane %v2260_v48, 4  ;;  %v429_v2 = vor.u32 %v428_v52, %v425_v49  ;;  %v438_v6 = vrot.slane %v436_v54, 4  ;;  %v2277_v8 = vshll.u32 %v6967_v51, 16  ;;  %v5457_v48 = vld [vmem:[%s6752_s30 + $0xc] sm:$0xe] }
  0x54   : > { %v444_v7 = vrot.slane %v442_v50, 5  ;;  %v2270_v10 = vrot.slane %v2268_v1, 4  ;;  %v2273_v14 = vrot.slane %v2271_v4, 5  ;;  %v2281_v17 = vshrl.u32 %v6967_v51, 16 }
  0x55   : > { %v2266_v9 = vsel %vm6777_vm2, %v2261_v63, %v2265_v41  ;;  %v430_v27 = vrot.slane %v429_v2, 4  ;;  %v439_v29 = vor.u32 %v438_v6, %v434_v53  ;;  %v2279_v31 = vrot.slane %v2277_v8, 5 }
  0x56   : > { %v5429_v22 = vcombine.low %v2256_v62, %v2266_v9  ;;  %v2274_v33 = vor.u32 %v2273_v14, %v2270_v10  ;;  %v2283_v35 = vrot.slane %v2281_v17, 4  ;;  %v2287_v36 = vshll.u32 %v6971_v57, 16  ;;  %v6999_v62 = vld [vmem:[%s6752_s30 + $0x6c] sm:$0xf]  ;;  %v7012_v10 = vld [vmem:[%s6752_s30 + $0x70] sm:$0xf] }
  0x57   : > { %v447_v37 = vshrl.u32 %v6974_v60, 16  ;;  %v435_v38 = vsel %vm6777_vm2, %v430_v27, %v434_v53  ;;  %v440_v40 = vrot.slane %v439_v29, 4  ;;  %v450_v41 = vshll.u32 %v6974_v60, 16 }
  0x58   : > { %6128 = vmatprep.mubr.msk.bf16.mxu0 %vm702_vm3, %v5429_v22  ;;  %v456_v42 = vshll.u32 %v6984_v21, 16  ;;  %v2275_v43 = vrot.slane %v2274_v33, 4  ;;  %v2284_v44 = vor.u32 %v2283_v35, %v2279_v31  ;;  %v2289_v45 = vrot.slane %v2287_v36, 5  ;;  %v244_v35 = vld [vmem:[%s6752_s30 + $0x74] sm:$0x1] }
  0x59   : > { %v449_v46 = vrot.slane %v447_v37, 4  ;;  %v445_v49 = vsel %vm6777_vm2, %v440_v40, %v444_v7  ;;  %v452_v52 = vrot.slane %v450_v41, 5  ;;  %v460_v50 = vshrl.u32 %v6984_v21, 16  ;;  %v5458_v36 = vld [vmem:[%s6752_s30 + $0x18] sm:$0xe] }
  0x5a   : > { %v458_v54 = vrot.slane %v456_v42, 5  ;;  %v5198_v53 = vcombine.low %v435_v38, %v445_v49  ;;  %v2280_v63 = vsel %vm6777_vm2, %v2275_v43, %v2279_v31  ;;  %v2285_v1 = vrot.slane %v2284_v44, 4  ;;  %v7031_v42 = vld [vmem:[%s6752_s30 + $0x78] sm:$0xf] }
  0x5b   : > { %v466_v4 = vshll.u32 %v243_v32, 16  ;;  %v453_v6 = vor.u32 %v452_v52, %v449_v46  ;;  %v462_v7 = vrot.slane %v460_v50, 4  ;;  %v5473_v8 = vrot.slane %v5457_v48, 9  ;;  %v245_v50 = vld [vmem:[%s6752_s30 + $0x80] sm:$0x1] }
  0x5c   : > { %v2856_v9 = vrot.slane %v2854_v58, 4  ;;  %5985 = vmatmul.mubr.msk.bf16.gmra.mrb[12].mxu1 %vm702_vm3, %v5198_v53  ;;  %v2290_v14 = vsel %vm6777_vm2, %v2285_v1, %v2289_v45  ;;  %v471_v22 = vshrl.u32 %v6999_v62, 16  ;;  %v474_v27 = vshll.u32 %v6999_v62, 16 }
  0x5d   : > { %v468_v17 = vrot.slane %v466_v4, 5  ;;  %v5430_v29 = vcombine.low %v2280_v63, %v2290_v14  ;;  %v454_v31 = vrot.slane %v453_v6, 4  ;;  %v463_v32 = vor.u32 %v462_v7, %v458_v54  ;;  %v5459_v7 = vld [vmem:[%s6752_s30 + $0x24] sm:$0xe] }
  0x5e   : > { %v2855_v33 = vsel %vm7005_vm6, %v5473_v8, %v2854_v58  ;;  %v2858_v37 = vsel %vm7005_vm6, %v2856_v9, %v2857_v59  ;;  %v473_v38 = vrot.slane %v471_v22, 4  ;;  %v476_v40 = vrot.slane %v474_v27, 5  ;;  %v7062_v22 = vld [vmem:[%s6752_s30 + $0x84] sm:$0xf] }
  0x5f   : > { %v480_v41 = vshll.u32 %v7012_v10, 16  ;;  %6129 = vmatmul.mubr.msk.bf16.gmra.mrb[12].mxu0 %vm702_vm3, %v5430_v29  ;;  %v459_v15 = vsel %vm6777_vm2, %v454_v31, %v458_v54  ;;  %v464_v58 = vrot.slane %v463_v32, 4  ;;  %v5489_v43 = vcombine.low %v2855_v33, %v2858_v37  ;;  %v7046_v54 = vld [vmem:[%s6752_s30 + $0x7c] sm:$0xf]  ;;  %v7069_v33 = vld [vmem:[%s6752_s30 + $0x88] sm:$0xf] }
  0x60   : > { %v484_v16 = vshrl.u32 %v7012_v10, 16  ;;  %v477_v44 = vor.u32 %v476_v40, %v473_v38  ;;  %v490_v45 = vshll.u32 %v244_v35, 16  ;;  %v5474_v46 = vrot.slane %v5458_v36, 9  ;;  %v246_v40 = vld [vmem:[%s6752_s30 + $0x8c] sm:$0x1] }
  0x61   : > { %v482_v59 = vrot.slane %v480_v41, 5  ;;  %v469_v48 = vsel %vm6777_vm2, %v464_v58, %v468_v17  ;;  %6152 = vmatprep.mubr.msk.bf16.mxu0 %vm702_vm3, %v5489_v43  ;;  %v2865_v52 = vsel %vm7005_vm6, %v6813_v25, %v2864_v23  ;;  %v495_v53 = vshrl.u32 %v7031_v42, 16 }
  0x62   : > { %v486_v49 = vrot.slane %v484_v16, 4  ;;  %v5199_v63 = vcombine.low %v459_v15, %v469_v48  ;;  %v478_v1 = vrot.slane %v477_v44, 4  ;;  %v492_v4 = vrot.slane %v490_v45, 5 }
  0x63   : > { %v2862_v6 = vsel %vm7005_vm6, %v5474_v46, %v2861_v18  ;;  %v497_v9 = vrot.slane %v495_v53, 4  ;;  %v498_v23 = vshll.u32 %v7031_v42, 16  ;;  %v504_v14 = vshll.u32 %v7046_v54, 16  ;;  %v6572_v18 = vld [vmem:[%s8621_s1 + $0x68] sm:$0xff]  }
  0x64   : > { %v487_v61 = vor.u32 %v486_v49, %v482_v59  ;;  %v5490_v8 = vcombine.low %v2862_v6, %v2865_v52  ;;  %5988 = vmatprep.mubr.msk.bf16.mxu1 %vm702_vm3, %v5199_v63  ;;  %v483_v25 = vsel %vm6777_vm2, %v478_v1, %v482_v59  ;;  %v508_v56 = vshrl.u32 %v7046_v54, 16  ;;  %v7087_v52 = vld [vmem:[%s6752_s30 + $0x90] sm:$0xf] }
  0x65   : > { %v514_v17 = vshll.u32 %v245_v50, 16  ;;  %v500_v29 = vrot.slane %v498_v23, 5  ;;  %v5475_v31 = vrot.slane %v5459_v7, 9  ;;  %v2868_v32 = vrot.slane %v6820_v39, 5  ;;  %v5460_v39 = vld [vmem:[%s6752_s30 + $0x30] sm:$0xe] }
  0x66   : > { %v488_v27 = vrot.slane %v487_v61, 4  ;;  %v506_v35 = vrot.slane %v504_v14, 5  ;;  %v510_v36 = vrot.slane %v508_v56, 4  ;;  %v2871_v38 = vrot.slane %v6829_v47, 5 }
  0x67   : > { %v516_v37 = vrot.slane %v514_v17, 5  ;;  %6153 = vmatmul.mubr.msk.bf16.vlgmr.msra.gmra.mrb[0].mxu0 %vm702_vm3, %v5490_v8  ;;  %v501_v15 = vor.u32 %v500_v29, %v497_v9  ;;  %v2869_v58 = vsel %vm7005_vm6, %v5475_v31, %v2868_v32  ;;  %v2870_v43 = vrot.slane %v2868_v32, 4  ;;  %v247_v9 = vld [vmem:[%s6752_s30 + $0x98] sm:$0x1]  ;;  %v5461_v32 = vld [vmem:[%s6752_s30 + $0x3c] sm:$0xe] }
  0x68   : > { %v493_v41 = vsel %vm6777_vm2, %v488_v27, %v492_v4  ;;  %6185 = vmatpush3.bf16.msra.mxu0 %v6859_v5  ;;  %v511_v44 = vor.u32 %v510_v36, %v506_v35  ;;  %v519_v47 = vshrl.u32 %v7062_v22, 16  ;;  %v522_v59 = vshll.u32 %v7062_v22, 16  ;;  %v7092_v5 = vld [vmem:[%s8621_s1 + $0x70] sm:$0xff]  }
  0x69   : > { %v5200_v16 = vcombine.low %v483_v25, %v493_v41  ;;  %v502_v45 = vrot.slane %v501_v15, 4  ;;  %v2872_v46 = vsel %vm7005_vm6, %v2870_v43, %v2871_v38  ;;  %v528_v48 = vshll.u32 %v7069_v33, 16  ;;  %6186 = vmatprep.subr.bf16.mxu0 %v6572_v18  ;;  %v7096_v4 = vld [vmem:[%s6752_s30 + $0x94] sm:$0xf]  ;;  %v7119_v15 = vld [vmem:[%s6752_s30 + $0xa0] sm:$0xf] }
  0x6a   : > { %v532_v49 = vshrl.u32 %v7069_v33, 16  ;;  %v512_v50 = vrot.slane %v511_v44, 4  ;;  %v5491_v53 = vcombine.low %v2869_v58, %v2872_v46  ;;  %v521_v63 = vrot.slane %v519_v47, 4 }
  0x6b   : > { %5989 = vmatmul.mubr.msk.bf16.gmra.mrb[16].mxu1 %vm702_vm3, %v5200_v16  ;;  %v524_v1 = vrot.slane %v522_v59, 5  ;;  %v507_v6 = vsel %vm6777_vm2, %v502_v45, %v506_v35  ;;  %v530_v7 = vrot.slane %v528_v48, 5  ;;  %v538_v8 = vshll.u32 %v246_v40, 16  ;;  %v7112_v40 = vld [vmem:[%s6752_s30 + $0x9c] sm:$0xf] }
  0x6c   : > { %v534_v61 = vrot.slane %v532_v49, 4  ;;  %v517_v23 = vsel %vm6777_vm2, %v512_v50, %v516_v37  ;;  %6156 = vmatprep.mubr.msk.bf16.mxu0 %vm702_vm3, %v5491_v53  ;;  %v5476_v14 = vrot.slane %v5460_v39, 9  ;;  %v2875_v56 = vrot.slane %v6854_v26, 5  ;;  %6187 = vmatpush3.bf16.msra.mxu0 %v6572_v18  ;;  %v248_v53 = vld [vmem:[%s6752_s30 + $0xa4] sm:$0x1] }
  0x6d   : > { %v525_v25 = vor.u32 %v524_v1, %v521_v63  ;;  %v5201_v17 = vcombine.low %v507_v6, %v517_v23  ;;  %v540_v29 = vrot.slane %v538_v8, 5  ;;  %v2878_v31 = vrot.slane %v6865_v34, 5  ;;  %6220 = vmatprep.subr.bf16.mxu0 %v7092_v5  ;;  %v5462_v63 = vld [vmem:[%s6752_s30 + $0x48] sm:$0xe] }
  0x6e   : > { %v535_v27 = vor.u32 %v534_v61, %v530_v7  ;;  %v2876_v36 = vsel %vm7005_vm6, %v5476_v14, %v2875_v56  ;;  %v2877_v37 = vrot.slane %v2875_v56, 4  ;;  %v543_v38 = vshrl.u32 %v7087_v52, 16 }
  0x6f   : > { %v526_v35 = vrot.slane %v525_v25, 4  ;;  %5992 = vmatprep.mubr.msk.bf16.mxu1 %vm702_vm3, %v5201_v17  ;;  %v546_v18 = vshll.u32 %v7087_v52, 16  ;;  %v552_v34 = vshll.u32 %v7096_v4, 16  ;;  %v556_v41 = vshrl.u32 %v7096_v4, 16 }
  0x70   : > { %v536_v26 = vrot.slane %v535_v27, 4  ;;  %v2879_v43 = vsel %vm7005_vm6, %v2877_v37, %v2878_v31  ;;  %v545_v39 = vrot.slane %v543_v38, 4  ;;  %v562_v16 = vshll.u32 %v247_v9, 16  ;;  %v7140_v27 = vld [vmem:[%s6752_s30 + $0xa8] sm:$0xf] }
  0x71   : > { %v531_v58 = vsel %vm6777_vm2, %v526_v35, %v530_v7  ;;  %v5492_v47 = vcombine.low %v2876_v36, %v2879_v43  ;;  %v548_v59 = vrot.slane %v546_v18, 5  ;;  %v554_v45 = vrot.slane %v552_v34, 5  ;;  %v7143_v35 = vld [vmem:[%s6752_s30 + $0xac] sm:$0xf] }
  0x72   : > { %v541_v44 = vsel %vm6777_vm2, %v536_v26, %v540_v29  ;;  %v558_v48 = vrot.slane %v556_v41, 4  ;;  %v564_v49 = vrot.slane %v562_v16, 5  ;;  %v5477_v50 = vrot.slane %v5461_v32, 9 }
  0x73   : > { %v5202_v46 = vcombine.low %v531_v58, %v541_v44  ;;  %6157 = vmatmul.mubr.msk.bf16.gmra.mrb[4].mxu0 %vm702_vm3, %v5492_v47  ;;  %v549_v1 = vor.u32 %v548_v59, %v545_v39  ;;  %v2882_v6 = vrot.slane %v6883_v12, 5  ;;  %v2885_v7 = vrot.slane %v6888_v20, 5  ;;  %v249_v47 = vld [vmem:[%s6752_s30 + $0xb0] sm:$0x1]  ;;  %v5463_v59 = vld [vmem:[%s6752_s30 + $0x54] sm:$0xe] }
  0x74   : > { %v567_v61 = vshrl.u32 %v7112_v40, 16  ;;  %v559_v8 = vor.u32 %v558_v48, %v554_v45  ;;  %v570_v9 = vshll.u32 %v7112_v40, 16  ;;  %v576_v23 = vshll.u32 %v7119_v15, 16 }
  0x75   : > { %5993 = vmatmul.mubr.msk.bf16.gmra.mrb[20].mxu1 %vm702_vm3, %v5202_v46  ;;  %v580_v25 = vshrl.u32 %v7119_v15, 16  ;;  %v550_v14 = vrot.slane %v549_v1, 4  ;;  %v2883_v56 = vsel %vm7005_vm6, %v5477_v50, %v2882_v6  ;;  %v2884_v17 = vrot.slane %v2882_v6, 4 }
  0x76   : > { %v569_v12 = vrot.slane %v567_v61, 4  ;;  %v560_v20 = vrot.slane %v559_v8, 4  ;;  %v572_v29 = vrot.slane %v570_v9, 5  ;;  %v578_v31 = vrot.slane %v576_v23, 5  ;;  %v7168_v61 = vld [vmem:[%s6752_s30 + $0xb4] sm:$0xf] }
  0x77   : > { %v582_v32 = vrot.slane %v580_v25, 4  ;;  %v555_v36 = vsel %vm6777_vm2, %v550_v14, %v554_v45  ;;  %v2886_v37 = vsel %vm7005_vm6, %v2884_v17, %v2885_v7  ;;  %v586_v38 = vshll.u32 %v248_v53, 16  ;;  %v7173_v14 = vld [vmem:[%s6752_s30 + $0xb8] sm:$0xf] }
  0x78   : > { %v5478_v26 = vrot.slane %v5462_v63, 9  ;;  %v565_v18 = vsel %vm6777_vm2, %v560_v20, %v564_v49  ;;  %v5493_v34 = vcombine.low %v2883_v56, %v2886_v37  ;;  %v573_v41 = vor.u32 %v572_v29, %v569_v12  ;;  %v250_v29 = vld [vmem:[%s6752_s30 + $0xbc] sm:$0x1] }
  0x79   : > { %v583_v58 = vor.u32 %v582_v32, %v578_v31  ;;  %v5203_v43 = vcombine.low %v555_v36, %v565_v18  ;;  %v588_v39 = vrot.slane %v586_v38, 5  ;;  %v2889_v16 = vrot.slane %v6906_v0, 5  ;;  %v5464_v38 = vld [vmem:[%s6752_s30 + $0x60] sm:$0xe] }
  0x7a   : > { %v2892_v44 = vrot.slane %v6914_v13, 5  ;;  %6160 = vmatprep.mubr.msk.bf16.mxu0 %vm702_vm3, %v5493_v34  ;;  %v574_v45 = vrot.slane %v573_v41, 4  ;;  %v591_v48 = vshrl.u32 %v7140_v27, 16  ;;  %v594_v49 = vshll.u32 %v7140_v27, 16 }
  0x7b   : > { %v584_v46 = vrot.slane %v583_v58, 4  ;;  %5996 = vmatprep.mubr.msk.bf16.mxu1 %vm702_vm3, %v5203_v43  ;;  %v2890_v50 = vsel %vm7005_vm6, %v5478_v26, %v2889_v16  ;;  %v2891_v0 = vrot.slane %v2889_v16, 4  ;;  %v600_v13 = vshll.u32 %v7143_v35, 16  ;;  %v5400_v16 = vld [vmem:[%s6752_s30 + $0x70] sm:$0xf] }
  0x7c   : > { %v604_v53 = vshrl.u32 %v7143_v35, 16  ;;  %v579_v63 = vsel %vm6777_vm2, %v574_v45, %v578_v31  ;;  %v593_v6 = vrot.slane %v591_v48, 4  ;;  %v596_v7 = vrot.slane %v594_v49, 5 }
  0x7d   : > { %v589_v1 = vsel %vm6777_vm2, %v584_v46, %v588_v39  ;;  %v2893_v9 = vsel %vm7005_vm6, %v2891_v0, %v2892_v44  ;;  %v602_v23 = vrot.slane %v600_v13, 5  ;;  %v610_v12 = vshll.u32 %v249_v47, 16  ;;  %v5465_v46 = vld [vmem:[%s6752_s30 + $0x6c] sm:$0xe] }
  0x7e   : > { %v5204_v8 = vcombine.low %v579_v63, %v589_v1  ;;  %v606_v25 = vrot.slane %v604_v53, 4  ;;  %v5494_v56 = vcombine.low %v2890_v50, %v2893_v9  ;;  %v597_v17 = vor.u32 %v596_v7, %v593_v6 }
  0x7f   : > { %v5479_v20 = vrot.slane %v5463_v59, 9  ;;  %v2896_v32 = vrot.slane %v6937_v55, 5  ;;  %v2899_v36 = vrot.slane %v6943_v3, 5  ;;  %v615_v37 = vshrl.u32 %v7168_v61, 16  ;;  %v5401_v3 = vld [vmem:[%s6752_s30 + $0x74] sm:$0x1] }
  0x80   : > { %5997 = vmatmul.mubr.msk.bf16.gmra.mrb[24].mxu1 %vm702_vm3, %v5204_v8  ;;  %v607_v31 = vor.u32 %v606_v25, %v602_v23  ;;  %6161 = vmatmul.mubr.msk.bf16.gmra.mrb[8].mxu0 %vm702_vm3, %v5494_v56  ;;  %v598_v26 = vrot.slane %v597_v17, 4  ;;  %v612_v18 = vrot.slane %v610_v12, 5  ;;  %v618_v34 = vshll.u32 %v7168_v61, 16  ;;  %v5466_v12 = vld [vmem:[%s6752_s30 + $0x78] sm:$0xe] }
  0x81   : > { %v624_v41 = vshll.u32 %v7173_v14, 16  ;;  %v2897_v43 = vsel %vm7005_vm6, %v5479_v20, %v2896_v32  ;;  %v2898_v39 = vrot.slane %v2896_v32, 4  ;;  %v617_v55 = vrot.slane %v615_v37, 4 }
  0x82   : > { %v608_v58 = vrot.slane %v607_v31, 4  ;;  %v603_v44 = vsel %vm6777_vm2, %v598_v26, %v602_v23  ;;  %v620_v47 = vrot.slane %v618_v34, 5  ;;  %v628_v45 = vshrl.u32 %v7173_v14, 16  ;;  %v7214_v26 = vld [vmem:[%s6752_s30 + $0x4] sm:$0xf] }
  0x83   : > { %v626_v59 = vrot.slane %v624_v41, 5  ;;  %v2900_v49 = vsel %vm7005_vm6, %v2898_v39, %v2899_v36  ;;  %v634_v50 = vshll.u32 %v250_v29, 16  ;;  %v5480_v0 = vrot.slane %v5464_v38, 9  ;;  %v7208_v36 = vld [vmem:[%s6752_s30 + $0x7c] sm:$0xf] }
  0x84   : > { %v613_v48 = vsel %vm6777_vm2, %v608_v58, %v612_v18  ;;  %v5495_v53 = vcombine.low %v2897_v43, %v2900_v49  ;;  %v621_v63 = vor.u32 %v620_v47, %v617_v55  ;;  %v630_v1 = vrot.slane %v628_v45, 4  ;;  %v6627_v38 = vld [vmem:[%s6752_s30] sm:$0xf]  ;;  %v5467_v41 = vld [vmem:[%s6752_s30 + $0x84] sm:$0xe] }
  0x85   : > { %v5205_v13 = vcombine.low %v603_v44, %v613_v48  ;;  %v636_v6 = vrot.slane %v634_v50, 5  ;;  %v2903_v7 = vrot.slane %v6967_v51, 5  ;;  %v2906_v8 = vrot.slane %v6971_v57, 5  ;;  %v7218_v34 = vld [vmem:[%s6752_s30 + $0x80] sm:$0x1] }
  0x86   : > { %v5481_v9 = vrot.slane %v5465_v46, 9  ;;  %6164 = vmatprep.mubr.msk.bf16.mxu0 %vm702_vm3, %v5495_v53  ;;  %v622_v23 = vrot.slane %v621_v63, 4  ;;  %v631_v25 = vor.u32 %v630_v1, %v626_v59  ;;  %v2910_v56 = vrot.slane %v5400_v16, 5  ;;  %v5406_v16 = vld [vmem:[%s6752_s30 + $0x88] sm:$0xf] }
  0x87   : > { %6000 = vmatprep.mubr.msk.bf16.mxu1 %vm702_vm3, %v5205_v13  ;;  %v2913_v17 = vrot.slane %v5401_v3, 5  ;;  %v2904_v51 = vsel %vm7005_vm6, %v5480_v0, %v2903_v7  ;;  %v2905_v20 = vrot.slane %v2903_v7, 4  ;;  %v5225_v18 = vcombine.low %v6627_v38, %v7214_v26  ;;  %v5407_v3 = vld [vmem:[%s6752_s30 + $0x8c] sm:$0x1]  ;;  %v5410_v0 = vld [vmem:[%s6752_s30 + $0x98] sm:$0x1] }
  0x88   : > { %v627_v57 = vsel %vm6777_vm2, %v622_v23, %v626_v59  ;;  %v632_v29 = vrot.slane %v631_v25, 4  ;;  %v2911_v31 = vsel %vm7005_vm6, %v5481_v9, %v2910_v56  ;;  %v2912_v32 = vrot.slane %v2910_v56, 4  ;;  %v5409_v59 = vld [vmem:[%s6752_s30 + $0x94] sm:$0xf]  ;;  %v5468_v13 = vld [vmem:[%s6752_s30 + $0x90] sm:$0xe] }
  0x89   : > { %v2907_v37 = vsel %vm7005_vm6, %v2905_v20, %v2906_v8  ;;  %v5482_v55 = vrot.slane %v5466_v12, 9  ;;  %v2917_v45 = vrot.slane %v7208_v36, 5  ;;  %v2920_v46 = vrot.slane %v7218_v34, 5  ;;  %v5413_v9 = vld [vmem:[%s6752_s30 + $0xa4] sm:$0x1] }
  0x8a   : > { %v637_v58 = vsel %vm6777_vm2, %v632_v29, %v636_v6  ;;  %v5496_v43 = vcombine.low %v2904_v51, %v2907_v37  ;;  %v2914_v39 = vsel %vm7005_vm6, %v2912_v32, %v2913_v17  ;;  %v5483_v48 = vrot.slane %v5467_v41, 9  ;;  %v5412_v6 = vld [vmem:[%s6752_s30 + $0xa0] sm:$0xf]  ;;  %v5469_v23 = vld [vmem:[%s6752_s30 + $0x9c] sm:$0xe] }
  0x8b   : > { %v5206_v44 = vcombine.low %v627_v57, %v637_v58  ;;  %v5497_v47 = vcombine.low %v2911_v31, %v2914_v39  ;;  %v2924_v49 = vrot.slane %v5406_v16, 5  ;;  %v2927_v50 = vrot.slane %v5407_v3, 5  ;;  %v6629_v25 = vld [vmem:[%s6752_s30 + $0xc] sm:$0xf]  ;;  %v7245_v56 = vld [vmem:[%s6752_s30 + $0x10] sm:$0xf] }
  0x8c   : > { %6165 = vmatmul.mubr.msk.bf16.gmra.mrb[12].mxu0 %vm702_vm3, %v5496_v43  ;;  %v2918_v53 = vsel %vm7005_vm6, %v5482_v55, %v2917_v45  ;;  %v2919_v63 = vrot.slane %v2917_v45, 4  ;;  %v2931_v1 = vrot.slane %v5409_v59, 5  ;;  %v5226_v17 = vcombine.low %v6629_v25, %v7245_v56  ;;  %v6631_v37 = vld [vmem:[%s6752_s30 + $0x18] sm:$0xf]  ;;  %v7254_v38 = vld [vmem:[%s6752_s30 + $0x1c] sm:$0xf] }
  0x8d   : > { %6001 = vmatmul.mubr.msk.bf16.gmra.mrb[28].mxu1 %vm702_vm3, %v5206_v44  ;;  %6168 = vmatprep.mubr.msk.bf16.mxu0 %vm702_vm3, %v5497_v47  ;;  %v2925_v7 = vsel %vm7005_vm6, %v5483_v48, %v2924_v49  ;;  %v2926_v8 = vrot.slane %v2924_v49, 4  ;;  %v5484_v51 = vrot.slane %v5468_v13, 9  ;;  %v2934_v20 = vrot.slane %v5410_v0, 5  ;;  %v5415_v39 = vld [vmem:[%s6752_s30 + $0xac] sm:$0xf]  ;;  %v6633_v45 = vld [vmem:[%s8621_s1 + $0x20] sm:$0xff]  }
  0x8e   : > { %6008 = vmatprep.mubr.msk.bf16.mxu1 %vm702_vm3, %v5225_v18  ;;  %v2921_v12 = vsel %vm7005_vm6, %v2919_v63, %v2920_v46  ;;  %v2933_v31 = vrot.slane %v2931_v1, 4  ;;  %v2938_v32 = vrot.slane %v5412_v6, 5  ;;  %v5227_v18 = vcombine.low %v6631_v37, %v7254_v38  ;;  %v5418_v16 = vld [vmem:[%s6752_s30 + $0xb8] sm:$0xf]  ;;  %v6581_v3 = vld [vmem:[%s8621_s1 + $0x28] sm:$0xff]   ;;  %v7284_v63 = vld [vmem:[%s8621_s1 + $0x30] sm:$0xff]  }
  0x8f   : > { %v5498_v57 = vcombine.low %v2918_v53, %v2921_v12  ;;  %v2928_v29 = vsel %vm7005_vm6, %v2926_v8, %v2927_v50  ;;  %v5485_v58 = vrot.slane %v5469_v23, 9  ;;  %v2941_v43 = vrot.slane %v5413_v9, 5  ;;  %v5416_v49 = vld [vmem:[%s6752_s30 + $0xb0] sm:$0x1]  ;;  %v5470_v50 = vld [vmem:[%s6752_s30 + $0xa8] sm:$0xe] }
  0x90   : > { %v5499_v41 = vcombine.low %v2925_v7, %v2928_v29  ;;  %v2940_v55 = vrot.slane %v2938_v32, 4  ;;  %v2932_v44 = vsel %vm7005_vm6, %v5484_v51, %v2931_v1  ;;  %v2935_v47 = vsel %vm7005_vm6, %v2933_v31, %v2934_v20  ;;  %v5419_v13 = vld [vmem:[%s6752_s30 + $0xbc] sm:$0x1]  ;;  %v5471_v53 = vld [vmem:[%s6752_s30 + $0xb4] sm:$0xe] }
  0x91   : > { %v2945_v59 = vrot.slane %v5415_v39, 5  ;;  %v2939_v46 = vsel %vm7005_vm6, %v5485_v58, %v2938_v32  ;;  %v2952_v0 = vrot.slane %v5418_v16, 5  ;;  %v6634_v1 = vld [vmem:[%s6752_s30 + $0x24] sm:$0xf]  ;;  %v7288_v6 = vld [vmem:[%s6752_s30 + $0x28] sm:$0xf]  ;;  %v5500_v8 = vcombine.low %v2932_v44, %v2935_v47 }
  0x92   : > { %v2942_v48 = vsel %vm7005_vm6, %v2940_v55, %v2941_v43  ;;  %v5228_v7 = vcombine.low %v6634_v1, %v7288_v6  ;;  %v5486_v23 = vrot.slane %v5470_v50, 9  ;;  %v6636_v12 = vld [vmem:[%s6752_s30 + $0x30] sm:$0xf]  ;;  %v7293_v51 = vld [vmem:[%s6752_s30 + $0x34] sm:$0xf]  ;;  %v2955_v31 = vrot.slane %v5419_v13, 5 }
  0x93   : > { %v5501_v9 = vcombine.low %v2939_v46, %v2942_v48  ;;  %v2947_v25 = vrot.slane %v2945_v59, 4  ;;  %v5229_v20 = vcombine.low %v6636_v12, %v7293_v51  ;;  %v2954_v29 = vrot.slane %v2952_v0, 4  ;;  %v5421_v32 = vld [vmem:[%s6752_s30 + $0xc4] sm:$0xf]  ;;  %v5422_v55 = vld [vmem:[%s6752_s30 + $0xc8] sm:$0x1] }
  0x94   : > { %6169 = vmatmul.mubr.msk.bf16.gmra.mrb[16].mxu0 %vm702_vm3, %v5498_v57  ;;  %v5487_v57 = vrot.slane %v5471_v53, 9  ;;  %v2946_v37 = vsel %vm7005_vm6, %v5486_v23, %v2945_v59  ;;  %v2959_v58 = vrot.slane %v5421_v32, 5  ;;  %v6638_v44 = vld [vmem:[%s6752_s30 + $0x3c] sm:$0xf]  ;;  %v7314_v47 = vld [vmem:[%s6752_s30 + $0x40] sm:$0xf]  ;;  %v5232_v53 = vcombine.low %v6947_v11, %v6953_v24 }
  0x95   : > { %6009 = vmatmul.mubr.msk.bf16.vlgmr.msra.gmra.mrb[0].mxu1 %vm702_vm3, %v5226_v17  ;;  %6172 = vmatprep.mubr.msk.bf16.mxu0 %vm702_vm3, %v5499_v41  ;;  %v2948_v17 = vrot.slane %v5416_v49, 5  ;;  %v5472_v41 = vld [vmem:[%s6752_s30 + $0xc0] sm:$0xe]  ;;  %v2956_v39 = vsel %vm7005_vm6, %v2954_v29, %v2955_v31  ;;  %v5230_v59 = vcombine.low %v6638_v44, %v7314_v47  ;;  %v2962_v48 = vrot.slane %v5422_v55, 5  ;;  %v6582_v1 = vld [vmem:[%s6752_s30 + $0x18] sm:$0xff]  }
  0x96   : > { %6041 = vmatpush3.bf16.msra.mxu1 %v6633_v45  ;;  %6012 = vmatprep.mubr.msk.bf16.mxu1 %vm702_vm3, %v5227_v18  ;;  %v2953_v43 = vsel %vm7005_vm6, %v5487_v57, %v2952_v0  ;;  %v2961_v46 = vrot.slane %v2959_v58, 4  ;;  %v5231_v49 = vcombine.low %v6918_v19, %v6921_v28  ;;  %v2325_v13 = vshll.u32 %v7208_v36, 16  ;;  %v1213_v11 = vld [vmem:[%s6752_s30] sm:$0xe]  ;;  %v1215_v24 = vld [vmem:[%s6752_s30 + $0x18] sm:$0xe] }
  0x97   : > { %6042 = vmatprep.subr.bf16.mxu1 %v6581_v3  ;;  %v2949_v18 = vsel %vm7005_vm6, %v2947_v25, %v2948_v17  ;;  %v5503_v45 = vcombine.low %v2953_v43, %v2956_v39  ;;  %v2329_v19 = vshrl.u32 %v7208_v36, 16  ;;  %v1214_v25 = vld [vmem:[%s6752_s30 + $0xc] sm:$0xe]  ;;  %v6640_v17 = vld [vmem:[%s6752_s30 + $0x14] sm:$0x1]  ;;  %v2335_v31 = vshll.u32 %v7218_v34, 16 }
  0x98   : > { %v5502_v16 = vcombine.low %v2946_v37, %v2949_v18  ;;  %v2963_v0 = vsel %vm7005_vm6, %v2961_v46, %v2962_v48  ;;  %v1276_v12 = vrot.slane %v6640_v17, 5  ;;  %v1287_v32 = vrot.slane %v7288_v6, 5  ;;  %v6585_v18 = vld [vmem:[%s6752_s30 + $0x24] sm:$0xff]   ;;  %v6587_v43 = vld [vmem:[%s6752_s30 + $0x30] sm:$0xff]   ;;  %v6642_v55 = vld [vmem:[%s6752_s30 + $0x20] sm:$0x1] }
  0x99   : > { %v2331_v23 = vrot.slane %v2329_v19, 4  ;;  %v5234_v37 = vcombine.low %v6999_v62, %v7012_v10  ;;  %v5237_v34 = vcombine.low %v7087_v52, %v7096_v4  ;;  %v5259_v39 = vrot.slane %v1213_v11, 9  ;;  %v1217_v62 = vld [vmem:[%s6752_s30 + $0x30] sm:$0xe]  ;;  %v6600_v44 = vld [vmem:[%s8621_s1 + $0x78] sm:$0xff]  }
  0x9a   : > { %6043 = vmatpush3.bf16.msra.mxu1 %v6581_v3  ;;  %v5488_v3 = vrot.slane %v5472_v41, 9  ;;  %v1216_v41 = vld [vmem:[%s6752_s30 + $0x24] sm:$0xe]  ;;  %v5261_v6 = vrot.slane %v1215_v24, 9  ;;  %v6643_v46 = vld [vmem:[%s6752_s30 + $0x2c] sm:$0x1] }
  0x9b   : > { %6076 = vmatprep.subr.bf16.mxu1 %v7284_v63  ;;  %v1290_v48 = vrot.slane %v6643_v46, 5  ;;  %v5589_v24 = vld [vmem:[%s6752_s30 + $0x18] sm:$0xf] }
  0x9c   : > { %6173 = vmatmul.mubr.msk.bf16.gmra.mrb[20].mxu0 %vm702_vm3, %v5500_v8  ;;  %v2960_v50 = vsel %vm7005_vm6, %v5488_v3, %v2959_v58  ;;  %v5233_v8 = vcombine.low %v6974_v60, %v6984_v21  ;;  %v1266_v60 = vrot.slane %v7214_v26, 5  ;;  %v5260_v21 = vrot.slane %v1214_v25, 9  ;;  %v5597_v3 = vld [vmem:[%s6752_s30 + $0x38] sm:$0x1] }
  0x9d   : > { %6013 = vmatmul.mubr.msk.bf16.gmra.mrb[4].mxu1 %vm702_vm3, %v5228_v7  ;;  %6176 = vmatprep.mubr.msk.bf16.mxu0 %vm702_vm3, %v5501_v9  ;;  %v5504_v28 = vcombine.low %v2960_v50, %v2963_v0  ;;  %v1273_v7 = vrot.slane %v7245_v56, 5  ;;  %v7335_v9 = vrot.slane %v2325_v13, 5  ;;  %v1280_v56 = vrot.slane %v7254_v38, 5  ;;  %v6644_v13 = vld [vmem:[%s6752_s30 + $0x38] sm:$0x1] }
  0x9e   : > { %6016 = vmatprep.mubr.msk.bf16.mxu1 %vm702_vm3, %v5229_v20  ;;  %v6641_v20 = vld [vmem:[%s6752_s30 + $0x8] sm:$0x1]  ;;  %v5235_v26 = vcombine.low %v7031_v42, %v7046_v54  ;;  %v5236_v38 = vcombine.low %v7062_v22, %v7069_v33  ;;  %v1294_v58 = vrot.slane %v7293_v51, 5  ;;  %v1268_v10 = vrot.slane %v1266_v60, 4 }
  0x9f   : > { %8641 = vst [vmem:[#allocation2_spill] sm:$0xff] %v7335_v9  ;;  %v1275_v36 = vrot.slane %v1273_v7, 4  ;;  %v1269_v57 = vrot.slane %v6641_v20, 5  ;;  %v2332_v29 = vor.u32 %v2331_v23, %v7335_v9  ;;  %v7367_v42 = vsel %vm7005_vm6, %v5260_v21, %v1273_v7  ;;  %v7399_v23 = vld [vmem:[%s6752_s30 + $0x48] sm:$0xe] }
  0xa0   : > { %v1282_v51 = vrot.slane %v1280_v56, 4  ;;  %v5263_v50 = vrot.slane %v1217_v62, 9  ;;  %v1296_v0 = vrot.slane %v1294_v58, 4  ;;  %v1297_v19 = vrot.slane %v6644_v13, 5  ;;  %v6591_v21 = vld [vmem:[%s6752_s30 + $0x48] sm:$0xff]  }
  0xa1   : > { %v7371_v54 = vsel %vm7005_vm6, %v1275_v36, %v1276_v12  ;;  %v7394_v7 = vsel %vm7005_vm6, %v5259_v39, %v1266_v60  ;;  %v7401_v25 = vrot.slane %v2332_v29, 4  ;;  %v7408_v17 = vsel %vm7005_vm6, %v1268_v10, %v1269_v57  ;;  %v7422_v60 = vld [vmem:[%s8621_s1 + $0x80] sm:$0xff]   ;;  %v6645_v57 = vld [vmem:[%s6752_s30 + $0x4c] sm:$0xf]  ;;  %v5593_v13 = vld [vmem:[%s6752_s30 + $0x28] sm:$0xf] }
  0xa2   : > { %v7412_v12 = vsel %vm7005_vm6, %v5261_v6, %v1280_v56  ;;  %v1301_v20 = vrot.slane %v7314_v47, 5  ;;  %v1308_v29 = vrot.slane %v6645_v57, 5  ;;  %v7450_v39 = vld [vmem:[%s6752_s30 + $0x60] sm:$0xe]  ;;  %v5591_v47 = vld [vmem:[%s6752_s30 + $0x20] sm:$0x1] }
  0xa3   : > { %8643 = vst [vmem:[#allocation4_spill] sm:$0xff] %v7401_v25  ;;  %v5265_v10 = vrot.slane %v7399_v23, 9  ;;  %v5596_v62 = vld [vmem:[%s6752_s30 + $0x34] sm:$0xf] }
  0xa4   : > { %6177 = vmatmul.mubr.msk.bf16.gmra.mrb[24].mxu0 %vm702_vm3, %v5502_v16  ;;  %v1283_v16 = vrot.slane %v6642_v55, 5  ;;  %v3688_v55 = vshrl.u32 %v5589_v24, 16  ;;  %v1303_v46 = vrot.slane %v1301_v20, 4  ;;  %v3745_v6 = vshll.u32 %v5596_v62, 16  ;;  %v6653_v9 = vld [vmem:[%s6752_s30 + $0x74] sm:$0x1] }
  0xa5   : > { %6017 = vmatmul.mubr.msk.bf16.gmra.mrb[8].mxu1 %vm702_vm3, %v5230_v59  ;;  %6180 = vmatprep.mubr.msk.bf16.mxu0 %vm702_vm3, %v5503_v45  ;;  %v5262_v59 = vrot.slane %v1216_v41, 9  ;;  %v1289_v45 = vrot.slane %v1287_v32, 4  ;;  %v6646_v41 = vld [vmem:[%s6752_s30 + $0x44] sm:$0x1]  ;;  %v7493_v33 = vsel %vm7005_vm6, %v5265_v10, %v1308_v29  ;;  %v3721_v10 = vshll.u32 %v5593_v13, 16 }
  0xa6   : > { %6020 = vmatprep.mubr.msk.bf16.mxu1 %vm702_vm3, %v5231_v49  ;;  %v7416_v11 = vsel %vm7005_vm6, %v1282_v51, %v1283_v16  ;;  %v3691_v16 = vshll.u32 %v5589_v24, 16  ;;  %v7470_v24 = vld [vmem:[%s6752_s30 + $0x5c] sm:$0x1] }
  0xa7   : > { %v7427_v36 = vsel %vm7005_vm6, %v5262_v59, %v1287_v32  ;;  %v7431_v56 = vsel %vm7005_vm6, %v1289_v45, %v1290_v48  ;;  %v5592_v45 = vld [vmem:[%s6752_s30 + $0x24] sm:$0xf]  ;;  %v1310_v48 = vrot.slane %v1308_v29, 4  ;;  %v7516_v25 = vrot.slane %v3721_v10, 5 }
  0xa8   : > { %v3712_v4 = vshrl.u32 %v5592_v45, 16 }
  0xaa   : > { %v3714_v49 = vrot.slane %v3712_v4, 4  ;;  %v6597_v4 = vld [vmem:[%s6752_s30 + $0x6c] sm:$0xff]  }
  0xac   : > { %6181 = vmatmul.mubr.msk.bf16.gmra.mrb[28].mxu0 %vm702_vm3, %v5504_v28  ;;  %v7384_v28 = vld [vmem:[%s6752_s30 + $0x3c] sm:$0xe] }
  0xad   : > { %6021 = vmatmul.mubr.msk.bf16.gmra.mrb[12].mxu1 %vm702_vm3, %v5232_v53  ;;  %6188 = vmatprep.mubr.msk.bf16.mxu0 %vm702_vm3, %v6582_v1  ;;  %v7386_v53 = vrot.slane %v2335_v31, 5  ;;  %v7436_v31 = vld [vmem:[%s6752_s30 + $0x54] sm:$0xe]  ;;  %v5264_v32 = vrot.slane %v7384_v28, 9  ;;  %v6648_v28 = vld [vmem:[%s6752_s30 + $0x58] sm:$0xf] }
  0xae   : > { %6024 = vmatprep.mubr.msk.bf16.mxu1 %vm702_vm3, %v5233_v8  ;;  %v1315_v23 = vrot.slane %v6648_v28, 5  ;;  %v3693_v28 = vrot.slane %v3691_v16, 5  ;;  %v6651_v16 = vld [vmem:[%s6752_s30 + $0x70] sm:$0xf]  ;;  %v3749_v1 = vshrl.u32 %v5596_v62, 16 }
  0xaf   : > { %8642 = vst [vmem:[#allocation3_spill] sm:$0xff] %v7386_v53  ;;  %v7489_v22 = vsel %vm7005_vm6, %v5264_v32, %v1301_v20  ;;  %v1222_v32 = vld [vmem:[%s6752_s30 + $0x6c] sm:$0xe]  ;;  %v1329_v29 = vrot.slane %v6651_v16, 5 }
  0xb0   : > { %v1317_v20 = vrot.slane %v1315_v23, 4  ;;  %v5268_v57 = vrot.slane %v1222_v32, 9 }
  0xb4   : > { %6189 = vmatmul.mubr.msk.bf16.vlgmr.msra.gmra.mrb[0].mxu0 %vm702_vm3, %v6585_v18  ;;  %v7441_v18 = vsel %vm7005_vm6, %v5263_v50, %v1294_v58  ;;  %v6647_v50 = vld [vmem:[%s6752_s30 + $0x50] sm:$0x1] }
  0xb5   : > { %6025 = vmatmul.mubr.msk.bf16.gmra.mrb[16].mxu1 %vm702_vm3, %v5234_v37  ;;  %6221 = vmatpush3.bf16.msra.mxu0 %v7092_v5  ;;  %v6589_v5 = vld [vmem:[%s6752_s30 + $0x3c] sm:$0xff]  }
  0xb6   : > { %6028 = vmatprep.mubr.msk.bf16.mxu1 %vm702_vm3, %v5235_v26  ;;  %6192 = vmatprep.mubr.msk.bf16.mxu0 %vm702_vm3, %v6587_v43  ;;  %v5590_v37 = vld [vmem:[%s6752_s30 + $0x1c] sm:$0xf]  ;;  %v7445_v26 = vsel %vm7005_vm6, %v1296_v0, %v1297_v19  ;;  %v1304_v43 = vrot.slane %v6646_v41, 5  ;;  %v1311_v0 = vrot.slane %v6647_v50, 5  ;;  %v5266_v19 = vrot.slane %v7436_v31, 9 }
  0xb7   : > { %6222 = vmatprep.subr.bf16.mxu0 %v6600_v44  ;;  %v3697_v51 = vshll.u32 %v5590_v37, 16  ;;  %v3701_v59 = vshrl.u32 %v5590_v37, 16  ;;  %v5267_v37 = vrot.slane %v7450_v39, 9  ;;  %v5595_v41 = vld [vmem:[%s6752_s30 + $0x30] sm:$0xf]  ;;  %v3690_v50 = vrot.slane %v3688_v55, 4 }
  0xb8   : > { %v6593_v39 = vld [vmem:[%s6752_s30 + $0x54] sm:$0xff]   ;;  %v7500_v55 = vsel %vm7005_vm6, %v1303_v46, %v1304_v43  ;;  %v7504_v52 = vsel %vm7005_vm6, %v1310_v48, %v1311_v0  ;;  %v3736_v43 = vshrl.u32 %v5595_v41, 16  ;;  %v3739_v46 = vshll.u32 %v5595_v41, 16  ;;  %v5594_v0 = vld [vmem:[%s6752_s30 + $0x2c] sm:$0x1] }
  0xb9   : > { %6223 = vmatpush3.bf16.msra.mxu0 %v6600_v44  ;;  %v3707_v44 = vshll.u32 %v5591_v47, 16  ;;  %v6595_v47 = vld [vmem:[%s6752_s30 + $0x60] sm:$0xff]   ;;  %v3694_v8 = vor.u32 %v3693_v28, %v3690_v50  ;;  %v8644_v50 = vcombine.low %v7112_v40, %v7119_v15  ;;  %v3731_v32 = vshll.u32 %v5594_v0, 16 }
  0xba   : > { %6256 = vmatprep.subr.bf16.mxu0 %v7422_v60  ;;  %v3741_v28 = vrot.slane %v3739_v46, 5  ;;  %v6655_v46 = vld [vmem:[%s6752_s30 + $0x88] sm:$0xf] }
  0xbb   : > { %v3695_v40 = vrot.slane %v3694_v8, 4  ;;  %v1223_v8 = vld [vmem:[%s6752_s30 + $0x78] sm:$0xe]  ;;  %v3733_v0 = vrot.slane %v3731_v32, 5 }
  0xbc   : > { %6193 = vmatmul.mubr.msk.bf16.gmra.mrb[4].mxu0 %vm702_vm3, %v6589_v5  ;;  %v6650_v5 = vld [vmem:[%s6752_s30 + $0x64] sm:$0xf] }
  0xbd   : > { %6029 = vmatmul.mubr.msk.bf16.gmra.mrb[20].mxu1 %vm702_vm3, %v5236_v38  ;;  %6196 = vmatprep.mubr.msk.bf16.mxu0 %vm702_vm3, %v6591_v21  ;;  %v1322_v31 = vrot.slane %v6650_v5, 5  ;;  %v7495_v38 = vrot.slane %v3697_v51, 5  ;;  %v3703_v21 = vrot.slane %v3701_v59, 4  ;;  %v3725_v51 = vshrl.u32 %v5593_v13, 16  ;;  %v6652_v5 = vld [vmem:[%s6752_s30 + $0x68] sm:$0x1] }
  0xbe   : > { %6032 = vmatprep.mubr.msk.bf16.mxu1 %vm702_vm3, %v5237_v34  ;;  %v3715_v34 = vshll.u32 %v5592_v45, 16  ;;  %v1325_v58 = vrot.slane %v6652_v5, 5  ;;  %v7511_v45 = vrot.slane %v3707_v44, 5  ;;  %v1331_v13 = vrot.slane %v1329_v29, 4 }
  0xbf   : > { %v1324_v59 = vrot.slane %v1322_v31, 4  ;;  %v3704_v48 = vor.u32 %v3703_v21, %v7495_v38  ;;  %v1332_v5 = vrot.slane %v6653_v9, 5  ;;  %v3727_v41 = vrot.slane %v3725_v51, 4 }
  0xc0   : > { %v3717_v16 = vrot.slane %v3715_v34, 5  ;;  %v7527_v44 = vsel %vm7005_vm6, %v5266_v19, %v1315_v23  ;;  %v3738_v9 = vrot.slane %v3736_v43, 4  ;;  %v7533_v21 = vrot.slane %v3745_v6, 5  ;;  %v6654_v6 = vld [vmem:[%s6752_s30 + $0x7c] sm:$0xf] }
  0xc1   : > { %v3705_v15 = vrot.slane %v3704_v48, 4  ;;  %v7540_v23 = vsel %vm7005_vm6, %v5267_v37, %v1322_v31  ;;  %v1336_v10 = vrot.slane %v6654_v6, 5  ;;  %v3755_v51 = vshll.u32 %v5597_v3, 16  ;;  %v6599_v43 = vld [vmem:[%s6752_s30 + $0x78] sm:$0xff]  }
  0xc2   : > { %v3718_v34 = vor.u32 %v3717_v16, %v3714_v49  ;;  %v7554_v49 = vsel %vm7005_vm6, %v1324_v59, %v1325_v58  ;;  %v7562_v37 = vsel %vm7005_vm6, %v1331_v13, %v1332_v5  ;;  %v3742_v31 = vor.u32 %v3741_v28, %v3738_v9  ;;  %v6656_v13 = vld [vmem:[%s6752_s30 + $0x80] sm:$0x1]  ;;  %v1226_v6 = vld [vmem:[%s6752_s30 + $0x9c] sm:$0xe] }
  0xc3   : > { %v3700_v3 = vsel %vm6777_vm2, %v3695_v40, %v7495_v38  ;;  %v3710_v58 = vsel %vm6777_vm2, %v3705_v15, %v7511_v45  ;;  %v1343_v48 = vrot.slane %v6655_v46, 5  ;;  %v5269_v16 = vrot.slane %v1223_v8, 9  ;;  %v6657_v40 = vld [vmem:[%s6752_s30 + $0x8c] sm:$0x1] }
  0xc4   : > { %6197 = vmatmul.mubr.msk.bf16.gmra.mrb[8].mxu0 %vm702_vm3, %v6593_v39  ;;  %v8645_v39 = vcombine.low %v7140_v27, %v7143_v35  ;;  %v8646_v27 = vrot.slane %v7470_v24, 5  ;;  %v7558_v24 = vsel %vm7005_vm6, %v5268_v57, %v1329_v29  ;;  %v5598_v57 = vld [vmem:[%s6752_s30 + $0x3c] sm:$0xf]  ;;  %v3719_v29 = vrot.slane %v3718_v34, 4 }
  0xc5   : > { %6033 = vmatmul.mubr.msk.bf16.gmra.mrb[24].mxu1 %vm702_vm3, %v8644_v50  ;;  %6200 = vmatprep.mubr.msk.bf16.mxu0 %vm702_vm3, %v6595_v47  ;;  %v3751_v47 = vrot.slane %v3749_v1, 4  ;;  %v3728_v1 = vor.u32 %v3727_v41, %v7516_v25  ;;  %v1339_v5 = vrot.slane %v6656_v13, 5  ;;  %v7576_v41 = vld [vmem:[%s6752_s30 + $0x40] sm:$0xf]  ;;  %v1338_v50 = vrot.slane %v1336_v10, 4 }
  0xc6   : > { %6036 = vmatprep.mubr.msk.bf16.mxu1 %vm702_vm3, %v8645_v39  ;;  %v7546_v35 = vsel %vm7005_vm6, %v1317_v20, %v8646_v27  ;;  %v1224_v20 = vld [vmem:[%s6752_s30 + $0x84] sm:$0xe]  ;;  %8647 = vst [vmem:[#allocation5_spill] sm:$0xff] %v7576_v41  ;;  %v3757_v9 = vrot.slane %v3755_v51, 5  ;;  %v8648_v28 = vcombine.low %v7168_v61, %v7173_v14  ;;  %v3743_v39 = vrot.slane %v3742_v31, 4  ;;  %v6602_v51 = vld [vmem:[%s6752_s30 + $0x90] sm:$0xff]  }
  0xc7   : > { %v3752_v59 = vor.u32 %v3751_v47, %v7533_v21  ;;  %v3729_v38 = vrot.slane %v3728_v1, 4  ;;  %v5270_v45 = vrot.slane %v1224_v20, 9  ;;  %v1346_v15 = vrot.slane %v6657_v40, 5  ;;  %v6601_v1 = vld [vmem:[%s6752_s30 + $0x84] sm:$0xff]  }
  0xc8   : > { %v3760_v47 = vshrl.u32 %v5598_v57, 16  ;;  %v3763_v34 = vshll.u32 %v5598_v57, 16  ;;  %v1345_v27 = vrot.slane %v1343_v48, 4  ;;  %v3769_v61 = vshll.u32 %v7576_v41, 16 }
  0xc9   : > { %v3753_v32 = vrot.slane %v3752_v59, 4  ;;  %v3773_v14 = vshrl.u32 %v7576_v41, 16  ;;  %v3734_v31 = vsel %vm6777_vm2, %v3729_v38, %v3733_v0  ;;  %v7608_v20 = vsel %vm7005_vm6, %v5269_v16, %v1336_v10  ;;  %v7616_v59 = vld [vmem:[%s6752_s30 + $0x4c] sm:$0xf]  ;;  %v5604_v10 = vld [vmem:[%s6752_s30 + $0x54] sm:$0xf] }
  0xca   : > { %v3748_v46 = vsel %vm6777_vm2, %v3743_v39, %v7533_v21  ;;  %v3762_v57 = vrot.slane %v3760_v47, 4  ;;  %v7627_v0 = vld [vmem:[%s6752_s30 + $0x58] sm:$0xf]  ;;  %v7639_v21 = vld [vmem:[%s6752_s30 + $0x44] sm:$0x1]  ;;  %v3793_v39 = vshll.u32 %v7616_v59, 16 }
  0xcb   : > { %v6608_v16 = vld [vmem:[%s8621_s1 + $0x38] sm:$0xff]   ;;  %v3758_v13 = vsel %vm6777_vm2, %v3753_v32, %v3757_v9  ;;  %8650 = vst [vmem:[#allocation6_spill] sm:$0xff] %v7639_v21  ;;  %v3775_v38 = vrot.slane %v3773_v14, 4  ;;  %v3797_v40 = vshrl.u32 %v7616_v59, 16  ;;  %v3808_v9 = vshrl.u32 %v5604_v10, 16 }
  0xcc   : > { %6201 = vmatmul.mubr.msk.bf16.gmra.mrb[12].mxu0 %vm702_vm3, %v6597_v4  ;;  %v8649_v4 = vcombine.low %v7394_v7, %v7408_v17  ;;  %v7596_v7 = vcombine.low %v3700_v3, %v3710_v58  ;;  %v7612_v3 = vsel %vm7005_vm6, %v1338_v50, %v1339_v5  ;;  %v5601_v58 = vld [vmem:[%s6752_s30 + $0x48] sm:$0xf]  ;;  %v7636_v5 = vsel %vm7005_vm6, %v1345_v27, %v1346_v15  ;;  %v7644_v50 = vld [vmem:[%s6752_s30 + $0x90] sm:$0xe]  ;;  %v6658_v27 = vld [vmem:[%s6752_s30 + $0x94] sm:$0xf] }
  0xcd   : > { %6037 = vmatmul.mubr.msk.bf16.gmra.mrb[28].mxu1 %vm702_vm3, %v8648_v28  ;;  %6204 = vmatprep.mubr.msk.bf16.mxu0 %vm702_vm3, %v6599_v43  ;;  %v3724_v43 = vsel %vm6777_vm2, %v3719_v29, %v7516_v25  ;;  %v7623_v25 = vsel %vm7005_vm6, %v5270_v45, %v1343_v48  ;;  %v3765_v29 = vrot.slane %v3763_v34, 5  ;;  %v7641_v48 = vrot.slane %v3769_v61, 5  ;;  %v6663_v41 = vld [vmem:[%s6752_s30 + $0xa4] sm:$0x1] }
  0xce   : > { %6044 = vmatprep.mubr.msk.bf16.mxu1 %vm702_vm3, %v8649_v4  ;;  %v3784_v45 = vshrl.u32 %v5601_v58, 16  ;;  %v3787_v28 = vshll.u32 %v5601_v58, 16  ;;  %v3811_v47 = vshll.u32 %v5604_v10, 16  ;;  %v3817_v15 = vshll.u32 %v7627_v0, 16  ;;  %v5607_v58 = vld [vmem:[%s6752_s30 + $0x60] sm:$0xf] }
  0xcf   : > { %v3821_v34 = vshrl.u32 %v7627_v0, 16  ;;  %v8651_v4 = vcombine.low %v7367_v42, %v7371_v54  ;;  %v7656_v32 = vcombine.low %v3724_v43, %v3734_v31  ;;  %v7660_v61 = vcombine.low %v3748_v46, %v3758_v13  ;;  %v7673_v31 = vld [vmem:[%s6752_s30 + $0x50] sm:$0x1]  ;;  %v7679_v10 = vld [vmem:[%s6752_s30 + $0x64] sm:$0xf] }
  0xd0   : > { %v3779_v14 = vshll.u32 %v7639_v21, 16  ;;  %v8652_v42 = vcombine.low %v7412_v12, %v7416_v11  ;;  %v3789_v46 = vrot.slane %v3787_v28, 5  ;;  %v7676_v12 = vrot.slane %v3793_v39, 5  ;;  %v6659_v28 = vld [vmem:[%s6752_s30 + $0x98] sm:$0x1] }
  0xd1   : > { %v3799_v11 = vrot.slane %v3797_v40, 4  ;;  %v3810_v13 = vrot.slane %v3808_v9, 4  ;;  %v1353_v17 = vrot.slane %v6659_v28, 5  ;;  %v3803_v39 = vshll.u32 %v7673_v31, 16  ;;  %v7691_v40 = vld [vmem:[%s6752_s30 + $0x5c] sm:$0x1] }
  0xd2   : > { %v7685_v54 = vrot.slane %v3779_v14, 5  ;;  %v3832_v8 = vshrl.u32 %v5607_v58, 16  ;;  %v3835_v19 = vshll.u32 %v5607_v58, 16  ;;  %v3841_v9 = vshll.u32 %v7679_v10, 16  ;;  %v6660_v14 = vld [vmem:[%s6752_s30 + $0xa0] sm:$0xf] }
  0xd3   : > { %v1357_v28 = vrot.slane %v6660_v14, 5  ;;  %v3805_v14 = vrot.slane %v3803_v39, 5  ;;  %v5272_v43 = vrot.slane %v1226_v6, 9  ;;  %v1360_v6 = vrot.slane %v6663_v41, 5 }
  0xd4   : > { %6205 = vmatmul.mubr.msk.bf16.gmra.mrb[16].mxu0 %vm702_vm3, %v6601_v1  ;;  %v3766_v1 = vor.u32 %v3765_v29, %v3762_v57  ;;  %v6603_v57 = vld [vmem:[%s6752_s30 + $0x9c] sm:$0xff]   ;;  %v6604_v29 = vld [vmem:[%s6752_s30 + $0xa8] sm:$0xff]  }
  0xd5   : > { %6045 = vmatmul.mubr.msk.bf16.vlgmr.msra.gmra.mrb[0].mxu1 %vm702_vm3, %v8651_v4  ;;  %6208 = vmatprep.mubr.msk.bf16.mxu0 %vm702_vm3, %v6602_v51  ;;  %v3776_v51 = vor.u32 %v3775_v38, %v7641_v48  ;;  %v3813_v38 = vrot.slane %v3811_v47, 5  ;;  %v7683_v4 = vrot.slane %v3817_v15, 5  ;;  %v3845_v47 = vshrl.u32 %v7679_v10, 16 }
  0xd6   : > { %6077 = vmatpush3.bf16.msra.mxu1 %v7284_v63  ;;  %6048 = vmatprep.mubr.msk.bf16.mxu1 %vm702_vm3, %v8652_v42  ;;  %v3786_v63 = vrot.slane %v3784_v45, 4  ;;  %v3823_v42 = vrot.slane %v3821_v34, 4  ;;  %v1350_v45 = vrot.slane %v6658_v27, 5  ;;  %v7696_v15 = vrot.slane %v3766_v1, 4 }
  0xd7   : > { %6078 = vmatprep.subr.bf16.mxu1 %v6608_v16  ;;  %v3800_v27 = vor.u32 %v3799_v11, %v7676_v12  ;;  %v3777_v58 = vrot.slane %v3776_v51, 4  ;;  %v3814_v62 = vor.u32 %v3813_v38, %v3810_v13  ;;  %v6662_v51 = vld [vmem:[%s6752_s30 + $0xac] sm:$0xf]  ;;  %v8655_v38 = vcombine.low %v7441_v18, %v7445_v26 }
  0xd8   : > { %v3790_v34 = vor.u32 %v3789_v46, %v3786_v63  ;;  %v3824_v1 = vor.u32 %v3823_v42, %v7683_v4  ;;  %v3827_v63 = vshll.u32 %v7691_v40, 16  ;;  %v8654_v46 = vcombine.low %v7427_v36, %v7431_v56 }
  0xd9   : > { %v1352_v11 = vrot.slane %v1350_v45, 4  ;;  %v1364_v13 = vrot.slane %v6662_v51, 5  ;;  %v3834_v36 = vrot.slane %v3832_v8, 4  ;;  %v3837_v56 = vrot.slane %v3835_v19, 5  ;;  %v6605_v51 = vld [vmem:[%s6752_s30 + $0xb4] sm:$0xff]   ;;  %v6606_v8 = vld [vmem:[%s6752_s30 + $0xc0] sm:$0xff]  }
  0xda   : > { %6079 = vmatpush3.bf16.msra.mxu1 %v6608_v16  ;;  %v7703_v16 = vld [vmem:[%s8621_s1 + $0x40] sm:$0xff]   ;;  %v7720_v42 = vrot.slane %v3841_v9, 5  ;;  %v3801_v21 = vrot.slane %v3800_v27, 4  ;;  %v1359_v39 = vrot.slane %v1357_v28, 4  ;;  %v3815_v18 = vrot.slane %v3814_v62, 4 }
  0xdb   : > { %8653 = vst [vmem:[#allocation7_spill] sm:$0xff] %v7703_v16  ;;  %6292 = vmatprep.subr.bf16.mxu1 %v7703_v16  ;;  %v7724_v16 = vld [vmem:[%s6752_s30 + $0x68] sm:$0x1]  ;;  %v3825_v26 = vrot.slane %v3824_v1, 4  ;;  %v3772_v19 = vsel %vm6777_vm2, %v7696_v15, %v7641_v48  ;;  %v8657_v9 = vrot.slane %v7644_v50, 9  ;;  %v3782_v62 = vsel %vm6777_vm2, %v3777_v58, %v7685_v54 }
  0xdc   : > { %6209 = vmatmul.mubr.msk.bf16.gmra.mrb[20].mxu0 %vm702_vm3, %v6603_v57  ;;  %v1227_v57 = vld [vmem:[%s6752_s30 + $0xa8] sm:$0xe]  ;;  %8656 = vst [vmem:[#allocation8_spill] sm:$0xff] %v7724_v16  ;;  %v3838_v1 = vor.u32 %v3837_v56, %v3834_v36  ;;  %v1228_v48 = vld [vmem:[%s6752_s30 + $0xb4] sm:$0xe]  ;;  %v7748_v50 = vsel %vm7005_vm6, %v1352_v11, %v1353_v17  ;;  %v7755_v54 = vsel %vm7005_vm6, %v5272_v43, %v1357_v28 }
  0xdd   : > { %6049 = vmatmul.mubr.msk.bf16.gmra.mrb[4].mxu1 %vm702_vm3, %v8654_v46  ;;  %6212 = vmatprep.mubr.msk.bf16.mxu0 %vm702_vm3, %v6604_v29  ;;  %v3847_v46 = vrot.slane %v3845_v47, 4  ;;  %v3791_v29 = vrot.slane %v3790_v34, 4  ;;  %v5273_v53 = vrot.slane %v1227_v57, 9  ;;  %v7736_v41 = vsel %vm7005_vm6, %v8657_v9, %v1350_v45  ;;  %v6664_v34 = vld [vmem:[%s6752_s30 + $0xb0] sm:$0x1] }
  0xde   : > { %6052 = vmatprep.mubr.msk.bf16.mxu1 %vm702_vm3, %v8655_v38  ;;  %v3829_v38 = vrot.slane %v3827_v63, 5  ;;  %v1366_v47 = vrot.slane %v1364_v13, 4  ;;  %v1367_v27 = vrot.slane %v6664_v34, 5  ;;  %v3851_v57 = vshll.u32 %v7724_v16, 16  ;;  %v5610_v15 = vld [vmem:[%s6752_s30 + $0x6c] sm:$0xf] }
  0xdf   : > { %v3848_v63 = vor.u32 %v3847_v46, %v7720_v42  ;;  %v3796_v45 = vsel %vm6777_vm2, %v3791_v29, %v7676_v12  ;;  %v7759_v58 = vsel %vm7005_vm6, %v1359_v39, %v1360_v6  ;;  %v3806_v36 = vsel %vm6777_vm2, %v3801_v21, %v3805_v14  ;;  %v6665_v11 = vld [vmem:[%s6752_s30 + $0xb8] sm:$0xf] }
  0xe0   : > { %v3820_v17 = vsel %vm6777_vm2, %v3815_v18, %v7683_v4  ;;  %v3830_v12 = vsel %vm6777_vm2, %v3825_v26, %v3829_v38  ;;  %v7771_v43 = vsel %vm7005_vm6, %v5273_v53, %v1364_v13  ;;  %v8659_v28 = vcombine.low %v7489_v22, %v7500_v55  ;;  %v7784_v53 = vld [vmem:[%s6752_s30 + $0x70] sm:$0xf]  ;;  %v7808_v18 = vld [vmem:[%s6752_s30 + $0x7c] sm:$0xf]  ;;  %v5616_v26 = vld [vmem:[%s6752_s30 + $0x84] sm:$0xf] }
  0xe1   : > { %8658 = vst [vmem:[#allocation9_spill] sm:$0xff] %v7771_v43  ;;  %v7780_v21 = vsel %vm7005_vm6, %v1366_v47, %v1367_v27  ;;  %v5274_v4 = vrot.slane %v1228_v48, 9  ;;  %v1371_v14 = vrot.slane %v6665_v11, 5  ;;  %8661 = vst [vmem:[#allocation11_spill] sm:$0xff] %v7784_v53  ;;  %v3856_v13 = vshrl.u32 %v5610_v15, 16  ;;  %v6607_v38 = vld [vmem:[%s6752_s30 + $0xcc] sm:$0xff]  }
  0xe2   : > { %8660 = vst [vmem:[#allocation10_spill] sm:$0xff] %v7780_v21  ;;  %v8662_v22 = vcombine.low %v7493_v33, %v7504_v52  ;;  %v7790_v55 = vcombine.low %v3772_v19, %v3782_v62  ;;  %v7792_v56 = vrot.slane %v3838_v1, 4  ;;  %v7794_v46 = vrot.slane %v3848_v63, 4  ;;  %v5613_v52 = vld [vmem:[%s6752_s30 + $0x78] sm:$0xf]  ;;  %8663 = vst [vmem:[#allocation12_spill] sm:$0xff] %v7808_v18 }
  0xe3   : > { %v7796_v29 = vrot.slane %v3851_v57, 5  ;;  %v7800_v6 = vcombine.low %v3796_v45, %v3806_v36  ;;  %v7804_v33 = vcombine.low %v3820_v17, %v3830_v12  ;;  %v7815_v19 = vld [vmem:[%s6752_s30 + $0xbc] sm:$0x1]  ;;  %v3859_v47 = vshll.u32 %v5610_v15, 16  ;;  %v7820_v27 = vld [vmem:[%s6752_s30 + $0x88] sm:$0xf] }
  0xe4   : > { %6213 = vmatmul.mubr.msk.bf16.gmra.mrb[24].mxu0 %vm702_vm3, %v6605_v51  ;;  %v3865_v34 = vshll.u32 %v7784_v53, 16  ;;  %8664 = vst [vmem:[#allocation13_spill] sm:$0xff] %v7820_v27  ;;  %v7824_v62 = vsel %vm7005_vm6, %v5274_v4, %v1371_v14  ;;  %v7826_v1 = vrot.slane %v1371_v14, 4  ;;  %v7828_v63 = vrot.slane %v3856_v13, 4  ;;  %v5619_v48 = vld [vmem:[%s6752_s30 + $0x90] sm:$0xf] }
  0xe5   : > { %6053 = vmatmul.mubr.msk.bf16.gmra.mrb[8].mxu1 %vm702_vm3, %v8659_v28  ;;  %6216 = vmatprep.mubr.msk.bf16.mxu0 %vm702_vm3, %v6606_v8  ;;  %v3869_v57 = vshrl.u32 %v7784_v53, 16  ;;  %v3880_v36 = vshrl.u32 %v5613_v52, 16  ;;  %v3883_v17 = vshll.u32 %v5613_v52, 16  ;;  %v7841_v12 = vld [vmem:[%s6752_s30 + $0x94] sm:$0xf]  ;;  %v3889_v4 = vshll.u32 %v7808_v18, 16 }
  0xe6   : > { %6056 = vmatprep.mubr.msk.bf16.mxu1 %vm702_vm3, %v8662_v22  ;;  %8665 = vst [vmem:[#allocation14_spill] sm:$0xff] %v7841_v12  ;;  %v7844_v28 = vld [vmem:[%s6752_s30 + $0x74] sm:$0x1]  ;;  %v3893_v11 = vshrl.u32 %v7808_v18, 16  ;;  %v3904_v14 = vshrl.u32 %v5616_v26, 16  ;;  %v3907_v13 = vshll.u32 %v5616_v26, 16  ;;  %v8667_v15 = vcombine.low %v7527_v44, %v7546_v35 }
  0xe7   : > { %8666 = vst [vmem:[#allocation15_spill] sm:$0xff] %v7844_v28  ;;  %v3913_v22 = vshll.u32 %v7820_v27, 16  ;;  %v3917_v8 = vshrl.u32 %v7820_v27, 16  ;;  %v3928_v51 = vshrl.u32 %v5619_v48, 16  ;;  %v3931_v52 = vshll.u32 %v5619_v48, 16 }
  0xe8   : > { %v3861_v45 = vrot.slane %v3859_v47, 5  ;;  %v7857_v26 = vrot.slane %v3865_v34, 5  ;;  %v3937_v39 = vshll.u32 %v7841_v12, 16  ;;  %v3941_v9 = vshrl.u32 %v7841_v12, 16  ;;  %v5622_v34 = vld [vmem:[%s6752_s30 + $0x9c] sm:$0xf] }
  0xe9   : > { %v8668_v48 = vcombine.low %v7540_v23, %v7554_v49  ;;  %v3871_v44 = vrot.slane %v3869_v57, 4  ;;  %v3875_v35 = vshll.u32 %v7844_v28, 16  ;;  %v3885_v47 = vrot.slane %v3883_v17, 5  ;;  %v7873_v18 = vld [vmem:[%s6752_s30 + $0x8c] sm:$0x1] }
  0xea   : > { %v3895_v27 = vrot.slane %v3893_v11, 4  ;;  %v3906_v53 = vrot.slane %v3904_v14, 4  ;;  %v3909_v12 = vrot.slane %v3907_v13, 5  ;;  %v7875_v21 = vrot.slane %v3913_v22, 5  ;;  %v7881_v57 = vld [vmem:[%s6752_s30 + $0x98] sm:$0x1] }
  0xeb   : > { %v3919_v23 = vrot.slane %v3917_v8, 4  ;;  %v3930_v49 = vrot.slane %v3928_v51, 4  ;;  %v3933_v43 = vrot.slane %v3931_v52, 5  ;;  %v7883_v28 = vrot.slane %v3937_v39, 5  ;;  %v6611_v51 = vld [vmem:[%s8621_s1 + $0x88] sm:$0xff]  }
  0xec   : > { %6217 = vmatmul.mubr.msk.bf16.gmra.mrb[28].mxu0 %vm702_vm3, %v6607_v38  ;;  %v7860_v38 = vld [vmem:[%s6752_s30 + $0x80] sm:$0x1]  ;;  %v3952_v17 = vshrl.u32 %v5622_v34, 16  ;;  %v3862_v11 = vor.u32 %v3861_v45, %v7828_v63  ;;  %v3872_v16 = vor.u32 %v3871_v44, %v7857_v26  ;;  %v3910_v22 = vor.u32 %v3909_v12, %v3906_v53 }
  0xed   : > { %6057 = vmatmul.mubr.msk.bf16.gmra.mrb[12].mxu1 %vm702_vm3, %v8667_v15  ;;  %6224 = vmatprep.mubr.msk.bf16.mxu0 %vm702_vm3, %v7596_v7  ;;  %v3882_v7 = vrot.slane %v3880_v36, 4  ;;  %v7870_v15 = vrot.slane %v3889_v4, 5  ;;  %v3943_v36 = vrot.slane %v3941_v9, 4  ;;  %v3955_v4 = vshll.u32 %v5622_v34, 16 }
  0xee   : > { %6060 = vmatprep.mubr.msk.bf16.mxu1 %vm702_vm3, %v8668_v48  ;;  %v7878_v48 = vld [vmem:[%s6752_s30 + $0xa0] sm:$0xf]  ;;  %v3899_v13 = vshll.u32 %v7860_v38, 16  ;;  %v3920_v63 = vor.u32 %v3919_v23, %v7875_v21  ;;  %v3923_v45 = vshll.u32 %v7873_v18, 16  ;;  %v3934_v52 = vor.u32 %v3933_v43, %v3930_v49 }
  0xef   : > { %v3886_v14 = vor.u32 %v3885_v47, %v3882_v7  ;;  %v3896_v8 = vor.u32 %v3895_v27, %v7870_v15  ;;  %v3961_v39 = vshll.u32 %v7878_v48, 16  ;;  %v3965_v9 = vshrl.u32 %v7878_v48, 16 }
  0xf0   : > { %v3947_v27 = vshll.u32 %v7881_v57, 16  ;;  %v8669_v44 = vcombine.low %v7558_v24, %v7562_v37  ;;  %v3877_v53 = vrot.slane %v3875_v35, 5  ;;  %v3944_v12 = vor.u32 %v3943_v36, %v7883_v28 }
  0xf1   : > { %v3954_v7 = vrot.slane %v3952_v17, 4  ;;  %v8670_v47 = vcombine.low %v7608_v20, %v7612_v3  ;;  %v3863_v43 = vrot.slane %v3862_v11, 4  ;;  %v3873_v24 = vrot.slane %v3872_v16, 4  ;;  %v7918_v16 = vld [vmem:[%s6752_s30 + $0xac] sm:$0xf] }
  0xf2   : > { %v3887_v37 = vrot.slane %v3886_v14, 4  ;;  %v3901_v34 = vrot.slane %v3899_v13, 5  ;;  %v3897_v35 = vrot.slane %v3896_v8, 4  ;;  %v3911_v23 = vrot.slane %v3910_v22, 4 }
  0xf3   : > { %v7912_v49 = vrot.slane %v3961_v39, 5  ;;  %v3967_v36 = vrot.slane %v3965_v9, 4  ;;  %v3921_v17 = vrot.slane %v3920_v63, 4  ;;  %v3925_v20 = vrot.slane %v3923_v45, 5 }
  0xf4   : > { %6225 = vmatmul.mubr.msk.bf16.vlgmr.msra.gmra.mrb[0].mxu0 %vm702_vm3, %v7656_v32  ;;  %v3957_v32 = vrot.slane %v3955_v4, 5  ;;  %v3935_v3 = vrot.slane %v3934_v52, 4  ;;  %v3949_v4 = vrot.slane %v3947_v27, 5  ;;  %v8671_v8 = vrot.slane %v7815_v19, 5 }
  0xf5   : > { %6061 = vmatmul.mubr.msk.bf16.gmra.mrb[16].mxu1 %vm702_vm3, %v8669_v44  ;;  %6257 = vmatpush3.bf16.msra.mxu0 %v7422_v60  ;;  %v5625_v60 = vld [vmem:[%s6752_s30 + $0xa8] sm:$0xf]  ;;  %v7915_v44 = vld [vmem:[%s6752_s30 + $0xa4] sm:$0x1]  ;;  %v3868_v39 = vsel %vm6777_vm2, %v3863_v43, %v7857_v26  ;;  %v3892_v9 = vsel %vm6777_vm2, %v3887_v37, %v7870_v15  ;;  %v3902_v19 = vsel %vm6777_vm2, %v3897_v35, %v3901_v34  ;;  %v3985_v52 = vshll.u32 %v7918_v16, 16 }
  0xf6   : > { %6064 = vmatprep.mubr.msk.bf16.mxu1 %vm702_vm3, %v8670_v47  ;;  %6228 = vmatprep.mubr.msk.bf16.mxu0 %vm702_vm3, %v7660_v61  ;;  %v3945_v61 = vrot.slane %v3944_v12, 4  ;;  %v3958_v11 = vor.u32 %v3957_v32, %v3954_v7  ;;  %v3976_v14 = vshrl.u32 %v5625_v60, 16  ;;  %v3979_v13 = vshll.u32 %v5625_v60, 16 }
  0xf7   : > { %6258 = vmatprep.subr.bf16.mxu0 %v6611_v51  ;;  %v7925_v22 = vsel %vm7005_vm6, %v7826_v1, %v8671_v8  ;;  %v3916_v1 = vsel %vm6777_vm2, %v3911_v23, %v7875_v21  ;;  %v3968_v63 = vor.u32 %v3967_v36, %v7912_v49  ;;  %v3971_v45 = vshll.u32 %v7915_v44, 16  ;;  %v5675_v21 = vld [vmem:[%s6752_s30 + $0x48] sm:$0xe]  ;;  %v5678_v8 = vld [vmem:[%s6752_s30 + $0x6c] sm:$0xe] }
  0xf8   : > { %v3926_v26 = vsel %vm6777_vm2, %v3921_v17, %v3925_v20  ;;  %v3940_v15 = vsel %vm6777_vm2, %v3935_v3, %v7883_v28  ;;  %v3989_v27 = vshrl.u32 %v7918_v16, 16  ;;  %v3959_v12 = vrot.slane %v3958_v11, 4  ;;  %v7961_v28 = vld [vmem:[%s6752_s30 + $0xb0] sm:$0x1] }
  0xf9   : > { %6259 = vmatpush3.bf16.msra.mxu0 %v6611_v51  ;;  %v3878_v51 = vsel %vm6777_vm2, %v3873_v24, %v3877_v53  ;;  %v8672_v53 = vcombine.low %v7623_v25, %v7636_v5  ;;  %v3978_v7 = vrot.slane %v3976_v14, 4  ;;  %v3981_v32 = vrot.slane %v3979_v13, 5 }
  0xfa   : > { %v8673_v47 = vcombine.low %v7736_v41, %v7748_v50  ;;  %v8674_v25 = vsel %vm6777_vm2, %v7794_v46, %v7796_v29  ;;  %v8675_v5 = vsel %vm6777_vm2, %v7792_v56, %v7720_v42  ;;  %v5290_v43 = vcombine.low %v7824_v62, %v7925_v22  ;;  %v5628_v50 = vld [vmem:[%s6752_s30 + $0xb4] sm:$0xf] }
  0xfb   : > { %v7979_v24 = vcombine.low %v3868_v39, %v3878_v51  ;;  %v7981_v41 = vcombine.low %v3892_v9, %v3902_v19  ;;  %v7984_v37 = vcombine.low %v3916_v1, %v3926_v26  ;;  %v3969_v34 = vrot.slane %v3968_v63, 4  ;;  %v5676_v29 = vld [vmem:[%s6752_s30 + $0x54] sm:$0xe] }
  0xfc   : > { %6229 = vmatmul.mubr.msk.bf16.gmra.mrb[4].mxu0 %vm702_vm3, %v7790_v55  ;;  %v3950_v55 = vsel %vm6777_vm2, %v3945_v61, %v3949_v4  ;;  %v3973_v60 = vrot.slane %v3971_v45, 5  ;;  %v5691_v46 = vrot.slane %v5675_v21, 9  ;;  %v7989_v42 = vrot.slane %v3985_v52, 5  ;;  %v5677_v4 = vld [vmem:[%s6752_s30 + $0x60] sm:$0xe]  ;;  %v8677_v45 = vld [vmem:[#allocation8_spill] sm:$0xff] }
  0xfd   : > { %6065 = vmatmul.mubr.msk.bf16.gmra.mrb[20].mxu1 %vm702_vm3, %v8672_v53  ;;  %6232 = vmatprep.mubr.msk.bf16.mxu0 %vm702_vm3, %v7800_v6  ;;  %v5643_v6 = vcombine.low %v8675_v5, %v8674_v25  ;;  %v7987_v35 = vcombine.low %v3940_v15, %v3950_v55  ;;  %v3991_v56 = vrot.slane %v3989_v27, 4  ;;  %v3995_v23 = vshll.u32 %v7961_v28, 16  ;;  %v8678_v52 = vld [vmem:[#allocation9_spill] sm:$0xff]  ;;  %v8679_v27 = vld [vmem:[#allocation10_spill] sm:$0xff]  ;;  %v8681_v53 = vld [vmem:[#allocation11_spill] sm:$0xff] }
  0xfe   : > { %6068 = vmatprep.mubr.msk.bf16.mxu1 %vm702_vm3, %v8673_v47  ;;  %v3964_v36 = vsel %vm6777_vm2, %v3959_v12, %v7912_v49  ;;  %v3982_v17 = vor.u32 %v3981_v32, %v3978_v7  ;;  %v4470_v20 = vrot.slane %v7616_v59, 5  ;;  %v4473_v3 = vrot.slane %v7673_v31, 5  ;;  %v8011_v31 = vld [vmem:[%s6752_s30 + $0xb8] sm:$0xf]  ;;  %v8682_v12 = vld [vmem:[#allocation15_spill] sm:$0xff] }
  0xff   : > { %v4000_v61 = vshrl.u32 %v5628_v50, 16  ;;  %v5692_v11 = vrot.slane %v5676_v29, 9  ;;  %v4477_v14 = vrot.slane %v7627_v0, 5  ;;  %v4480_v13 = vrot.slane %v7691_v40, 5  ;;  %v5631_v32 = vld [vmem:[%s6752_s30 + $0xc0] sm:$0xf] }
 0x100   : > { %v3974_v39 = vsel %vm6777_vm2, %v3969_v34, %v3973_v60  ;;  %v4003_v51 = vshll.u32 %v5628_v50, 16  ;;  %v8005_v49 = vsel %vm7005_vm6, %v5691_v46, %v4470_v20  ;;  %v4472_v9 = vrot.slane %v4470_v20, 4  ;;  %v5679_v46 = vld [vmem:[%s6752_s30 + $0x78] sm:$0xe] }
 0x101   : > { %v3992_v59 = vor.u32 %v3991_v56, %v7989_v42  ;;  %v8015_v0 = vsel %vm7005_vm6, %v5692_v11, %v4477_v14  ;;  %v4479_v40 = vrot.slane %v4477_v14, 4  ;;  %v5693_v19 = vrot.slane %v5677_v4, 9  ;;  %v6610_v4 = vld [vmem:[%s6752_s30 + $0xc] sm:$0xff]  }
 0x102   : > { %v8676_v1 = vcombine.low %v7755_v54, %v7759_v58  ;;  %v4484_v63 = vrot.slane %v7679_v10, 5  ;;  %v4487_v26 = vrot.slane %v8677_v45, 5  ;;  %v5694_v15 = vrot.slane %v5678_v8, 9 }
 0x103   : > { %v8680_v21 = vcombine.low %v8678_v52, %v8679_v27  ;;  %v8036_v58 = vsel %vm7005_vm6, %v4479_v40, %v4480_v13  ;;  %v4491_v55 = vrot.slane %v8681_v53, 5  ;;  %v4494_v10 = vrot.slane %v8682_v12, 5  ;;  %v8073_v13 = vld [vmem:[%s6752_s30 + $0xc4] sm:$0xf]  ;;  %v8684_v52 = vld [vmem:[#allocation3_spill] sm:$0xff]  ;;  %v8685_v27 = vld [vmem:[#allocation4_spill] sm:$0xff] }
 0x104   : > { %6233 = vmatmul.mubr.msk.bf16.gmra.mrb[8].mxu0 %vm702_vm3, %v7804_v33  ;;  %v8024_v33 = vsel %vm7005_vm6, %v4472_v9, %v4473_v3  ;;  %v4009_v7 = vshll.u32 %v8011_v31, 16  ;;  %v5708_v47 = vcombine.low %v8015_v0, %v8036_v58  ;;  %v8046_v25 = vsel %vm7005_vm6, %v5693_v19, %v4484_v63  ;;  %v5402_v3 = vld [vmem:[%s6752_s30 + $0x78] sm:$0xf]  ;;  %v8683_v19 = vld [vmem:[#allocation12_spill] sm:$0xff]  ;;  %v6678_v58 = vld [vmem:[%s6752_s30 + $0xa0] sm:$0xf] }
 0x105   : > { %6069 = vmatmul.mubr.msk.bf16.gmra.mrb[24].mxu1 %vm702_vm3, %v8676_v1  ;;  %6236 = vmatprep.mubr.msk.bf16.mxu0 %vm702_vm3, %v5643_v6  ;;  %v5707_v54 = vcombine.low %v8005_v49, %v8024_v33  ;;  %v4486_v5 = vrot.slane %v4484_v63, 4  ;;  %v8048_v6 = vrot.slane %v3995_v23, 5  ;;  %v4013_v50 = vshrl.u32 %v8011_v31, 16  ;;  %v8686_v12 = vld [vmem:[#allocation13_spill] sm:$0xff] }
 0x106   : > { %6072 = vmatprep.mubr.msk.bf16.mxu1 %vm702_vm3, %v8680_v21  ;;  %v8053_v34 = vsel %vm7005_vm6, %v5694_v15, %v4491_v55  ;;  %v4493_v60 = vrot.slane %v4491_v55, 4  ;;  %v8056_v29 = vcombine.low %v3964_v36, %v3974_v39  ;;  %v8058_v56 = vrot.slane %v3982_v17, 4 }
 0x107   : > { %v8060_v20 = vrot.slane %v4000_v61, 4  ;;  %v8064_v23 = vsel %vm7005_vm6, %v4486_v5, %v4487_v26  ;;  %v8068_v11 = vrot.slane %v3992_v59, 4  ;;  %v8070_v14 = vrot.slane %v4003_v51, 5  ;;  %v5680_v59 = vld [vmem:[%s6752_s30 + $0x84] sm:$0xe] }
 0x108   : > { %v5709_v36 = vcombine.low %v8046_v25, %v8064_v23  ;;  %v8079_v17 = vsel %vm7005_vm6, %v4493_v60, %v4494_v10  ;;  %v8081_v61 = vrot.slane %v4009_v7, 5  ;;  %v4024_v8 = vshrl.u32 %v5631_v32, 16  ;;  %v8089_v51 = vld [vmem:[%s6752_s30 + $0xbc] sm:$0x1]  ;;  %v5634_v5 = vld [vmem:[%s6752_s30 + $0xcc] sm:$0xf] }
 0x109   : > { %v5710_v39 = vcombine.low %v8053_v34, %v8079_v17  ;;  %v5695_v9 = vrot.slane %v5679_v46, 9  ;;  %v4027_v40 = vshll.u32 %v5631_v32, 16  ;;  %v4498_v1 = vrot.slane %v8683_v19, 5  ;;  %v6612_v46 = vld [vmem:[%s6752_s30 + $0x18] sm:$0xff]   ;;  %v5681_v19 = vld [vmem:[%s6752_s30 + $0x90] sm:$0xe] }
 0x10a   : > { %v4501_v63 = vrot.slane %v7860_v38, 5  ;;  %v2316_v45 = vshrl.u32 %v5402_v3, 16  ;;  %v4033_v26 = vshll.u32 %v8073_v13, 16  ;;  %v2319_v15 = vshll.u32 %v5402_v3, 16  ;;  %v6682_v17 = vld [vmem:[%s6752_s30 + $0xac] sm:$0xf] }
 0x10b   : > { %v2338_v38 = vsel %vm6777_vm2, %v8685_v27, %v8684_v52  ;;  %v8108_v62 = vsel %vm7005_vm6, %v5695_v9, %v4498_v1  ;;  %v4500_v22 = vrot.slane %v4498_v1, 4  ;;  %v4015_v21 = vrot.slane %v4013_v50, 4  ;;  %v8687_v27 = vld [vmem:[#allocation14_spill] sm:$0xff] }
 0x10c   : > { %6237 = vmatmul.mubr.msk.bf16.gmra.mrb[12].mxu0 %vm702_vm3, %v7979_v24  ;;  %v4037_v24 = vshrl.u32 %v8073_v13, 16  ;;  %v4019_v53 = vshll.u32 %v8089_v51, 16  ;;  %v2321_v55 = vrot.slane %v2319_v15, 5  ;;  %v4505_v10 = vrot.slane %v8686_v12, 5 }
 0x10d   : > { %6073 = vmatmul.mubr.msk.bf16.gmra.mrb[28].mxu1 %vm702_vm3, %v5290_v43  ;;  %6240 = vmatprep.mubr.msk.bf16.mxu0 %vm702_vm3, %v7981_v41  ;;  %v2318_v43 = vrot.slane %v2316_v45, 4  ;;  %v5696_v41 = vrot.slane %v5680_v59, 9  ;;  %v3988_v7 = vsel %vm6777_vm2, %v8058_v56, %v7989_v42  ;;  %v4006_v32 = vor.u32 %v8070_v14, %v8060_v20  ;;  %v6613_v42 = vld [vmem:[%s6752_s30 + $0x24] sm:$0xff]   ;;  %v8132_v14 = vld [vmem:[%s6752_s30 + $0xd0] sm:$0xf] }
 0x10e   : > { %6080 = vmatprep.mubr.msk.bf16.mxu1 %vm702_vm3, %v6610_v4  ;;  %v8121_v60 = vsel %vm7005_vm6, %v4500_v22, %v4501_v63  ;;  %v4508_v50 = vrot.slane %v7873_v18, 5  ;;  %v4026_v3 = vrot.slane %v4024_v8, 4  ;;  %v4029_v4 = vrot.slane %v4027_v40, 5  ;;  %v8144_v40 = vld [vmem:[%s6752_s30 + $0xc8] sm:$0x1] }
 0x10f   : > { %v5711_v9 = vcombine.low %v8108_v62, %v8121_v60  ;;  %v2322_v59 = vor.u32 %v2321_v55, %v2318_v43  ;;  %v8129_v56 = vrot.slane %v4033_v26, 5  ;;  %v4039_v20 = vrot.slane %v4037_v24, 4  ;;  %v8688_v43 = vld [vmem:[#allocation2_spill] sm:$0xff] }
 0x110   : > { %v8136_v1 = vsel %vm7005_vm6, %v5696_v41, %v4505_v10  ;;  %v4507_v63 = vrot.slane %v4505_v10, 4  ;;  %v3998_v18 = vsel %vm6777_vm2, %v8068_v11, %v8048_v6  ;;  %v4016_v8 = vor.u32 %v4015_v21, %v8081_v61  ;;  %v8689_v21 = vld [vmem:[#allocation7_spill] sm:$0xff] }
 0x111   : > { %v4048_v45 = vshrl.u32 %v5634_v5, 16  ;;  %v2323_v26 = vrot.slane %v2322_v59, 4  ;;  %v4051_v24 = vshll.u32 %v5634_v5, 16  ;;  %v5697_v52 = vrot.slane %v5681_v19, 9 }
 0x112   : > { %v8150_v15 = vsel %vm7005_vm6, %v4507_v63, %v4508_v50  ;;  %v4512_v22 = vrot.slane %v8687_v27, 5  ;;  %v4057_v6 = vshll.u32 %v8132_v14, 16  ;;  %v4061_v11 = vshrl.u32 %v8132_v14, 16  ;;  %v6667_v50 = vld [vmem:[%s8621_s1 + $0x48] sm:$0xff]   ;;  %v6614_v63 = vld [vmem:[%s6752_s30 + $0x30] sm:$0xff]  }
 0x113   : > { %v5712_v41 = vcombine.low %v8136_v1, %v8150_v15  ;;  %v4030_v55 = vor.u32 %v4029_v4, %v4026_v3  ;;  %v4043_v12 = vshll.u32 %v8144_v40, 16  ;;  %v4021_v5 = vrot.slane %v4019_v53, 5  ;;  %v8180_v53 = vld [vmem:[%s6752_s30 + $0xd4] sm:$0x1] }
 0x114   : > { %6241 = vmatmul.mubr.msk.bf16.gmra.mrb[16].mxu0 %vm702_vm3, %v7984_v37  ;;  %v2328_v37 = vsel %vm6777_vm2, %v2323_v26, %v8688_v43  ;;  %v4514_v59 = vrot.slane %v4512_v22, 4  ;;  %v4515_v3 = vrot.slane %v7881_v57, 5  ;;  %v5649_v4 = vcombine.low %v3988_v7, %v3998_v18 }
 0x115   : > { %6081 = vmatmul.mubr.msk.bf16.vlgmr.msra.gmra.mrb[0].mxu1 %vm702_vm3, %v6612_v46  ;;  %6244 = vmatprep.mubr.msk.bf16.mxu0 %vm702_vm3, %v7987_v35  ;;  %v4040_v35 = vor.u32 %v4039_v20, %v8129_v56  ;;  %v8167_v10 = vcombine.low %v2328_v37, %v2338_v38  ;;  %v8174_v46 = vsel %vm7005_vm6, %v5697_v52, %v4512_v22  ;;  %v4007_v19 = vrot.slane %v4006_v32, 4  ;;  %v5682_v38 = vld [vmem:[%s6752_s30 + $0x9c] sm:$0xe] }
 0x116   : > { %6294 = vmatpush3.bf16.msra.mxu1 %v8689_v21  ;;  %6084 = vmatprep.mubr.msk.bf16.mxu1 %vm702_vm3, %v6613_v42  ;;  %v4017_v42 = vrot.slane %v4016_v8, 4  ;;  %v4050_v20 = vrot.slane %v4048_v45, 4  ;;  %v4053_v26 = vrot.slane %v4051_v24, 5  ;;  %v8182_v27 = vrot.slane %v4057_v6, 5  ;;  %v6615_v52 = vld [vmem:[%s6752_s30 + $0x3c] sm:$0xff]  }
 0x117   : > { %6293 = vmatprep.subr.bf16.mxu1 %v6667_v50  ;;  %v4063_v43 = vrot.slane %v4061_v11, 4  ;;  %v8186_v37 = vsel %vm7005_vm6, %v4514_v59, %v4515_v3  ;;  %v4031_v22 = vrot.slane %v4030_v55, 4  ;;  %v4041_v57 = vrot.slane %v4040_v35, 4  ;;  %v5671_v21 = vld [vmem:[%s6752_s30 + $0x18] sm:$0xe] }
 0x118   : > { %v4045_v7 = vrot.slane %v4043_v12, 5  ;;  %v5713_v32 = vcombine.low %v8174_v46, %v8186_v37  ;;  %v5698_v18 = vrot.slane %v5682_v38, 9  ;;  %v4519_v8 = vrot.slane %v7878_v48, 5  ;;  %v6668_v12 = vld [vmem:[%s6752_s30 + $0x1c] sm:$0xf] }
 0x119   : > { %v4012_v45 = vsel %vm6777_vm2, %v4007_v19, %v8081_v61  ;;  %v4022_v24 = vsel %vm6777_vm2, %v4017_v42, %v4021_v5  ;;  %v4067_v6 = vshll.u32 %v8180_v53, 16  ;;  %v4522_v11 = vrot.slane %v7915_v44, 5  ;;  %v5683_v59 = vld [vmem:[%s6752_s30 + $0xa8] sm:$0xe] }
 0x11a   : > { %6295 = vmatpush3.bf16.msra.mxu1 %v6667_v50  ;;  %v4054_v48 = vor.u32 %v4053_v26, %v4050_v20  ;;  %v8207_v61 = vsel %vm7005_vm6, %v5698_v18, %v4519_v8  ;;  %v4521_v55 = vrot.slane %v4519_v8, 4  ;;  %v4036_v44 = vsel %vm6777_vm2, %v4031_v22, %v8129_v56  ;;  %v6616_v20 = vld [vmem:[%s6752_s30 + $0x48] sm:$0xff]   ;;  %v6669_v26 = vld [vmem:[%s6752_s30 + $0x20] sm:$0x1]  ;;  %v5684_v8 = vld [vmem:[%s6752_s30 + $0xb4] sm:$0xe] }
 0x11b   : > { %v4046_v35 = vsel %vm6777_vm2, %v4041_v57, %v4045_v7  ;;  %v4442_v5 = vrot.slane %v6668_v12, 5  ;;  %v5650_v3 = vcombine.low %v4012_v45, %v4022_v24  ;;  %v5687_v19 = vrot.slane %v5671_v21, 9  ;;  %v5673_v12 = vld [vmem:[%s6752_s30 + $0x30] sm:$0xe] }
 0x11c   : > { %6245 = vmatmul.mubr.msk.bf16.gmra.mrb[20].mxu0 %vm702_vm3, %v8056_v29  ;;  %v4064_v29 = vor.u32 %v4063_v43, %v8182_v27  ;;  %v8218_v50 = vsel %vm7005_vm6, %v4521_v55, %v4522_v11  ;;  %v5651_v56 = vcombine.low %v4036_v44, %v4046_v35  ;;  %v4055_v38 = vrot.slane %v4054_v48, 4  ;;  %v5672_v11 = vld [vmem:[%s6752_s30 + $0x24] sm:$0xe]  ;;  %v6670_v48 = vld [vmem:[%s6752_s30 + $0x28] sm:$0xf] }
 0x11d   : > { %6085 = vmatmul.mubr.msk.bf16.gmra.mrb[4].mxu1 %vm702_vm3, %v6614_v63  ;;  %6248 = vmatprep.mubr.msk.bf16.mxu0 %vm702_vm3, %v5649_v4  ;;  %v4069_v4 = vrot.slane %v4067_v6, 5  ;;  %v5714_v42 = vcombine.low %v8207_v61, %v8218_v50  ;;  %v4445_v43 = vrot.slane %v6669_v26, 5  ;;  %v4444_v22 = vrot.slane %v4442_v5, 4  ;;  %v6671_v55 = vld [vmem:[%s6752_s30 + $0x34] sm:$0xf] }
 0x11e   : > { %6088 = vmatprep.mubr.msk.bf16.mxu1 %vm702_vm3, %v6615_v52  ;;  %v4065_v63 = vrot.slane %v4064_v29, 4  ;;  %v6617_v52 = vld [vmem:[%s6752_s30 + $0x54] sm:$0xff]   ;;  %v5699_v57 = vrot.slane %v5683_v59, 9  ;;  %v4526_v7 = vrot.slane %v7918_v16, 5  ;;  %v4529_v18 = vrot.slane %v7961_v28, 5 }
 0x11f   : > { %v4060_v16 = vsel %vm6777_vm2, %v4055_v38, %v8182_v27  ;;  %v4443_v6 = vsel %vm7005_vm6, %v5687_v19, %v4442_v5  ;;  %v4449_v29 = vrot.slane %v6670_v48, 5  ;;  %v4446_v21 = vsel %vm7005_vm6, %v4444_v22, %v4445_v43  ;;  %v6672_v19 = vld [vmem:[%s6752_s30 + $0x2c] sm:$0x1]  ;;  %v6618_v38 = vld [vmem:[%s6752_s30 + $0x60] sm:$0xff]   ;;  %v6687_v61 = vld [vmem:[%s6752_s30 + $0xc8] sm:$0x1] }
 0x120   : > { %v8232_v45 = vsel %vm7005_vm6, %v5699_v57, %v4526_v7  ;;  %v4528_v24 = vrot.slane %v4526_v7, 4  ;;  %v4070_v28 = vsel %vm6777_vm2, %v4065_v63, %v4069_v4  ;;  %v4456_v44 = vrot.slane %v6671_v55, 5  ;;  %v6619_v22 = vld [vmem:[%s6752_s30 + $0x6c] sm:$0xff]  }
 0x121   : > { %v5700_v35 = vrot.slane %v5684_v8, 9  ;;  %v4533_v59 = vrot.slane %v8011_v31, 5  ;;  %v5688_v4 = vrot.slane %v5672_v11, 9  ;;  %v5703_v63 = vcombine.low %v4443_v6, %v4446_v21  ;;  %v6673_v31 = vld [vmem:[%s6752_s30 + $0x38] sm:$0x1] }
 0x122   : > { %v8251_v27 = vsel %vm7005_vm6, %v4528_v24, %v4529_v18  ;;  %v4451_v26 = vrot.slane %v4449_v29, 4  ;;  %v5689_v57 = vrot.slane %v5673_v12, 9  ;;  %v4458_v7 = vrot.slane %v4456_v44, 4  ;;  %v5685_v8 = vld [vmem:[%s6752_s30 + $0xc0] sm:$0xe]  ;;  %v8690_v6 = vld [vmem:[#allocation5_spill] sm:$0xff] }
 0x123   : > { %v5715_v5 = vcombine.low %v8232_v45, %v8251_v27  ;;  %v8262_v43 = vsel %vm7005_vm6, %v5700_v35, %v4533_v59  ;;  %v4459_v18 = vrot.slane %v6673_v31, 5  ;;  %v4463_v11 = vrot.slane %v8690_v6, 5  ;;  %v5674_v35 = vld [vmem:[%s6752_s30 + $0x3c] sm:$0xe]  ;;  %v6674_v6 = vld [vmem:[%s6752_s30 + $0x70] sm:$0xf] }
 0x124   : > { %6249 = vmatmul.mubr.msk.bf16.gmra.mrb[24].mxu0 %vm702_vm3, %v5650_v3  ;;  %v5652_v3 = vcombine.low %v4060_v16, %v4070_v28  ;;  %v4450_v16 = vsel %vm7005_vm6, %v5688_v4, %v4449_v29  ;;  %v5701_v48 = vrot.slane %v5685_v8, 9  ;;  %v4457_v21 = vsel %vm7005_vm6, %v5689_v57, %v4456_v44  ;;  %v5399_v4 = vld [vmem:[%s6752_s30 + $0x6c] sm:$0xf] }
 0x125   : > { %6089 = vmatmul.mubr.msk.bf16.gmra.mrb[8].mxu1 %vm702_vm3, %v6616_v20  ;;  %6252 = vmatprep.mubr.msk.bf16.mxu0 %vm702_vm3, %v5651_v56  ;;  %v4452_v20 = vrot.slane %v6672_v19, 5  ;;  %v4536_v56 = vrot.slane %v8089_v51, 5  ;;  %v4460_v55 = vsel %vm7005_vm6, %v4458_v7, %v4459_v18  ;;  %v4540_v12 = vrot.slane %v8073_v13, 5 }
 0x126   : > { %6092 = vmatprep.mubr.msk.bf16.mxu1 %vm702_vm3, %v6617_v52  ;;  %v4535_v52 = vrot.slane %v4533_v59, 4  ;;  %v4543_v29 = vrot.slane %v8144_v40, 5  ;;  %v5686_v59 = vld [vmem:[%s6752_s30 + $0xcc] sm:$0xe]  ;;  %v4465_v44 = vrot.slane %v4463_v11, 4  ;;  %v2292_v57 = vshrl.u32 %v5399_v4, 16 }
 0x127   : > { %v4453_v28 = vsel %vm7005_vm6, %v4451_v26, %v4452_v20  ;;  %v8293_v19 = vsel %vm7005_vm6, %v5701_v48, %v4540_v12  ;;  %v4542_v20 = vrot.slane %v4540_v12, 4  ;;  %v8691_v26 = vld [vmem:[#allocation6_spill] sm:$0xff]  ;;  %v5702_v40 = vrot.slane %v5686_v59, 9 }
 0x128   : > { %v8269_v24 = vsel %vm7005_vm6, %v4535_v52, %v4536_v56  ;;  %v6620_v56 = vld [vmem:[%s6752_s30 + $0x78] sm:$0xff]   ;;  %v4466_v52 = vrot.slane %v8691_v26, 5  ;;  %v2295_v7 = vshll.u32 %v5399_v4, 16  ;;  %v4547_v18 = vrot.slane %v8132_v14, 5 }
 0x129   : > { %v5716_v51 = vcombine.low %v8262_v43, %v8269_v24  ;;  %v8300_v13 = vsel %vm7005_vm6, %v4542_v20, %v4543_v29  ;;  %v4550_v8 = vrot.slane %v8180_v53, 5  ;;  %v2301_v48 = vshll.u32 %v6674_v6, 16  ;;  %v6622_v29 = vld [vmem:[%s6752_s30 + $0x90] sm:$0xff]   ;;  %v6623_v20 = vld [vmem:[%s6752_s30 + $0x9c] sm:$0xff]  }
 0x12a   : > { %v5717_v31 = vcombine.low %v8293_v19, %v8300_v13  ;;  %v8317_v14 = vsel %vm7005_vm6, %v5702_v40, %v4547_v18  ;;  %v4549_v53 = vrot.slane %v4547_v18, 4  ;;  %v5408_v18 = vld [vmem:[%s6752_s30 + $0x90] sm:$0xf]  ;;  %v2479_v50 = vshll.u32 %v6687_v61, 16 }
 0x12b   : > { %v2303_v59 = vrot.slane %v2301_v48, 5 }
 0x12c   : > { %6253 = vmatmul.mubr.msk.bf16.gmra.mrb[28].mxu0 %vm702_vm3, %v5652_v3  ;;  %v5704_v3 = vcombine.low %v4450_v16, %v4453_v28  ;;  %v4467_v28 = vsel %vm7005_vm6, %v4465_v44, %v4466_v52 }
 0x12d   : > { %6093 = vmatmul.mubr.msk.bf16.gmra.mrb[12].mxu1 %vm702_vm3, %v6618_v38  ;;  %6260 = vmatprep.mubr.msk.bf16.mxu0 %vm702_vm3, %v5703_v63  ;;  %v5705_v38 = vcombine.low %v4457_v21, %v4460_v55  ;;  %v5690_v63 = vrot.slane %v5674_v35, 9  ;;  %v2305_v21 = vshrl.u32 %v6674_v6, 16  ;;  %v2294_v55 = vrot.slane %v2292_v57, 4  ;;  %v6625_v6 = vld [vmem:[%s6752_s30 + $0xb4] sm:$0xff]  }
 0x12e   : > { %6096 = vmatprep.mubr.msk.bf16.mxu1 %vm702_vm3, %v6619_v22  ;;  %v6621_v22 = vld [vmem:[%s6752_s30 + $0x84] sm:$0xff]   ;;  %v2297_v35 = vrot.slane %v2295_v7, 5 }
 0x12f   : > { %v4464_v16 = vsel %vm7005_vm6, %v5690_v63, %v4463_v11  ;;  %v8321_v11 = vsel %vm7005_vm6, %v4549_v53, %v4550_v8  ;;  %v6675_v63 = vld [vmem:[%s6752_s30 + $0x74] sm:$0x1]  ;;  %v6624_v8 = vld [vmem:[%s6752_s30 + $0xa8] sm:$0xff]   ;;  %v2364_v53 = vshrl.u32 %v5408_v18, 16 }
 0x130   : > { %v5706_v12 = vcombine.low %v4464_v16, %v4467_v28  ;;  %v5718_v4 = vcombine.low %v8317_v14, %v8321_v11  ;;  %v2311_v44 = vshll.u32 %v6675_v63, 16  ;;  %v5411_v28 = vld [vmem:[%s6752_s30 + $0x9c] sm:$0xf]  ;;  %v6679_v63 = vld [vmem:[%s6752_s30 + $0x8c] sm:$0x1] }
 0x132   : > { %v2313_v49 = vrot.slane %v2311_v44, 5  ;;  %v2359_v44 = vshll.u32 %v6679_v63, 16 }
 0x134   : > { %6261 = vmatmul.mubr.msk.bf16.vlgmr.msra.gmra.mrb[0].mxu0 %vm702_vm3, %v5704_v3  ;;  %v2307_v3 = vrot.slane %v2305_v21, 4 }
 0x135   : > { %6097 = vmatmul.mubr.msk.bf16.gmra.mrb[16].mxu1 %vm702_vm3, %v6620_v56  ;;  %6264 = vmatprep.mubr.msk.bf16.mxu0 %vm702_vm3, %v5705_v38  ;;  %v5405_v56 = vld [vmem:[%s6752_s30 + $0x84] sm:$0xf]  ;;  %v2298_v38 = vor.u32 %v2297_v35, %v2294_v55  ;;  %v2367_v55 = vshll.u32 %v5408_v18, 16 }
 0x136   : > { %6100 = vmatprep.mubr.msk.bf16.mxu1 %vm702_vm3, %v6621_v22  ;;  %v2308_v2 = vor.u32 %v2307_v3, %v2303_v59  ;;  %v2340_v26 = vshrl.u32 %v5405_v56, 16  ;;  %v2343_v52 = vshll.u32 %v5405_v56, 16  ;;  %v6676_v22 = vld [vmem:[%s6752_s30 + $0x88] sm:$0xf]  ;;  %v2391_v56 = vshll.u32 %v5411_v28, 16 }
 0x137   : > { %v2349_v40 = vshll.u32 %v6676_v22, 16  ;;  %v2353_v57 = vshrl.u32 %v6676_v22, 16  ;;  %v2299_v7 = vrot.slane %v2298_v38, 4  ;;  %v2397_v38 = vshll.u32 %v6678_v58, 16 }
 0x138   : > { %v2309_v16 = vrot.slane %v2308_v2, 4  ;;  %v2342_v33 = vrot.slane %v2340_v26, 4  ;;  %v2366_v26 = vrot.slane %v2364_v53, 4  ;;  %v2369_v25 = vrot.slane %v2367_v55, 5  ;;  %v6681_v55 = vld [vmem:[%s6752_s30 + $0xa4] sm:$0x1] }
 0x139   : > { %v8341_v48 = vrot.slane %v2349_v40, 5  ;;  %v2355_v21 = vrot.slane %v2353_v57, 4  ;;  %v2304_v35 = vsel %vm6777_vm2, %v2299_v7, %v2303_v59  ;;  %v2393_v22 = vrot.slane %v2391_v56, 5  ;;  %v6626_v40 = vld [vmem:[%s6752_s30 + $0xc0] sm:$0xff]  }
 0x13a   : > { %v2314_v59 = vsel %vm6777_vm2, %v2309_v16, %v2313_v49  ;;  %v8364_v18 = vrot.slane %v2397_v38, 5  ;;  %v5414_v16 = vld [vmem:[%s6752_s30 + $0xa8] sm:$0xf] }
 0x13b   : > { %v2356_v2 = vor.u32 %v2355_v21, %v8341_v48  ;;  %v5431_v57 = vcombine.low %v2304_v35, %v2314_v59  ;;  %v2407_v35 = vshll.u32 %v6681_v55, 16  ;;  %v2415_v34 = vshll.u32 %v5414_v16, 16 }
 0x13c   : > { %6265 = vmatmul.mubr.msk.bf16.gmra.mrb[4].mxu0 %vm702_vm3, %v5706_v12  ;;  %v6677_v12 = vld [vmem:[%s6752_s30 + $0x94] sm:$0xf] }
 0x13d   : > { %6101 = vmatmul.mubr.msk.bf16.gmra.mrb[20].mxu1 %vm702_vm3, %v6622_v29  ;;  %6268 = vmatprep.mubr.msk.bf16.mxu0 %vm702_vm3, %v5707_v54  ;;  %v2345_v54 = vrot.slane %v2343_v52, 5  ;;  %v2373_v29 = vshll.u32 %v6677_v12, 16  ;;  %v2377_v3 = vshrl.u32 %v6677_v12, 16  ;;  %v2357_v49 = vrot.slane %v2356_v2, 4 }
 0x13e   : > { %6104 = vmatprep.mubr.msk.bf16.mxu1 %vm702_vm3, %v6623_v20  ;;  %v2388_v20 = vshrl.u32 %v5411_v28, 16  ;;  %v6680_v28 = vld [vmem:[%s6752_s30 + $0x98] sm:$0x1]  ;;  %v2412_v12 = vshrl.u32 %v5414_v16, 16  ;;  %v5420_v16 = vld [vmem:[%s6752_s30 + $0xc0] sm:$0xf] }
 0x13f   : > { %v2346_v0 = vor.u32 %v2345_v54, %v2342_v33  ;;  %v8361_v23 = vrot.slane %v2373_v29, 5  ;;  %v2361_v33 = vrot.slane %v2359_v44, 5  ;;  %v2370_v54 = vor.u32 %v2369_v25, %v2366_v26  ;;  %v5417_v29 = vld [vmem:[%s6752_s30 + $0xb4] sm:$0xf] }
 0x140   : > { %v2390_v52 = vrot.slane %v2388_v20, 4  ;;  %v2425_v20 = vshrl.u32 %v6682_v17, 16  ;;  %v2436_v62 = vshrl.u32 %v5417_v29, 16  ;;  %v2439_v60 = vshll.u32 %v5417_v29, 16 }
 0x141   : > { %v2347_v7 = vrot.slane %v2346_v0, 4  ;;  %v2362_v59 = vsel %vm6777_vm2, %v2357_v49, %v2361_v33  ;;  %v2371_v0 = vrot.slane %v2370_v54, 4  ;;  %v2409_v44 = vrot.slane %v2407_v35, 5 }
 0x142   : > { %v2394_v53 = vor.u32 %v2393_v22, %v2390_v52  ;;  %v2414_v26 = vrot.slane %v2412_v12, 4  ;;  %v2427_v22 = vrot.slane %v2425_v20, 4  ;;  %v6686_v12 = vld [vmem:[%s6752_s30 + $0xbc] sm:$0x1] }
 0x143   : > { %v2352_v56 = vsel %vm6777_vm2, %v2347_v7, %v8341_v48  ;;  %v2376_v49 = vsel %vm6777_vm2, %v2371_v0, %v8361_v23  ;;  %v2455_v46 = vshll.u32 %v6686_v12, 16 }
 0x144   : > { %6269 = vmatmul.mubr.msk.bf16.gmra.mrb[8].mxu0 %vm702_vm3, %v5708_v47  ;;  %v2401_v47 = vshrl.u32 %v6678_v58, 16  ;;  %v2395_v63 = vrot.slane %v2394_v53, 4  ;;  %v5433_v48 = vcombine.low %v2352_v56, %v2362_v59 }
 0x145   : > { %6105 = vmatmul.mubr.msk.bf16.gmra.mrb[24].mxu1 %vm702_vm3, %v6624_v8  ;;  %6272 = vmatprep.mubr.msk.bf16.mxu0 %vm702_vm3, %v5709_v36  ;;  %v2379_v36 = vrot.slane %v2377_v3, 4 }
 0x146   : > { %6108 = vmatprep.mubr.msk.bf16.mxu1 %vm702_vm3, %v6625_v6  ;;  %v2403_v8 = vrot.slane %v2401_v47, 4  ;;  %v2383_v6 = vshll.u32 %v6680_v28, 16  ;;  %v2400_v54 = vsel %vm6777_vm2, %v2395_v63, %v8364_v18  ;;  %v2481_v63 = vrot.slane %v2479_v50, 5 }
 0x147   : > { %v2380_v21 = vor.u32 %v2379_v36, %v8361_v23  ;;  %v2417_v36 = vrot.slane %v2415_v34, 5  ;;  %v6684_v23 = vld [vmem:[%s6752_s30 + $0xb0] sm:$0x1] }
 0x148   : > { %v2404_v3 = vor.u32 %v2403_v8, %v8364_v18  ;;  %v2385_v58 = vrot.slane %v2383_v6, 5  ;;  %v2431_v28 = vshll.u32 %v6684_v23, 16  ;;  %v2460_v6 = vshrl.u32 %v5420_v16, 16 }
 0x149   : > { %v2381_v2 = vrot.slane %v2380_v21, 4  ;;  %v2418_v15 = vor.u32 %v2417_v36, %v2414_v26  ;;  %v2463_v18 = vshll.u32 %v5420_v16, 16  ;;  %v6685_v21 = vld [vmem:[%s6752_s30 + $0xc4] sm:$0xf] }
 0x14a   : > { %v2405_v25 = vrot.slane %v2404_v3, 4  ;;  %v2469_v53 = vshll.u32 %v6685_v21, 16  ;;  %v2473_v55 = vshrl.u32 %v6685_v21, 16  ;;  %v2433_v34 = vrot.slane %v2431_v28, 5 }
 0x14b   : > { %v2386_v33 = vsel %vm6777_vm2, %v2381_v2, %v2385_v58  ;;  %v2419_v29 = vrot.slane %v2418_v15, 4  ;;  %v2457_v58 = vrot.slane %v2455_v46, 5 }
 0x14c   : > { %6273 = vmatmul.mubr.msk.bf16.gmra.mrb[12].mxu0 %vm702_vm3, %v5710_v39  ;;  %v2421_v39 = vshll.u32 %v6682_v17, 16  ;;  %v2410_v1 = vsel %vm6777_vm2, %v2405_v25, %v2409_v44  ;;  %v5434_v37 = vcombine.low %v2376_v49, %v2386_v33  ;;  %v2462_v17 = vrot.slane %v2460_v6, 4  ;;  %v8474_v33 = vld [vmem:[%s8623_s3] ss:$0 sm:$0xff] }
 0x14d   : > { %6109 = vmatmul.mubr.msk.bf16.gmra.mrb[28].mxu1 %vm702_vm3, %v6626_v40  ;;  %6276 = vmatprep.mubr.msk.bf16.mxu0 %vm702_vm3, %v5711_v9  ;;  %v6683_v9 = vld [vmem:[%s6752_s30 + $0xb8] sm:$0xf]  ;;  %v2438_v40 = vrot.slane %v2436_v62, 4  ;;  %v2471_v20 = vrot.slane %v2469_v53, 5  ;;  %v2475_v56 = vrot.slane %v2473_v55, 4 }
 0x14e   : > { %6132 = vmatprep.mubr.msk.bf16.mxu1 %vm702_vm3, %v5431_v57  ;;  %v2445_v38 = vshll.u32 %v6683_v9, 16  ;;  %v2449_v47 = vshrl.u32 %v6683_v9, 16  ;;  %v2423_v52 = vrot.slane %v2421_v39, 5  ;;  %v2441_v57 = vrot.slane %v2439_v60, 5 }
 0x14f   : > { %v2465_v39 = vrot.slane %v2463_v18, 5 }
 0x150   : > { %v2447_v7 = vrot.slane %v2445_v38, 5  ;;  %v2451_v8 = vrot.slane %v2449_v47, 4  ;;  %v2424_v62 = vsel %vm6777_vm2, %v2419_v29, %v2423_v52  ;;  %v2476_v38 = vor.u32 %v2475_v56, %v2471_v20 }
 0x151   : > { %v2466_v9 = vor.u32 %v2465_v39, %v2462_v17 }
 0x152   : > { %v2452_v35 = vor.u32 %v2451_v8, %v2447_v7  ;;  %v2477_v2 = vrot.slane %v2476_v38, 4  ;;  %v8469_v8 = vld [vmem:[%s8622_s2] ss:$0 sm:$0xff] }
 0x153   : > { %v2467_v47 = vrot.slane %v2466_v9, 4 }
 0x154   : > { %6277 = vmatmul.mubr.msk.bf16.gmra.mrb[16].mxu0 %vm702_vm3, %v5712_v41  ;;  %v2428_v41 = vor.u32 %v2427_v22, %v2423_v52  ;;  %v2453_v0 = vrot.slane %v2452_v35, 4  ;;  %v2482_v26 = vsel %vm6777_vm2, %v2477_v2, %v2481_v63 }
 0x155   : > { %6133 = vmatmul.mubr.msk.bf16.vlgmr.msra.gmra.mrb[16].mxu1 %vm702_vm3, %v8167_v10  ;;  %6280 = vmatprep.mubr.msk.bf16.mxu0 %vm702_vm3, %v5713_v32  ;;  %v2442_v10 = vor.u32 %v2441_v57, %v2438_v40  ;;  %v5435_v32 = vcombine.low %v2400_v54, %v2410_v1  ;;  %v2472_v44 = vsel %vm6777_vm2, %v2467_v47, %v2471_v20 }
 0x156   : > { %6136 = vmatprep.mubr.msk.bf16.mxu1 %vm702_vm3, %v5433_v48  ;;  %v2429_v3 = vrot.slane %v2428_v41, 4  ;;  %v2458_v45 = vsel %vm6777_vm2, %v2453_v0, %v2457_v58  ;;  %v5438_v25 = vcombine.low %v2472_v44, %v2482_v26 }
 0x157   : > { %v2443_v59 = vrot.slane %v2442_v10, 4 }
 0x158   : > { %v2434_v60 = vsel %vm6777_vm2, %v2429_v3, %v2433_v34 }
 0x159   : > { %v5436_v27 = vcombine.low %v2424_v62, %v2434_v60 }
 0x15c   : > { %6281 = vmatmul.mubr.msk.bf16.gmra.mrb[20].mxu0 %vm702_vm3, %v5714_v42  ;;  %v2448_v42 = vsel %vm6777_vm2, %v2443_v59, %v2447_v7 }
 0x15d   : > { %6137 = vmatmul.mubr.msk.bf16.gmra.mrb[20].mxu1 %vm702_vm3, %v5434_v37  ;;  %6284 = vmatprep.mubr.msk.bf16.mxu0 %vm702_vm3, %v5715_v5  ;;  %v5437_v5 = vcombine.low %v2448_v42, %v2458_v45 }
 0x15e   : > { %6140 = vmatprep.mubr.msk.bf16.mxu1 %vm702_vm3, %v5435_v32 }
 0x164   : > { %6285 = vmatmul.mubr.msk.bf16.gmra.mrb[24].mxu0 %vm702_vm3, %v5716_v51 }
 0x165   : > { %6141 = vmatmul.mubr.msk.bf16.gmra.mrb[24].mxu1 %vm702_vm3, %v5436_v27  ;;  %6288 = vmatprep.mubr.msk.bf16.mxu0 %vm702_vm3, %v5717_v31 }
 0x166   : > { %6144 = vmatprep.mubr.msk.bf16.mxu1 %vm702_vm3, %v5437_v5 }
 0x16c   : > { %6289 = vmatmul.mubr.msk.bf16.gmra.mrb[28].mxu0 %vm702_vm3, %v5718_v4 }
 0x16d   : > { %6145 = vmatmul.mubr.msk.bf16.gmra.mrb[28].mxu1 %vm702_vm3, %v5438_v25 }
 0x1e8   : > { %v6082_v43 = vpop.f32.mrb[0].mxu1 }
 0x1e9   : > { %v1892_v24 = vpop.f32.mrb[1].mxu1 }
 0x1ea   : > { %v6083_v51 = vpop.f32.mrb[2].mxu1 }
 0x1eb   : > { %v1895_v19 = vpop.f32.mrb[3].mxu1 }
 0x1f0   : > { %v6086_v13 = vpop.f32.mrb[4].mxu1 }
 0x1f1   : > { %v1908_v31 = vpop.f32.mrb[5].mxu1 }
 0x1f2   : > { %v6087_v36 = vpop.f32.mrb[6].mxu1 }
 0x1f3   : > { %v1911_v52 = vpop.f32.mrb[7].mxu1 }
 0x1f8   : > { %v6090_v22 = vpop.f32.mrb[8].mxu1 }
 0x1f9   : > { %v8452_v48 = vpop.f32.mrb[9].mxu1 }
 0x1fa   : > { %v8454_v30 = vpop.f32.mrb[10].mxu1 }
 0x1fb   : > { %v8456_v40 = vpop.f32.mrb[11].mxu1 }
 0x200   : > { %v8458_v14 = vpop.f32.mrb[12].mxu1 }
 0x201   : > { %v8460_v11 = vpop.f32.mrb[13].mxu1 }
 0x202   : > { %v8462_v4 = vpop.f32.mrb[14].mxu1 }
 0x203   : > { %v8464_v57 = vpop.f32.mrb[15].mxu1 }
 0x207   : > { %v6262_v7 = vpop.f32.mrb[0].mxu0 }
 0x208   : > { %v6296_v16 = vadd.f32 %v6262_v7, %v6082_v43  ;;  %v4698_v49 = vpop.f32.mrb[1].mxu0 }
 0x209   : > { %v6297_v54 = vadd.f32 %v4698_v49, %v1892_v24  ;;  %v6263_v1 = vpop.f32.mrb[2].mxu0 }
 0x20a   : > { %v4866_v15 = vmul.f32 %v6296_v16, %v8469_v8  ;;  %v6298_v41 = vadd.f32 %v6263_v1, %v6083_v51  ;;  %v4701_v23 = vpop.f32.mrb[3].mxu0 }
 0x20b   : > { %v4864_v28 = vmul.f32 %v6297_v54, %v8469_v8  ;;  %v6299_v6 = vadd.f32 %v4701_v23, %v1895_v19 }
 0x20c   : > { %v4905_v18 = vadd.f32 %v8474_v33, %v4866_v15  ;;  %v4867_v21 = vmul.f32 %v6298_v41, %v8469_v8 }
 0x20d   : > { %v4903_v53 = vadd.f32 %v8474_v33, %v4864_v28  ;;  %v4865_v55 = vmul.f32 %v6299_v6, %v8469_v8 }
 0x20e   : > { %v4937_v10 = vmax.f32 %v4905_v18, 0.0  ;;  %v4906_v35 = vadd.f32 %v8474_v33, %v4867_v21 }
 0x20f   : > { %v4935_v12 = vmax.f32 %v4903_v53, 0.0  ;;  %v4904_v46 = vadd.f32 %v8474_v33, %v4865_v55  ;;  %v6266_v37 = vpop.f32.mrb[4].mxu0 }
 0x210   : > { %v5776_v32 = vpack.c.bf16 %v4937_v10, %v4937_v10  ;;  %v4938_v29 = vmax.f32 %v4906_v35, 0.0  ;;  %v6300_v3 = vadd.f32 %v6266_v37, %v6086_v13  ;;  %v4714_v34 = vpop.f32.mrb[5].mxu0 }
 0x211   : > { %v5774_v17 = vpack.c.bf16 %v4935_v12, %v4935_v12  ;;  %v4936_v39 = vmax.f32 %v4904_v46, 0.0  ;;  %v6301_v20 = vadd.f32 %v4714_v34, %v1908_v31  ;;  %v6267_v56 = vpop.f32.mrb[6].mxu0 }
 0x212   : > { %5098 = vst.msk [vmem:[%s8487_s22 + $0x8] sm:$0xf] %vm5095_vm7, %v5776_v32  ;;  %v5777_v59 = vpack.c.bf16 %v4938_v29, %v4938_v29  ;;  %v4870_v0 = vmul.f32 %v6300_v3, %v8469_v8  ;;  %v6302_v58 = vadd.f32 %v6267_v56, %v6087_v36  ;;  %v4717_v62 = vpop.f32.mrb[7].mxu0 }
 0x213   : > { %5096 = vst.msk [vmem:[%s8487_s22] sm:$0xf] %vm5095_vm7, %v5774_v17  ;;  %v5775_v60 = vpack.c.bf16 %v4936_v39, %v4936_v39  ;;  %v4868_v9 = vmul.f32 %v6301_v20, %v8469_v8  ;;  %v6303_v38 = vadd.f32 %v4717_v62, %v1911_v52 }
 0x214   : > { %5099 = vst.msk [vmem:[%s8487_s22 + $0xc] sm:$0xf] %vm5095_vm7, %v5777_v59  ;;  %v4909_v61 = vadd.f32 %v8474_v33, %v4870_v0  ;;  %v4871_v50 = vmul.f32 %v6302_v58, %v8469_v8 }
 0x215   : > { %5097 = vst.msk [vmem:[%s8487_s22 + $0x4] sm:$0xf] %vm5095_vm7, %v5775_v60  ;;  %v4907_v42 = vadd.f32 %v8474_v33, %v4868_v9  ;;  %v4869_v45 = vmul.f32 %v6303_v38, %v8469_v8 }
 0x216   : > { %v4941_v27 = vmax.f32 %v4909_v61, 0.0  ;;  %v4910_v5 = vadd.f32 %v8474_v33, %v4871_v50 }
 0x217   : > { %v4939_v47 = vmax.f32 %v4907_v42, 0.0  ;;  %v4908_v2 = vadd.f32 %v8474_v33, %v4869_v45  ;;  %v6270_v63 = vpop.f32.mrb[8].mxu0 }
 0x218   : > { %v5780_v44 = vpack.c.bf16 %v4941_v27, %v4941_v27  ;;  %v4942_v26 = vmax.f32 %v4910_v5, 0.0  ;;  %v6304_v25 = vadd.f32 %v6270_v63, %v6090_v22  ;;  %v4730_v43 = vpop.f32.mrb[9].mxu0 }
 0x219   : > { %v5778_v24 = vpack.c.bf16 %v4939_v47, %v4939_v47  ;;  %v4940_v51 = vmax.f32 %v4908_v2, 0.0  ;;  %v6305_v19 = vadd.f32 %v4730_v43, %v8452_v48  ;;  %v6271_v13 = vpop.f32.mrb[10].mxu0 }
 0x21a   : > { %5102 = vst.msk [vmem:[%s8487_s22 + $0x18] sm:$0xf] %vm5095_vm7, %v5780_v44  ;;  %v5781_v31 = vpack.c.bf16 %v4942_v26, %v4942_v26  ;;  %v4874_v36 = vmul.f32 %v6304_v25, %v8469_v8  ;;  %v6306_v52 = vadd.f32 %v6271_v13, %v8454_v30  ;;  %v4733_v7 = vpop.f32.mrb[11].mxu0 }
 0x21b   : > { %5100 = vst.msk [vmem:[%s8487_s22 + $0x10] sm:$0xf] %vm5095_vm7, %v5778_v24  ;;  %v5779_v16 = vpack.c.bf16 %v4940_v51, %v4940_v51  ;;  %v4872_v22 = vmul.f32 %v6305_v19, %v8469_v8  ;;  %v6307_v49 = vadd.f32 %v4733_v7, %v8456_v40 }
 0x21c   : > { %5103 = vst.msk [vmem:[%s8487_s22 + $0x1c] sm:$0xf] %vm5095_vm7, %v5781_v31  ;;  %v4913_v48 = vadd.f32 %v8474_v33, %v4874_v36  ;;  %v4875_v54 = vmul.f32 %v6306_v52, %v8469_v8 }
 0x21d   : > { %5101 = vst.msk [vmem:[%s8487_s22 + $0x14] sm:$0xf] %vm5095_vm7, %v5779_v16  ;;  %v4911_v1 = vadd.f32 %v8474_v33, %v4872_v22  ;;  %v4873_v30 = vmul.f32 %v6307_v49, %v8469_v8 }
 0x21e   : > { %v4945_v15 = vmax.f32 %v4913_v48, 0.0  ;;  %v4914_v41 = vadd.f32 %v8474_v33, %v4875_v54 }
 0x21f   : > { %v4943_v23 = vmax.f32 %v4911_v1, 0.0  ;;  %v4912_v40 = vadd.f32 %v8474_v33, %v4873_v30  ;;  %v6274_v28 = vpop.f32.mrb[12].mxu0 }
 0x220   : > { %v5784_v6 = vpack.c.bf16 %v4945_v15, %v4945_v15  ;;  %v4946_v18 = vmax.f32 %v4914_v41, 0.0  ;;  %v6308_v21 = vadd.f32 %v6274_v28, %v8458_v14  ;;  %v4746_v53 = vpop.f32.mrb[13].mxu0 }
 0x221   : > { %v5782_v55 = vpack.c.bf16 %v4943_v23, %v4943_v23  ;;  %v4944_v10 = vmax.f32 %v4912_v40, 0.0  ;;  %v6309_v35 = vadd.f32 %v4746_v53, %v8460_v11  ;;  %v6275_v12 = vpop.f32.mrb[14].mxu0 }
 0x222   : > { %5106 = vst.msk [vmem:[%s8487_s22 + $0x28] sm:$0xf] %vm5095_vm7, %v5784_v6  ;;  %v5785_v46 = vpack.c.bf16 %v4946_v18, %v4946_v18  ;;  %v4878_v37 = vmul.f32 %v6308_v21, %v8469_v8  ;;  %v6310_v32 = vadd.f32 %v6275_v12, %v8462_v4  ;;  %v4749_v29 = vpop.f32.mrb[15].mxu0 }
 0x223   : > { %5104 = vst.msk [vmem:[%s8487_s22 + $0x20] sm:$0xf] %vm5095_vm7, %v5782_v55  ;;  %v5783_v3 = vpack.c.bf16 %v4944_v10, %v4944_v10  ;;  %v4876_v14 = vmul.f32 %v6309_v35, %v8469_v8  ;;  %v6311_v34 = vadd.f32 %v4749_v29, %v8464_v57 }
 0x224   : > { %5107 = vst.msk [vmem:[%s8487_s22 + $0x2c] sm:$0xf] %vm5095_vm7, %v5785_v46  ;;  %v4917_v11 = vadd.f32 %v8474_v33, %v4878_v37  ;;  %v4879_v17 = vmul.f32 %v6310_v32, %v8469_v8 }
 0x225   : > { %5105 = vst.msk [vmem:[%s8487_s22 + $0x24] sm:$0xf] %vm5095_vm7, %v5783_v3  ;;  %v4915_v39 = vadd.f32 %v8474_v33, %v4876_v14  ;;  %v4877_v4 = vmul.f32 %v6311_v34, %v8469_v8 }
 0x226   : > { %v4949_v20 = vmax.f32 %v4917_v11, 0.0  ;;  %v4918_v56 = vadd.f32 %v8474_v33, %v4879_v17 }
 0x227   : > { %v4947_v59 = vmax.f32 %v4915_v39, 0.0  ;;  %v4916_v0 = vadd.f32 %v8474_v33, %v4877_v4  ;;  %v6278_v57 = vpop.f32.mrb[16].mxu0 }
 0x228   : > { %v5788_v58 = vpack.c.bf16 %v4949_v20, %v4949_v20  ;;  %v4950_v62 = vmax.f32 %v4918_v56, 0.0  ;;  %v6134_v60 = vpop.f32.mrb[16].mxu1  ;;  %v4762_v9 = vpop.f32.mrb[17].mxu0 }
 0x229   : > { %v5786_v38 = vpack.c.bf16 %v4947_v59, %v4947_v59  ;;  %v4948_v61 = vmax.f32 %v4916_v0, 0.0  ;;  %v6312_v50 = vadd.f32 %v6278_v57, %v6134_v60  ;;  %v2693_v42 = vpop.f32.mrb[17].mxu1  ;;  %v6279_v45 = vpop.f32.mrb[18].mxu0 }
 0x22a   : > { %5110 = vst.msk [vmem:[%s8487_s22 + $0x38] sm:$0xf] %vm5095_vm7, %v5788_v58  ;;  %v5789_v27 = vpack.c.bf16 %v4950_v62, %v4950_v62  ;;  %v6313_v5 = vadd.f32 %v4762_v9, %v2693_v42  ;;  %v6135_v47 = vpop.f32.mrb[18].mxu1  ;;  %v4765_v2 = vpop.f32.mrb[19].mxu0 }
 0x22b   : > { %5108 = vst.msk [vmem:[%s8487_s22 + $0x30] sm:$0xf] %vm5095_vm7, %v5786_v38  ;;  %v5787_v63 = vpack.c.bf16 %v4948_v61, %v4948_v61  ;;  %v4882_v44 = vmul.f32 %v6312_v50, %v8469_v8  ;;  %v6314_v26 = vadd.f32 %v6279_v45, %v6135_v47  ;;  %v2696_v25 = vpop.f32.mrb[19].mxu1 }
 0x22c   : > { %5111 = vst.msk [vmem:[%s8487_s22 + $0x3c] sm:$0xf] %vm5095_vm7, %v5789_v27  ;;  %v4880_v43 = vmul.f32 %v6313_v5, %v8469_v8  ;;  %v6315_v24 = vadd.f32 %v4765_v2, %v2696_v25 }
 0x22d   : > { %5109 = vst.msk [vmem:[%s8487_s22 + $0x34] sm:$0xf] %vm5095_vm7, %v5787_v63  ;;  %v4921_v51 = vadd.f32 %v8474_v33, %v4882_v44  ;;  %v4883_v19 = vmul.f32 %v6314_v26, %v8469_v8 }
 0x22e   : > { %v4919_v13 = vadd.f32 %v8474_v33, %v4880_v43  ;;  %v4881_v31 = vmul.f32 %v6315_v24, %v8469_v8 }
 0x22f   : > { %v4953_v36 = vmax.f32 %v4921_v51, 0.0  ;;  %v4922_v52 = vadd.f32 %v8474_v33, %v4883_v19  ;;  %v6282_v7 = vpop.f32.mrb[20].mxu0 }
 0x230   : > { %v4951_v16 = vmax.f32 %v4919_v13, 0.0  ;;  %v4920_v22 = vadd.f32 %v8474_v33, %v4881_v31  ;;  %v6138_v49 = vpop.f32.mrb[20].mxu1  ;;  %v4778_v48 = vpop.f32.mrb[21].mxu0 }
 0x231   : > { %v5792_v54 = vpack.c.bf16 %v4953_v36, %v4953_v36  ;;  %v4954_v1 = vmax.f32 %v4922_v52, 0.0  ;;  %v6316_v30 = vadd.f32 %v6282_v7, %v6138_v49  ;;  %v2709_v15 = vpop.f32.mrb[21].mxu1  ;;  %v6283_v41 = vpop.f32.mrb[22].mxu0 }
 0x232   : > { %v5790_v23 = vpack.c.bf16 %v4951_v16, %v4951_v16  ;;  %v4952_v40 = vmax.f32 %v4920_v22, 0.0  ;;  %v6317_v28 = vadd.f32 %v4778_v48, %v2709_v15  ;;  %v6139_v6 = vpop.f32.mrb[22].mxu1  ;;  %v4781_v18 = vpop.f32.mrb[23].mxu0 }
 0x233   : > { %5114 = vst.msk [vmem:[%s8487_s22 + $0x48] sm:$0xf] %vm5095_vm7, %v5792_v54  ;;  %v5793_v21 = vpack.c.bf16 %v4954_v1, %v4954_v1  ;;  %v4886_v53 = vmul.f32 %v6316_v30, %v8469_v8  ;;  %v6318_v55 = vadd.f32 %v6283_v41, %v6139_v6  ;;  %v2712_v10 = vpop.f32.mrb[23].mxu1 }
 0x234   : > { %5112 = vst.msk [vmem:[%s8487_s22 + $0x40] sm:$0xf] %vm5095_vm7, %v5790_v23  ;;  %v5791_v35 = vpack.c.bf16 %v4952_v40, %v4952_v40  ;;  %v4884_v12 = vmul.f32 %v6317_v28, %v8469_v8  ;;  %v6319_v46 = vadd.f32 %v4781_v18, %v2712_v10 }
 0x235   : > { %5115 = vst.msk [vmem:[%s8487_s22 + $0x4c] sm:$0xf] %vm5095_vm7, %v5793_v21  ;;  %v4925_v37 = vadd.f32 %v8474_v33, %v4886_v53  ;;  %v4887_v32 = vmul.f32 %v6318_v55, %v8469_v8 }
 0x236   : > { %5113 = vst.msk [vmem:[%s8487_s22 + $0x44] sm:$0xf] %vm5095_vm7, %v5791_v35  ;;  %v4923_v29 = vadd.f32 %v8474_v33, %v4884_v12  ;;  %v4885_v3 = vmul.f32 %v6319_v46, %v8469_v8 }
 0x237   : > { %v4957_v14 = vmax.f32 %v4925_v37, 0.0  ;;  %v4926_v34 = vadd.f32 %v8474_v33, %v4887_v32  ;;  %v6286_v11 = vpop.f32.mrb[24].mxu0 }
 0x238   : > { %v4955_v17 = vmax.f32 %v4923_v29, 0.0  ;;  %v4924_v39 = vadd.f32 %v8474_v33, %v4885_v3  ;;  %v6142_v4 = vpop.f32.mrb[24].mxu1  ;;  %v4794_v20 = vpop.f32.mrb[25].mxu0 }
 0x239   : > { %v5796_v56 = vpack.c.bf16 %v4957_v14, %v4957_v14  ;;  %v4958_v59 = vmax.f32 %v4926_v34, 0.0  ;;  %v6320_v0 = vadd.f32 %v6286_v11, %v6142_v4  ;;  %v2725_v57 = vpop.f32.mrb[25].mxu1  ;;  %v6287_v58 = vpop.f32.mrb[26].mxu0 }
 0x23a   : > { %v5794_v62 = vpack.c.bf16 %v4955_v17, %v4955_v17  ;;  %v4956_v60 = vmax.f32 %v4924_v39, 0.0  ;;  %v6321_v9 = vadd.f32 %v4794_v20, %v2725_v57  ;;  %v6143_v38 = vpop.f32.mrb[26].mxu1  ;;  %v4797_v61 = vpop.f32.mrb[27].mxu0 }
 0x23b   : > { %5118 = vst.msk [vmem:[%s8487_s22 + $0x58] sm:$0xf] %vm5095_vm7, %v5796_v56  ;;  %v5797_v50 = vpack.c.bf16 %v4958_v59, %v4958_v59  ;;  %v4890_v42 = vmul.f32 %v6320_v0, %v8469_v8  ;;  %v6322_v45 = vadd.f32 %v6287_v58, %v6143_v38  ;;  %v2728_v27 = vpop.f32.mrb[27].mxu1 }
 0x23c   : > { %5116 = vst.msk [vmem:[%s8487_s22 + $0x50] sm:$0xf] %vm5095_vm7, %v5794_v62  ;;  %v5795_v5 = vpack.c.bf16 %v4956_v60, %v4956_v60  ;;  %v4888_v47 = vmul.f32 %v6321_v9, %v8469_v8  ;;  %v6323_v2 = vadd.f32 %v4797_v61, %v2728_v27 }
 0x23d   : > { %5119 = vst.msk [vmem:[%s8487_s22 + $0x5c] sm:$0xf] %vm5095_vm7, %v5797_v50  ;;  %v4929_v63 = vadd.f32 %v8474_v33, %v4890_v42  ;;  %v4891_v44 = vmul.f32 %v6322_v45, %v8469_v8 }
 0x23e   : > { %5117 = vst.msk [vmem:[%s8487_s22 + $0x54] sm:$0xf] %vm5095_vm7, %v5795_v5  ;;  %v4927_v26 = vadd.f32 %v8474_v33, %v4888_v47  ;;  %v4889_v25 = vmul.f32 %v6323_v2, %v8469_v8 }
 0x23f   : > { %v4961_v43 = vmax.f32 %v4929_v63, 0.0  ;;  %v4930_v24 = vadd.f32 %v8474_v33, %v4891_v44  ;;  %v6290_v51 = vpop.f32.mrb[28].mxu0 }
 0x240   : > { %v4959_v19 = vmax.f32 %v4927_v26, 0.0  ;;  %v4928_v13 = vadd.f32 %v8474_v33, %v4889_v25  ;;  %v6146_v31 = vpop.f32.mrb[28].mxu1  ;;  %v4810_v36 = vpop.f32.mrb[29].mxu0 }
 0x241   : > { %v5800_v52 = vpack.c.bf16 %v4961_v43, %v4961_v43  ;;  %v4962_v7 = vmax.f32 %v4930_v24, 0.0  ;;  %v6324_v16 = vadd.f32 %v6290_v51, %v6146_v31  ;;  %v2741_v22 = vpop.f32.mrb[29].mxu1  ;;  %v6291_v49 = vpop.f32.mrb[30].mxu0 }
 0x242   : > { %v5798_v48 = vpack.c.bf16 %v4959_v19, %v4959_v19  ;;  %v4960_v54 = vmax.f32 %v4928_v13, 0.0  ;;  %v6325_v1 = vadd.f32 %v4810_v36, %v2741_v22  ;;  %v6147_v30 = vpop.f32.mrb[30].mxu1  ;;  %v4813_v15 = vpop.f32.mrb[31].mxu0 }
 0x243   : > { %5122 = vst.msk [vmem:[%s8487_s22 + $0x68] sm:$0xf] %vm5095_vm7, %v5800_v52  ;;  %v5801_v41 = vpack.c.bf16 %v4962_v7, %v4962_v7  ;;  %v4894_v23 = vmul.f32 %v6324_v16, %v8469_v8  ;;  %v6326_v40 = vadd.f32 %v6291_v49, %v6147_v30  ;;  %v2744_v28 = vpop.f32.mrb[31].mxu1 }
 0x244   : > { %5120 = vst.msk [vmem:[%s8487_s22 + $0x60] sm:$0xf] %vm5095_vm7, %v5798_v48  ;;  %v5799_v6 = vpack.c.bf16 %v4960_v54, %v4960_v54  ;;  %v4892_v18 = vmul.f32 %v6325_v1, %v8469_v8  ;;  %v6327_v21 = vadd.f32 %v4813_v15, %v2744_v28 }
 0x245   : > { %5123 = vst.msk [vmem:[%s8487_s22 + $0x6c] sm:$0xf] %vm5095_vm7, %v5801_v41  ;;  %v4933_v53 = vadd.f32 %v8474_v33, %v4894_v23  ;;  %v4895_v55 = vmul.f32 %v6326_v40, %v8469_v8 }
 0x246   : > { %5121 = vst.msk [vmem:[%s8487_s22 + $0x64] sm:$0xf] %vm5095_vm7, %v5799_v6  ;;  %v4931_v10 = vadd.f32 %v8474_v33, %v4892_v18  ;;  %v4893_v35 = vmul.f32 %v6327_v21, %v8469_v8 }
 0x247   : > { %v4965_v12 = vmax.f32 %v4933_v53, 0.0  ;;  %v4934_v46 = vadd.f32 %v8474_v33, %v4895_v55 }
 0x248   : > { %v4963_v37 = vmax.f32 %v4931_v10, 0.0  ;;  %v4932_v32 = vadd.f32 %v8474_v33, %v4893_v35 }
 0x249   : > { %v5804_v29 = vpack.c.bf16 %v4965_v12, %v4965_v12  ;;  %v4966_v3 = vmax.f32 %v4934_v46, 0.0 }
 0x24a   : > { %v5802_v14 = vpack.c.bf16 %v4963_v37, %v4963_v37  ;;  %v4964_v34 = vmax.f32 %v4932_v32, 0.0 }
 0x24b   : > { %5126 = vst.msk [vmem:[%s8487_s22 + $0x78] sm:$0xf] %vm5095_vm7, %v5804_v29  ;;  %v5805_v11 = vpack.c.bf16 %v4966_v3, %v4966_v3 }
 0x24c   : > { %5124 = vst.msk [vmem:[%s8487_s22 + $0x70] sm:$0xf] %vm5095_vm7, %v5802_v14  ;;  %v5803_v17 = vpack.c.bf16 %v4964_v34, %v4964_v34 }
 0x24d   : > { %5127 = vst.msk [vmem:[%s8487_s22 + $0x7c] sm:$0xf] %vm5095_vm7, %v5805_v11 }
 0x24e   : > { %5125 = vst.msk [vmem:[%s8487_s22 + $0x74] sm:$0xf] %vm5095_vm7, %v5803_v17 }
 0x24f PF: > { %s14_s15 = sadd.s32 1, %s6694_s15  }
 0x250   : > { %p11_p4 = scmp.ge.s32.totalorder %s14_s15, 4  }
 0x252   :  { %13 = sbr.rel (!%p11_p4) target bundleno = 1 (0x1), region = 68 }

</bundles_post_ra>
